<compile_context>
chip_gen: v5e
topology: v5e:2x2
jax: 0.10.0
libtpu: 0.0.40
codegen_flags: <defaults>
</compile_context>

<pallas_src>
import functools

import numpy as np

import jax
import jax.numpy as jnp
from jax.experimental import pallas as pl
from jax.experimental.pallas import tpu as pltpu

LANE = 128


def _round_up(x, m):
    return (x + m - 1) // m * m


def _multi_tensorcore():
    """True on chips with >1 TensorCore (v4 / v5p / v7x); False on v5e/v6e."""
    try:
        kind = jax.devices()[0].device_kind.lower()
    except Exception:
        return False
    return any(t in kind for t in ("v4", "v5p", "v7", "7x"))


MULTI_TC = _multi_tensorcore()


def _pick_tiles(m):
    """Row tiling: one big tile on single-TC chips (grid steps are pure ~0.35us
    overhead there), two tiles on multi-TC chips so the 'parallel' axis feeds
    both TensorCores."""
    mp = _round_up(m, 8)
    if MULTI_TC and mp >= 16:
        tm = _round_up((mp + 1) // 2, 8)
        mp = _round_up(mp, tm)
    else:
        tm = mp
    return tm, mp


# ----------------------------- Pallas kernel ------------------------------ #

def _fused_matmul_kernel(a_ref, w_ref, shift_ref, o_ref, *, activation):
    """o = act(a @ w + shift) on one (tm, Np) lane-dense output tile (bf16 out)."""
    acc = jnp.dot(a_ref[...], w_ref[...], preferred_element_type=jnp.float32)
    y = acc + shift_ref[...]
    if activation == "relu":
        y = jnp.maximum(y, 0.0)
    elif activation == "tanh":
        y = jnp.tanh(y)
    o_ref[...] = y.astype(o_ref.dtype)


def fused_matmul(a, w_p, shift_p, activation, n_valid):
    """act(a @ w_p + shift_p)[:, :n_valid].

    a:       [M, K]  bf16 (K left unpadded: full-dim blocks are exempt from the
                           128-lane divisibility rule)
    w_p:     [K, Np] bf16, Np = round_up(N,128), prepacked (BN scale folded in)
    shift_p: [1, Np] f32 folded bias/BN shift
    """
    M, K = a.shape
    Kw, Np = w_p.shape
    assert Kw == K and Np % LANE == 0
    tm, Mp = _pick_tiles(M)
    a_p = a if Mp == M else jnp.pad(a, ((0, Mp - M), (0, 0)))

    cost = pl.CostEstimate(
        flops=2 * Mp * K * Np,
        transcendentals=Mp * Np if activation == "tanh" else 0,
        bytes_accessed=(Mp * K + K * Np + Mp * Np) * 2 + Np * 4,
    )
    out = pl.pallas_call(
        functools.partial(_fused_matmul_kernel, activation=activation),
        out_shape=jax.ShapeDtypeStruct((Mp, Np), jnp.bfloat16),
        grid_spec=pltpu.PrefetchScalarGridSpec(
            num_scalar_prefetch=0,
            grid=(Mp // tm,),
            in_specs=[
                pl.BlockSpec((tm, K), lambda i: (i, 0)),   # patch-row tile
                pl.BlockSpec((K, Np), lambda i: (0, 0)),   # prepacked weights
                pl.BlockSpec((1, Np), lambda i: (0, 0)),   # folded bias/BN shift
            ],
            out_specs=pl.BlockSpec((tm, Np), lambda i: (i, 0)),
        ),
        compiler_params=pltpu.CompilerParams(dimension_semantics=("parallel",)),
        cost_estimate=cost,
    )(a_p, w_p, shift_p)
    return out[:M, :n_valid]


# ------------------------------- JAX glue ---------------------------------- #

def _im2col(x, k, stride, pad):
    """x: [B,H,W,C] NHWC bf16 -> ([B*OH*OW, k*k*C], OH, OW); columns (kh,kw,c)."""
    # TODO(synk): could be done in-kernel via a tap grid axis + shifted BlockSpecs.
    B, H, W, C = x.shape
    xp = jnp.pad(x, ((0, 0), (pad, pad), (pad, pad), (0, 0)))
    OH = (H + 2 * pad - k) // stride + 1
    OW = (W + 2 * pad - k) // stride + 1
    cols = [xp[:, kh:kh + stride * OH:stride, kw:kw + stride * OW:stride, :]
            for kh in range(k) for kw in range(k)]
    patches = jnp.stack(cols, axis=3)                  # [B, OH, OW, k*k, C]
    return patches.reshape(B * OH * OW, k * k * C), OH, OW


def maxpool2d(x, k):
    # TODO(synk): could be fused into the preceding conv kernel's epilogue.
    B, H, W, C = x.shape
    return jnp.max(x.reshape(B, H // k, k, W // k, k, C), axis=(2, 4))


def conv2d(x, w_p, shift_p, n_out, k, stride, pad, activation):
    B = x.shape[0]
    a, OH, OW = _im2col(x, k, stride, pad)
    y = fused_matmul(a, w_p, shift_p, activation, n_out)
    return y.reshape(B, OH, OW, n_out)


def conv_transpose2d_s2(x, w_p, shift_p, n_out, activation):
    """k=4, stride=2, pad=1 ConvTranspose2d via sub-pixel phase decomposition:
    one stride-1 3x3 im2col + one matmul -> [B*H*W, 4*O], then interleave."""
    B, H, W, _ = x.shape
    a, _, _ = _im2col(x, 3, 1, 1)                                  # [B*H*W, 9*C]
    y = fused_matmul(a, w_p, shift_p, activation, 4 * n_out)       # [B*H*W, 4*O]
    y = y.reshape(B, H, W, 2, 2, n_out)                            # (..., a, b, o)
    y = jnp.transpose(y, (0, 1, 3, 2, 4, 5))                       # [B, H, 2, W, 2, O]
    return y.reshape(B, 2 * H, 2 * W, n_out)


# --------------------------- One-time prepacking ---------------------------- #

def _fold_bn(bias, bn, eps=1e-5):
    bias = np.asarray(bias, np.float32)
    if bn is None:
        return np.ones_like(bias), bias
    gamma, beta, mean, var = (np.asarray(t, np.float32) for t in bn)
    scale = gamma / np.sqrt(var + eps)
    shift = scale * (bias - mean) + beta
    return scale, shift


def _pack(wmat, scale_cols, shift_cols):
    """Fold per-column BN scale, pad N to 128 lanes, cast to (bf16 W, f32 shift)."""
    K, N = wmat.shape
    Np = _round_up(N, LANE)
    w = wmat * scale_cols[None, :]
    w = np.pad(w, ((0, 0), (0, Np - N)))
    s = np.pad(shift_cols, (0, Np - N)).astype(np.float32).reshape(1, Np)
    return jnp.asarray(w, jnp.bfloat16), jnp.asarray(s, jnp.float32)


def _conv_wmat(w):
    """PyTorch Conv2d weight [O,C,k,k] -> [k*k*C, O], rows ordered (kh, kw, c)."""
    O, C, k, _ = w.shape
    return np.transpose(np.asarray(w, np.float32), (2, 3, 1, 0)).reshape(k * k * C, O)


def _deconv_from_1x1_wmat(w):
    """ConvTranspose2d from a 1x1 input: weight [C,O,k,k] -> [C, k*k*O],
    columns ordered (kh, kw, o) so the matmul output reshapes directly to NHWC."""
    C, O, k, _ = w.shape
    return np.transpose(np.asarray(w, np.float32), (0, 2, 3, 1)).reshape(C, k * k * O)


# Sub-pixel decomposition of a k=4, s=2, p=1 ConvTranspose2d: output pixel
# (2m+a, 2l+b) is a stride-1 conv of a 3x3 (pad=1) window of the UNdilated
# input, using 2x2 taps of the original kernel.  (phase, tap) -> kernel index:
_PHASE_TAP_TO_KIDX = {(0, 0): 3, (0, 1): 1, (1, 1): 2, (1, 2): 0}


def _phase_wmat(w):
    """ConvTranspose2d weight [C,O,4,4] -> phase matrix [9*C, 4*O];
    rows ordered (tap_h, tap_w, c), columns ordered (phase_a, phase_b, o)."""
    w = np.asarray(w, np.float32)
    C, O = w.shape[0], w.shape[1]
    out = np.zeros((3, 3, C, 2, 2, O), np.float32)
    for a in range(2):
        for th in range(3):
            kh = _PHASE_TAP_TO_KIDX.get((a, th))
            if kh is None:
                continue
            for b in range(2):
                for tw in range(3):
                    kw = _PHASE_TAP_TO_KIDX.get((b, tw))
                    if kw is None:
                        continue
                    out[th, tw, :, a, b, :] = w[:, :, kh, kw]
    return out.reshape(9 * C, 4 * O)


def prepack_params(params):
    """One-time (outside jit) weight prepack: layout transforms, phase
    decomposition, BN folding, lane padding and bf16 casts hoisted out of the
    per-forward trace."""
    p = {}
    s, sh = _fold_bn(params["enc_conv1_b"], None)
    p["enc1_w"], p["enc1_s"] = _pack(_conv_wmat(params["enc_conv1_w"]), s, sh)

    s, sh = _fold_bn(params["enc_conv2_b"], params["enc_conv2_bn"])
    p["enc2_w"], p["enc2_s"] = _pack(_conv_wmat(params["enc_conv2_w"]), s, sh)

    s, sh = _fold_bn(params["dec1_b"], params["dec1_bn"])
    k2 = int(params["dec1_w"].shape[2]) ** 2                       # 7*7 = 49
    p["dec1_w"], p["dec1_s"] = _pack(_deconv_from_1x1_wmat(params["dec1_w"]),
                                     np.tile(s, k2), np.tile(sh, k2))

    for name, bn in (("dec2", params["dec2_bn"]),
                     ("dec3", params["dec3_bn"]),
                     ("dec4", None)):
        s, sh = _fold_bn(params[name + "_b"], bn)
        p[name + "_w"], p[name + "_s"] = _pack(_phase_wmat(params[name + "_w"]),
                                               np.tile(s, 4), np.tile(sh, 4))
    return p


# ----------------------------- Parameters ---------------------------------- #

def init_params(key, hidden_size=32):
    h = hidden_size
    keys = iter(jax.random.split(key, 32))

    def conv_w(o, c, k):
        return jax.random.normal(next(keys), (o, c, k, k), jnp.float32) / jnp.sqrt(c * k * k)

    def convT_w(c, o, k):
        return jax.random.normal(next(keys), (c, o, k, k), jnp.float32) / jnp.sqrt(c * k * k)

    def bias(n):
        return 0.01 * jax.random.normal(next(keys), (n,), jnp.float32)

    def bn(n):
        gamma = 1.0 + 0.1 * jax.random.normal(next(keys), (n,), jnp.float32)
        beta = 0.1 * jax.random.normal(next(keys), (n,), jnp.float32)
        mean = 0.1 * jax.random.normal(next(keys), (n,), jnp.float32)
        var = 1.0 + 0.1 * jnp.abs(jax.random.normal(next(keys), (n,), jnp.float32))
        return gamma, beta, mean, var

    p = {}
    p["enc_conv1_w"] = conv_w(h // 2, 1, 4);  p["enc_conv1_b"] = bias(h // 2)
    p["enc_conv2_w"] = conv_w(h, h // 2, 4);  p["enc_conv2_b"] = bias(h)
    p["enc_conv2_bn"] = bn(h)
    p["dec1_w"] = convT_w(h, 64, 7);  p["dec1_b"] = bias(64);  p["dec1_bn"] = bn(64)
    p["dec2_w"] = convT_w(64, 16, 4); p["dec2_b"] = bias(16);  p["dec2_bn"] = bn(16)
    p["dec3_w"] = convT_w(16, 8, 4);  p["dec3_b"] = bias(8);   p["dec3_bn"] = bn(8)
    p["dec4_w"] = convT_w(8, 1, 4);   p["dec4_b"] = bias(1)
    return p


# ------------------------------- Forward ------------------------------------ #

def autoencoder_forward(packed, img, hidden_size=32):
    h2, h = hidden_size // 2, hidden_size
    # NCHW (PyTorch interface) -> NHWC bf16 (lane-friendly, MXU-ready)
    x = jnp.transpose(img, (0, 2, 3, 1)).astype(jnp.bfloat16)

    # ---- encoder ----
    e = conv2d(x, packed["enc1_w"], packed["enc1_s"], h2,
               k=4, stride=2, pad=1, activation="relu")             # [B,28,28,16]
    e = maxpool2d(e, 2)                                             # [B,14,14,16]
    # enc_dropout (Dropout2d) is identity in eval mode
    e = conv2d(e, packed["enc2_w"], packed["enc2_s"], h,
               k=4, stride=2, pad=1, activation="relu")             # [B,7,7,32]
    z = jnp.max(e, axis=(1, 2))                                     # MaxPool2d(7) -> [B,32]

    # ---- decoder ----
    B = z.shape[0]
    d = fused_matmul(z, packed["dec1_w"], packed["dec1_s"], "relu", 49 * 64)
    d = d.reshape(B, 7, 7, 64)                                      # cols were (kh,kw,o)
    d = conv_transpose2d_s2(d, packed["dec2_w"], packed["dec2_s"], 16, "relu")   # [B,14,14,16]
    d = conv_transpose2d_s2(d, packed["dec3_w"], packed["dec3_s"], 8, "relu")    # [B,28,28,8]
    d = conv_transpose2d_s2(d, packed["dec4_w"], packed["dec4_s"], 1, "tanh")    # [B,56,56,1]
    return jnp.transpose(d, (0, 3, 1, 2)).astype(jnp.float32)       # NCHW f32


if __name__ == "__main__":
    key = jax.random.PRNGKey(0)
    pkey, xkey = jax.random.split(key)
    params = init_params(pkey, hidden_size=32)
    packed = prepack_params(params)          # one-time prepack, outside the jitted forward
    img = jax.random.normal(xkey, (2, 1, 56, 56), jnp.float32)      # NCHW, like PyTorch
    fwd = jax.jit(functools.partial(autoencoder_forward, hidden_size=32))
    out = jax.block_until_ready(fwd(packed, img))
    assert out.shape == (2, 1, 56, 56), out.shape
    assert bool(jnp.all(jnp.isfinite(out)))
    print("KERNEL_OK")
</pallas_src>

<mosaic_0001>
module attributes {stable_mosaic.version = 11 : i64} {
  func.func @_fused_matmul_kernel(%arg0: i32, %arg1: memref<1568x16xbf16, #tpu.memory_space<vmem>>, %arg2: memref<16x128xbf16, #tpu.memory_space<vmem>>, %arg3: memref<1x128xf32, #tpu.memory_space<vmem>>, %arg4: memref<1568x128xbf16, #tpu.memory_space<vmem>>) attributes {dimension_semantics = [#tpu.dimension_semantics<parallel>], iteration_bounds = array<i64: 1>, scalar_prefetch = 0 : i64, scratch_operands = 0 : i64, tpu.core_type = #tpu.core_type<tc>, window_params = [{transform_indices = @transform_0, window_bounds = array<i64: 1568, 16>}, {pipeline_mode = #tpu.pipeline_mode<synchronous>, transform_indices = @transform_1, window_bounds = array<i64: 16, 128>}, {pipeline_mode = #tpu.pipeline_mode<synchronous>, transform_indices = @transform_2, window_bounds = array<i64: 1, 128>}, {transform_indices = @transform_3, window_bounds = array<i64: 1568, 128>}]} {
    %c0 = arith.constant 0 : index
    %c0_0 = arith.constant 0 : index
    %0 = vector.load %arg1[%c0, %c0_0] : memref<1568x16xbf16, #tpu.memory_space<vmem>>, vector<1568x16xbf16>
    %c0_1 = arith.constant 0 : index
    %c0_2 = arith.constant 0 : index
    %1 = vector.load %arg2[%c0_1, %c0_2] : memref<16x128xbf16, #tpu.memory_space<vmem>>, vector<16x128xbf16>
    %cst = arith.constant dense<0.000000e+00> : vector<1568x128xf32>
    %2 = tpu.matmul %0, %1, %cst {dimension_numbers = #tpu.dot_dimension_numbers<[1], [0], [0], [1], [0, 0, 1, 1], [], []>} : vector<1568x16xbf16>, vector<16x128xbf16>, vector<1568x128xf32> -> vector<1568x128xf32>
    %c0_3 = arith.constant 0 : index
    %c0_4 = arith.constant 0 : index
    %3 = vector.load %arg3[%c0_3, %c0_4] : memref<1x128xf32, #tpu.memory_space<vmem>>, vector<1x128xf32>
    %4 = vector.broadcast %3 : vector<1x128xf32> to vector<1568x128xf32>
    %5 = arith.addf %2, %4 : vector<1568x128xf32>
    %cst_5 = arith.constant 0.000000e+00 : f32
    %6 = vector.broadcast %cst_5 : f32 to vector<1568x128xf32>
    %7 = arith.maximumf %5, %6 : vector<1568x128xf32>
    %8 = arith.truncf %7 : vector<1568x128xf32> to vector<1568x128xbf16>
    %c0_6 = arith.constant 0 : index
    %c0_7 = arith.constant 0 : index
    %9 = vector.load %arg4[%c0_6, %c0_7] : memref<1568x128xbf16, #tpu.memory_space<vmem>>, vector<1568x128xbf16>
    tpu.vector_store %arg4[%c0_6, %c0_7], %8 {strides = array<i32>} : memref<1568x128xbf16, #tpu.memory_space<vmem>>, vector<1568x128xbf16>,
    return
  }
  func.func @transform_0(%arg0: i32) -> (i32, i32) {
    %c0_i32 = arith.constant 0 : i32
    %c0_i32_0 = arith.constant 0 : i32
    return %arg0, %c0_i32 : i32, i32
  }
  func.func @transform_1(%arg0: i32) -> (i32, i32) {
    %c0_i32 = arith.constant 0 : i32
    %c0_i32_0 = arith.constant 0 : i32
    %c0_i32_1 = arith.constant 0 : i32
    return %c0_i32, %c0_i32_0 : i32, i32
  }
  func.func @transform_2(%arg0: i32) -> (i32, i32) {
    %c0_i32 = arith.constant 0 : i32
    %c0_i32_0 = arith.constant 0 : i32
    %c0_i32_1 = arith.constant 0 : i32
    return %c0_i32, %c0_i32_0 : i32, i32
  }
  func.func @transform_3(%arg0: i32) -> (i32, i32) {
    %c0_i32 = arith.constant 0 : i32
    %c0_i32_0 = arith.constant 0 : i32
    return %arg0, %c0_i32 : i32, i32
  }
}

module attributes {stable_mosaic.version = 11 : i64} {
  func.func @_fused_matmul_kernel(%arg0: i32, %arg1: memref<104x256xbf16, #tpu.memory_space<vmem>>, %arg2: memref<256x128xbf16, #tpu.memory_space<vmem>>, %arg3: memref<1x128xf32, #tpu.memory_space<vmem>>, %arg4: memref<104x128xbf16, #tpu.memory_space<vmem>>) attributes {dimension_semantics = [#tpu.dimension_semantics<parallel>], iteration_bounds = array<i64: 1>, scalar_prefetch = 0 : i64, scratch_operands = 0 : i64, tpu.core_type = #tpu.core_type<tc>, window_params = [{transform_indices = @transform_0, window_bounds = array<i64: 104, 256>}, {pipeline_mode = #tpu.pipeline_mode<synchronous>, transform_indices = @transform_1, window_bounds = array<i64: 256, 128>}, {pipeline_mode = #tpu.pipeline_mode<synchronous>, transform_indices = @transform_2, window_bounds = array<i64: 1, 128>}, {transform_indices = @transform_3, window_bounds = array<i64: 104, 128>}]} {
    %c0 = arith.constant 0 : index
    %c0_0 = arith.constant 0 : index
    %0 = vector.load %arg1[%c0, %c0_0] : memref<104x256xbf16, #tpu.memory_space<vmem>>, vector<104x256xbf16>
    %c0_1 = arith.constant 0 : index
    %c0_2 = arith.constant 0 : index
    %1 = vector.load %arg2[%c0_1, %c0_2] : memref<256x128xbf16, #tpu.memory_space<vmem>>, vector<256x128xbf16>
    %cst = arith.constant dense<0.000000e+00> : vector<104x128xf32>
    %2 = tpu.matmul %0, %1, %cst {dimension_numbers = #tpu.dot_dimension_numbers<[1], [0], [0], [1], [0, 0, 1, 1], [], []>} : vector<104x256xbf16>, vector<256x128xbf16>, vector<104x128xf32> -> vector<104x128xf32>
    %c0_3 = arith.constant 0 : index
    %c0_4 = arith.constant 0 : index
    %3 = vector.load %arg3[%c0_3, %c0_4] : memref<1x128xf32, #tpu.memory_space<vmem>>, vector<1x128xf32>
    %4 = vector.broadcast %3 : vector<1x128xf32> to vector<104x128xf32>
    %5 = arith.addf %2, %4 : vector<104x128xf32>
    %cst_5 = arith.constant 0.000000e+00 : f32
    %6 = vector.broadcast %cst_5 : f32 to vector<104x128xf32>
    %7 = arith.maximumf %5, %6 : vector<104x128xf32>
    %8 = arith.truncf %7 : vector<104x128xf32> to vector<104x128xbf16>
    %c0_6 = arith.constant 0 : index
    %c0_7 = arith.constant 0 : index
    %9 = vector.load %arg4[%c0_6, %c0_7] : memref<104x128xbf16, #tpu.memory_space<vmem>>, vector<104x128xbf16>
    tpu.vector_store %arg4[%c0_6, %c0_7], %8 {strides = array<i32>} : memref<104x128xbf16, #tpu.memory_space<vmem>>, vector<104x128xbf16>,
    return
  }
  func.func @transform_0(%arg0: i32) -> (i32, i32) {
    %c0_i32 = arith.constant 0 : i32
    %c0_i32_0 = arith.constant 0 : i32
    return %arg0, %c0_i32 : i32, i32
  }
  func.func @transform_1(%arg0: i32) -> (i32, i32) {
    %c0_i32 = arith.constant 0 : i32
    %c0_i32_0 = arith.constant 0 : i32
    %c0_i32_1 = arith.constant 0 : i32
    return %c0_i32, %c0_i32_0 : i32, i32
  }
  func.func @transform_2(%arg0: i32) -> (i32, i32) {
    %c0_i32 = arith.constant 0 : i32
    %c0_i32_0 = arith.constant 0 : i32
    %c0_i32_1 = arith.constant 0 : i32
    return %c0_i32, %c0_i32_0 : i32, i32
  }
  func.func @transform_3(%arg0: i32) -> (i32, i32) {
    %c0_i32 = arith.constant 0 : i32
    %c0_i32_0 = arith.constant 0 : i32
    return %arg0, %c0_i32 : i32, i32
  }
}

module attributes {stable_mosaic.version = 11 : i64} {
  func.func @_fused_matmul_kernel(%arg0: i32, %arg1: memref<8x32xbf16, #tpu.memory_space<vmem>>, %arg2: memref<32x3200xbf16, #tpu.memory_space<vmem>>, %arg3: memref<1x3200xf32, #tpu.memory_space<vmem>>, %arg4: memref<8x3200xbf16, #tpu.memory_space<vmem>>) attributes {dimension_semantics = [#tpu.dimension_semantics<parallel>], iteration_bounds = array<i64: 1>, scalar_prefetch = 0 : i64, scratch_operands = 0 : i64, tpu.core_type = #tpu.core_type<tc>, window_params = [{transform_indices = @transform_0, window_bounds = array<i64: 8, 32>}, {pipeline_mode = #tpu.pipeline_mode<synchronous>, transform_indices = @transform_1, window_bounds = array<i64: 32, 3200>}, {pipeline_mode = #tpu.pipeline_mode<synchronous>, transform_indices = @transform_2, window_bounds = array<i64: 1, 3200>}, {transform_indices = @transform_3, window_bounds = array<i64: 8, 3200>}]} {
    %c0 = arith.constant 0 : index
    %c0_0 = arith.constant 0 : index
    %0 = vector.load %arg1[%c0, %c0_0] : memref<8x32xbf16, #tpu.memory_space<vmem>>, vector<8x32xbf16>
    %c0_1 = arith.constant 0 : index
    %c0_2 = arith.constant 0 : index
    %1 = vector.load %arg2[%c0_1, %c0_2] : memref<32x3200xbf16, #tpu.memory_space<vmem>>, vector<32x3200xbf16>
    %cst = arith.constant dense<0.000000e+00> : vector<8x3200xf32>
    %2 = tpu.matmul %0, %1, %cst {dimension_numbers = #tpu.dot_dimension_numbers<[1], [0], [0], [1], [0, 0, 1, 1], [], []>} : vector<8x32xbf16>, vector<32x3200xbf16>, vector<8x3200xf32> -> vector<8x3200xf32>
    %c0_3 = arith.constant 0 : index
    %c0_4 = arith.constant 0 : index
    %3 = vector.load %arg3[%c0_3, %c0_4] : memref<1x3200xf32, #tpu.memory_space<vmem>>, vector<1x3200xf32>
    %4 = vector.broadcast %3 : vector<1x3200xf32> to vector<8x3200xf32>
    %5 = arith.addf %2, %4 : vector<8x3200xf32>
    %cst_5 = arith.constant 0.000000e+00 : f32
    %6 = vector.broadcast %cst_5 : f32 to vector<8x3200xf32>
    %7 = arith.maximumf %5, %6 : vector<8x3200xf32>
    %8 = arith.truncf %7 : vector<8x3200xf32> to vector<8x3200xbf16>
    %c0_6 = arith.constant 0 : index
    %c0_7 = arith.constant 0 : index
    %9 = vector.load %arg4[%c0_6, %c0_7] : memref<8x3200xbf16, #tpu.memory_space<vmem>>, vector<8x3200xbf16>
    tpu.vector_store %arg4[%c0_6, %c0_7], %8 {strides = array<i32>} : memref<8x3200xbf16, #tpu.memory_space<vmem>>, vector<8x3200xbf16>,
    return
  }
  func.func @transform_0(%arg0: i32) -> (i32, i32) {
    %c0_i32 = arith.constant 0 : i32
    %c0_i32_0 = arith.constant 0 : i32
    return %arg0, %c0_i32 : i32, i32
  }
  func.func @transform_1(%arg0: i32) -> (i32, i32) {
    %c0_i32 = arith.constant 0 : i32
    %c0_i32_0 = arith.constant 0 : i32
    %c0_i32_1 = arith.constant 0 : i32
    return %c0_i32, %c0_i32_0 : i32, i32
  }
  func.func @transform_2(%arg0: i32) -> (i32, i32) {
    %c0_i32 = arith.constant 0 : i32
    %c0_i32_0 = arith.constant 0 : i32
    %c0_i32_1 = arith.constant 0 : i32
    return %c0_i32, %c0_i32_0 : i32, i32
  }
  func.func @transform_3(%arg0: i32) -> (i32, i32) {
    %c0_i32 = arith.constant 0 : i32
    %c0_i32_0 = arith.constant 0 : i32
    return %arg0, %c0_i32 : i32, i32
  }
}

module attributes {stable_mosaic.version = 11 : i64} {
  func.func @_fused_matmul_kernel(%arg0: i32, %arg1: memref<104x576xbf16, #tpu.memory_space<vmem>>, %arg2: memref<576x128xbf16, #tpu.memory_space<vmem>>, %arg3: memref<1x128xf32, #tpu.memory_space<vmem>>, %arg4: memref<104x128xbf16, #tpu.memory_space<vmem>>) attributes {dimension_semantics = [#tpu.dimension_semantics<parallel>], iteration_bounds = array<i64: 1>, scalar_prefetch = 0 : i64, scratch_operands = 0 : i64, tpu.core_type = #tpu.core_type<tc>, window_params = [{transform_indices = @transform_0, window_bounds = array<i64: 104, 576>}, {pipeline_mode = #tpu.pipeline_mode<synchronous>, transform_indices = @transform_1, window_bounds = array<i64: 576, 128>}, {pipeline_mode = #tpu.pipeline_mode<synchronous>, transform_indices = @transform_2, window_bounds = array<i64: 1, 128>}, {transform_indices = @transform_3, window_bounds = array<i64: 104, 128>}]} {
    %c0 = arith.constant 0 : index
    %c0_0 = arith.constant 0 : index
    %0 = vector.load %arg1[%c0, %c0_0] : memref<104x576xbf16, #tpu.memory_space<vmem>>, vector<104x576xbf16>
    %c0_1 = arith.constant 0 : index
    %c0_2 = arith.constant 0 : index
    %1 = vector.load %arg2[%c0_1, %c0_2] : memref<576x128xbf16, #tpu.memory_space<vmem>>, vector<576x128xbf16>
    %cst = arith.constant dense<0.000000e+00> : vector<104x128xf32>
    %2 = tpu.matmul %0, %1, %cst {dimension_numbers = #tpu.dot_dimension_numbers<[1], [0], [0], [1], [0, 0, 1, 1], [], []>} : vector<104x576xbf16>, vector<576x128xbf16>, vector<104x128xf32> -> vector<104x128xf32>
    %c0_3 = arith.constant 0 : index
    %c0_4 = arith.constant 0 : index
    %3 = vector.load %arg3[%c0_3, %c0_4] : memref<1x128xf32, #tpu.memory_space<vmem>>, vector<1x128xf32>
    %4 = vector.broadcast %3 : vector<1x128xf32> to vector<104x128xf32>
    %5 = arith.addf %2, %4 : vector<104x128xf32>
    %cst_5 = arith.constant 0.000000e+00 : f32
    %6 = vector.broadcast %cst_5 : f32 to vector<104x128xf32>
    %7 = arith.maximumf %5, %6 : vector<104x128xf32>
    %8 = arith.truncf %7 : vector<104x128xf32> to vector<104x128xbf16>
    %c0_6 = arith.constant 0 : index
    %c0_7 = arith.constant 0 : index
    %9 = vector.load %arg4[%c0_6, %c0_7] : memref<104x128xbf16, #tpu.memory_space<vmem>>, vector<104x128xbf16>
    tpu.vector_store %arg4[%c0_6, %c0_7], %8 {strides = array<i32>} : memref<104x128xbf16, #tpu.memory_space<vmem>>, vector<104x128xbf16>,
    return
  }
  func.func @transform_0(%arg0: i32) -> (i32, i32) {
    %c0_i32 = arith.constant 0 : i32
    %c0_i32_0 = arith.constant 0 : i32
    return %arg0, %c0_i32 : i32, i32
  }
  func.func @transform_1(%arg0: i32) -> (i32, i32) {
    %c0_i32 = arith.constant 0 : i32
    %c0_i32_0 = arith.constant 0 : i32
    %c0_i32_1 = arith.constant 0 : i32
    return %c0_i32, %c0_i32_0 : i32, i32
  }
  func.func @transform_2(%arg0: i32) -> (i32, i32) {
    %c0_i32 = arith.constant 0 : i32
    %c0_i32_0 = arith.constant 0 : i32
    %c0_i32_1 = arith.constant 0 : i32
    return %c0_i32, %c0_i32_0 : i32, i32
  }
  func.func @transform_3(%arg0: i32) -> (i32, i32) {
    %c0_i32 = arith.constant 0 : i32
    %c0_i32_0 = arith.constant 0 : i32
    return %arg0, %c0_i32 : i32, i32
  }
}

module attributes {stable_mosaic.version = 11 : i64} {
  func.func @_fused_matmul_kernel(%arg0: i32, %arg1: memref<392x144xbf16, #tpu.memory_space<vmem>>, %arg2: memref<144x128xbf16, #tpu.memory_space<vmem>>, %arg3: memref<1x128xf32, #tpu.memory_space<vmem>>, %arg4: memref<392x128xbf16, #tpu.memory_space<vmem>>) attributes {dimension_semantics = [#tpu.dimension_semantics<parallel>], iteration_bounds = array<i64: 1>, scalar_prefetch = 0 : i64, scratch_operands = 0 : i64, tpu.core_type = #tpu.core_type<tc>, window_params = [{transform_indices = @transform_0, window_bounds = array<i64: 392, 144>}, {pipeline_mode = #tpu.pipeline_mode<synchronous>, transform_indices = @transform_1, window_bounds = array<i64: 144, 128>}, {pipeline_mode = #tpu.pipeline_mode<synchronous>, transform_indices = @transform_2, window_bounds = array<i64: 1, 128>}, {transform_indices = @transform_3, window_bounds = array<i64: 392, 128>}]} {
    %c0 = arith.constant 0 : index
    %c0_0 = arith.constant 0 : index
    %0 = vector.load %arg1[%c0, %c0_0] : memref<392x144xbf16, #tpu.memory_space<vmem>>, vector<392x144xbf16>
    %c0_1 = arith.constant 0 : index
    %c0_2 = arith.constant 0 : index
    %1 = vector.load %arg2[%c0_1, %c0_2] : memref<144x128xbf16, #tpu.memory_space<vmem>>, vector<144x128xbf16>
    %cst = arith.constant dense<0.000000e+00> : vector<392x128xf32>
    %2 = tpu.matmul %0, %1, %cst {dimension_numbers = #tpu.dot_dimension_numbers<[1], [0], [0], [1], [0, 0, 1, 1], [], []>} : vector<392x144xbf16>, vector<144x128xbf16>, vector<392x128xf32> -> vector<392x128xf32>
    %c0_3 = arith.constant 0 : index
    %c0_4 = arith.constant 0 : index
    %3 = vector.load %arg3[%c0_3, %c0_4] : memref<1x128xf32, #tpu.memory_space<vmem>>, vector<1x128xf32>
    %4 = vector.broadcast %3 : vector<1x128xf32> to vector<392x128xf32>
    %5 = arith.addf %2, %4 : vector<392x128xf32>
    %cst_5 = arith.constant 0.000000e+00 : f32
    %6 = vector.broadcast %cst_5 : f32 to vector<392x128xf32>
    %7 = arith.maximumf %5, %6 : vector<392x128xf32>
    %8 = arith.truncf %7 : vector<392x128xf32> to vector<392x128xbf16>
    %c0_6 = arith.constant 0 : index
    %c0_7 = arith.constant 0 : index
    %9 = vector.load %arg4[%c0_6, %c0_7] : memref<392x128xbf16, #tpu.memory_space<vmem>>, vector<392x128xbf16>
    tpu.vector_store %arg4[%c0_6, %c0_7], %8 {strides = array<i32>} : memref<392x128xbf16, #tpu.memory_space<vmem>>, vector<392x128xbf16>,
    return
  }
  func.func @transform_0(%arg0: i32) -> (i32, i32) {
    %c0_i32 = arith.constant 0 : i32
    %c0_i32_0 = arith.constant 0 : i32
    return %arg0, %c0_i32 : i32, i32
  }
  func.func @transform_1(%arg0: i32) -> (i32, i32) {
    %c0_i32 = arith.constant 0 : i32
    %c0_i32_0 = arith.constant 0 : i32
    %c0_i32_1 = arith.constant 0 : i32
    return %c0_i32, %c0_i32_0 : i32, i32
  }
  func.func @transform_2(%arg0: i32) -> (i32, i32) {
    %c0_i32 = arith.constant 0 : i32
    %c0_i32_0 = arith.constant 0 : i32
    %c0_i32_1 = arith.constant 0 : i32
    return %c0_i32, %c0_i32_0 : i32, i32
  }
  func.func @transform_3(%arg0: i32) -> (i32, i32) {
    %c0_i32 = arith.constant 0 : i32
    %c0_i32_0 = arith.constant 0 : i32
    return %arg0, %c0_i32 : i32, i32
  }
}

module attributes {stable_mosaic.version = 11 : i64} {
  func.func @_fused_matmul_kernel(%arg0: i32, %arg1: memref<1568x72xbf16, #tpu.memory_space<vmem>>, %arg2: memref<72x128xbf16, #tpu.memory_space<vmem>>, %arg3: memref<1x128xf32, #tpu.memory_space<vmem>>, %arg4: memref<1568x128xbf16, #tpu.memory_space<vmem>>) attributes {dimension_semantics = [#tpu.dimension_semantics<parallel>], iteration_bounds = array<i64: 1>, scalar_prefetch = 0 : i64, scratch_operands = 0 : i64, tpu.core_type = #tpu.core_type<tc>, window_params = [{transform_indices = @transform_0, window_bounds = array<i64: 1568, 72>}, {pipeline_mode = #tpu.pipeline_mode<synchronous>, transform_indices = @transform_1, window_bounds = array<i64: 72, 128>}, {pipeline_mode = #tpu.pipeline_mode<synchronous>, transform_indices = @transform_2, window_bounds = array<i64: 1, 128>}, {transform_indices = @transform_3, window_bounds = array<i64: 1568, 128>}]} {
    %c0 = arith.constant 0 : index
    %c0_0 = arith.constant 0 : index
    %0 = vector.load %arg1[%c0, %c0_0] : memref<1568x72xbf16, #tpu.memory_space<vmem>>, vector<1568x72xbf16>
    %c0_1 = arith.constant 0 : index
    %c0_2 = arith.constant 0 : index
    %1 = vector.load %arg2[%c0_1, %c0_2] : memref<72x128xbf16, #tpu.memory_space<vmem>>, vector<72x128xbf16>
    %cst = arith.constant dense<0.000000e+00> : vector<1568x128xf32>
    %2 = tpu.matmul %0, %1, %cst {dimension_numbers = #tpu.dot_dimension_numbers<[1], [0], [0], [1], [0, 0, 1, 1], [], []>} : vector<1568x72xbf16>, vector<72x128xbf16>, vector<1568x128xf32> -> vector<1568x128xf32>
    %c0_3 = arith.constant 0 : index
    %c0_4 = arith.constant 0 : index
    %3 = vector.load %arg3[%c0_3, %c0_4] : memref<1x128xf32, #tpu.memory_space<vmem>>, vector<1x128xf32>
    %4 = vector.broadcast %3 : vector<1x128xf32> to vector<1568x128xf32>
    %5 = arith.addf %2, %4 : vector<1568x128xf32>
    %6 = math.tanh %5 : vector<1568x128xf32>
    %7 = arith.truncf %6 : vector<1568x128xf32> to vector<1568x128xbf16>
    %c0_5 = arith.constant 0 : index
    %c0_6 = arith.constant 0 : index
    %8 = vector.load %arg4[%c0_5, %c0_6] : memref<1568x128xbf16, #tpu.memory_space<vmem>>, vector<1568x128xbf16>
    tpu.vector_store %arg4[%c0_5, %c0_6], %7 {strides = array<i32>} : memref<1568x128xbf16, #tpu.memory_space<vmem>>, vector<1568x128xbf16>,
    return
  }
  func.func @transform_0(%arg0: i32) -> (i32, i32) {
    %c0_i32 = arith.constant 0 : i32
    %c0_i32_0 = arith.constant 0 : i32
    return %arg0, %c0_i32 : i32, i32
  }
  func.func @transform_1(%arg0: i32) -> (i32, i32) {
    %c0_i32 = arith.constant 0 : i32
    %c0_i32_0 = arith.constant 0 : i32
    %c0_i32_1 = arith.constant 0 : i32
    return %c0_i32, %c0_i32_0 : i32, i32
  }
  func.func @transform_2(%arg0: i32) -> (i32, i32) {
    %c0_i32 = arith.constant 0 : i32
    %c0_i32_0 = arith.constant 0 : i32
    %c0_i32_1 = arith.constant 0 : i32
    return %c0_i32, %c0_i32_0 : i32, i32
  }
  func.func @transform_3(%arg0: i32) -> (i32, i32) {
    %c0_i32 = arith.constant 0 : i32
    %c0_i32_0 = arith.constant 0 : i32
    return %arg0, %c0_i32 : i32, i32
  }
}

</mosaic_0001>

<bundles_post_ra>
// kernel: autoencoder_forward.6
= control target key start
LH: loop header
LB: loop body
LE: loop exit
PB: predicated region body
PF: predicated region fallthrough
CT: control target
= control target key end

     0   :  { %8 = vsyncpa [#allocation3], 0  ;;  %s4288_s0 = inlined_call_operand.vmem [shape: bf16[1568,16], index: 0, kind: input, shape index: {}]   ;;  %s4289_s1 = inlined_call_operand.hbm [shape: bf16[16,128], index: 1, kind: input, shape index: {}]   ;;  %s4290_s2 = inlined_call_operand.hbm [shape: f32[1,128], index: 2, kind: input, shape index: {}]   ;;  %s4291_s3 = inlined_call_operand.vmem [shape: bf16[1568,128], index: 3, kind: output, shape index: {}]  }
   0x1   :  { %s16_s14 = sshll.u32 %s4289_s1, 4  ;;  %s17_s14 = int_to_ptr.hbm [resolvable:$true] %s16_s14 }
   0x2   :  { %9 = vsyncpa [#allocation5], 0  ;;  %s3372_s15 = smov [#allocation2]   ;;  %s30_s19 = sshll.u32 %s4290_s2, 4  ;;  %s31_s19 = int_to_ptr.hbm [resolvable:$true] %s30_s19 }
   0x3   :  { %s18_s16 = sshll.u32 %s3372_s15, 4  ;;  %s3373_s20 = smov 64   ;;  %s19_s16 = int_to_ptr.vmem [resolvable:$true] %s18_s16 }
   0x4   :  { %s3374_s21 = smov 4   ;;  %s3375_s22 = smov [#allocation4]  }
   0x5   :  { %24 = dma.hbm_to_vmem [thread:$0]  %s17_s14, 128, %s19_s16, [#allocation3], %s3373_s20, %s3373_s20, %s3374_s21  }
   0x6   :  { %s32_s23 = sshll.u32 %s3375_s22, 4  ;;  %s33_s23 = int_to_ptr.vmem [resolvable:$true] %s32_s23 }
   0x7   :  { %35 = dma.hbm_to_vmem [thread:$0]  %s31_s19, 16, %s33_s23, [#allocation5]  }
   0x8   :  { %3368 = dma.done.wait [#allocation3], 128  }
   0x9   :  { %3369 = vsyncadd [#allocation3], 4294967168 }
   0xa   :  { %3370 = dma.done.wait [#allocation5], 16  }
   0xb   :  { %3371 = vsyncadd [#allocation5], 4294967280  ;;  %v2723_v0 = vld [vmem:[#allocation2] sm:$0xff]  ;;  %v2650_v2 = vld [vmem:[%s4288_s0 + $0xc8] sm:$0xff]  ;;  %vm743_vm0 = vcmask 130048  }
   0xc   :  { %v2625_v1 = vld [vmem:[%s4288_s0] sm:$0xff]  ;;  %1045 = vmatpush.bf16.msra.mxu0 %v2723_v0  ;;  %3311 = vmatpush.bf16.msra.mxu1 %v2723_v0  ;;  %v2675_v3 = vld [vmem:[%s4288_s0 + $0x190] sm:$0xff]  ;;  %v2700_v4 = vld [vmem:[%s4288_s0 + $0x258] sm:$0xff] }
   0xd   :  { %3312 = vmatpush.bf16.msra.mxu2 %v2723_v0  ;;  %3313 = vmatpush.bf16.msra.mxu3 %v2723_v0  ;;  %v2626_v5 = vld [vmem:[%s4288_s0 + $0x8] sm:$0xff]  ;;  %v2651_v6 = vld [vmem:[%s4288_s0 + $0xd0] sm:$0xff]  ;;  %v2676_v7 = vld [vmem:[%s4288_s0 + $0x198] sm:$0xff] }
   0xe   :  { %v2701_v8 = vld [vmem:[%s4288_s0 + $0x260] sm:$0xff]  ;;  %v2627_v9 = vld [vmem:[%s4288_s0 + $0x10] sm:$0xff]  ;;  %v2652_v10 = vld [vmem:[%s4288_s0 + $0xd8] sm:$0xff] }
   0xf   :  { %2527 = vmatmul.msk.bf16.vlgmr.msra.gmra.mxu0 %vm743_vm0, %v2625_v1  ;;  %2552 = vmatmul.msk.bf16.vlgmr.msra.gmra.mxu1 %vm743_vm0, %v2650_v2  ;;  %v2677_v11 = vld [vmem:[%s4288_s0 + $0x1a0] sm:$0xff]  ;;  %v2702_v12 = vld [vmem:[%s4288_s0 + $0x268] sm:$0xff]  ;;  %v2628_v13 = vld [vmem:[%s4288_s0 + $0x18] sm:$0xff] }
  0x10   :  { %2577 = vmatmul.msk.bf16.vlgmr.msra.gmra.mxu2 %vm743_vm0, %v2675_v3  ;;  %2602 = vmatmul.msk.bf16.vlgmr.msra.gmra.mxu3 %vm743_vm0, %v2700_v4  ;;  %v2653_v14 = vld [vmem:[%s4288_s0 + $0xe0] sm:$0xff]  ;;  %v2678_v15 = vld [vmem:[%s4288_s0 + $0x1a8] sm:$0xff]  ;;  %v2703_v16 = vld [vmem:[%s4288_s0 + $0x270] sm:$0xff] }
  0x11   :  { %v2629_v17 = vld [vmem:[%s4288_s0 + $0x20] sm:$0xff]  ;;  %v2654_v18 = vld [vmem:[%s4288_s0 + $0xe8] sm:$0xff]  ;;  %v2679_v19 = vld [vmem:[%s4288_s0 + $0x1b0] sm:$0xff] }
  0x12   :  { %v2704_v20 = vld [vmem:[%s4288_s0 + $0x278] sm:$0xff]  ;;  %v2630_v21 = vld [vmem:[%s4288_s0 + $0x28] sm:$0xff]  ;;  %v2655_v22 = vld [vmem:[%s4288_s0 + $0xf0] sm:$0xff] }
  0x13   :  { %v2680_v23 = vld [vmem:[%s4288_s0 + $0x1b8] sm:$0xff]  ;;  %v2705_v24 = vld [vmem:[%s4288_s0 + $0x280] sm:$0xff]  ;;  %v2631_v25 = vld [vmem:[%s4288_s0 + $0x30] sm:$0xff] }
  0x14   :  { %v2656_v26 = vld [vmem:[%s4288_s0 + $0xf8] sm:$0xff]  ;;  %v2681_v27 = vld [vmem:[%s4288_s0 + $0x1c0] sm:$0xff]  ;;  %v2706_v28 = vld [vmem:[%s4288_s0 + $0x288] sm:$0xff] }
  0x15   :  { %v2632_v29 = vld [vmem:[%s4288_s0 + $0x38] sm:$0xff]  ;;  %v2657_v30 = vld [vmem:[%s4288_s0 + $0x100] sm:$0xff]  ;;  %v2682_v31 = vld [vmem:[%s4288_s0 + $0x1c8] sm:$0xff] }
  0x16   :  { %v2707_v32 = vld [vmem:[%s4288_s0 + $0x290] sm:$0xff]  ;;  %v2633_v33 = vld [vmem:[%s4288_s0 + $0x40] sm:$0xff]  ;;  %v2658_v34 = vld [vmem:[%s4288_s0 + $0x108] sm:$0xff] }
  0x17   :  { %v2683_v37 = vld [vmem:[%s4288_s0 + $0x1d0] sm:$0xff]  ;;  %v2708_v38 = vld [vmem:[%s4288_s0 + $0x298] sm:$0xff]  ;;  %v3542_v39 = vld [vmem:[#allocation4] ss:$0 sm:$0xff] }
  0x18   :  { %v2634_v57 = vld [vmem:[%s4288_s0 + $0x48] sm:$0xff]  ;;  %v2659_v58 = vld [vmem:[%s4288_s0 + $0x110] sm:$0xff]  ;;  %v2684_v63 = vld [vmem:[%s4288_s0 + $0x1d8] sm:$0xff] }
  0x19   :  { %v2709_v2 = vld [vmem:[%s4288_s0 + $0x2a0] sm:$0xff] }
  0x1f   :  { %2528 = vmatmul.msk.bf16.gmra.mxu0 %vm743_vm0, %v2626_v5  ;;  %2553 = vmatmul.msk.bf16.gmra.mxu1 %vm743_vm0, %v2651_v6 }
  0x20   :  { %2578 = vmatmul.msk.bf16.gmra.mxu2 %vm743_vm0, %v2676_v7  ;;  %2603 = vmatmul.msk.bf16.gmra.mxu3 %vm743_vm0, %v2701_v8 }
  0x2f   :  { %2529 = vmatmul.msk.bf16.gmra.mxu0 %vm743_vm0, %v2627_v9  ;;  %2554 = vmatmul.msk.bf16.gmra.mxu1 %vm743_vm0, %v2652_v10 }
  0x30   :  { %2579 = vmatmul.msk.bf16.gmra.mxu2 %vm743_vm0, %v2677_v11  ;;  %2604 = vmatmul.msk.bf16.gmra.mxu3 %vm743_vm0, %v2702_v12 }
  0x3f   :  { %2530 = vmatmul.msk.bf16.gmra.mxu0 %vm743_vm0, %v2628_v13  ;;  %2555 = vmatmul.msk.bf16.gmra.mxu1 %vm743_vm0, %v2653_v14 }
  0x40   :  { %2580 = vmatmul.msk.bf16.gmra.mxu2 %vm743_vm0, %v2678_v15  ;;  %2605 = vmatmul.msk.bf16.gmra.mxu3 %vm743_vm0, %v2703_v16 }
  0x4f   :  { %2531 = vmatmul.msk.bf16.gmra.mxu0 %vm743_vm0, %v2629_v17  ;;  %2556 = vmatmul.msk.bf16.gmra.mxu1 %vm743_vm0, %v2654_v18 }
  0x50   :  { %2581 = vmatmul.msk.bf16.gmra.mxu2 %vm743_vm0, %v2679_v19  ;;  %2606 = vmatmul.msk.bf16.gmra.mxu3 %vm743_vm0, %v2704_v20 }
  0x5f   :  { %2532 = vmatmul.msk.bf16.gmra.mxu0 %vm743_vm0, %v2630_v21  ;;  %2557 = vmatmul.msk.bf16.gmra.mxu1 %vm743_vm0, %v2655_v22 }
  0x60   :  { %2582 = vmatmul.msk.bf16.gmra.mxu2 %vm743_vm0, %v2680_v23  ;;  %2607 = vmatmul.msk.bf16.gmra.mxu3 %vm743_vm0, %v2705_v24 }
  0x6f   :  { %2533 = vmatmul.msk.bf16.gmra.mxu0 %vm743_vm0, %v2631_v25  ;;  %2558 = vmatmul.msk.bf16.gmra.mxu1 %vm743_vm0, %v2656_v26  ;;  %v2635_v25 = vld [vmem:[%s4288_s0 + $0x50] sm:$0xff]  ;;  %v2660_v26 = vld [vmem:[%s4288_s0 + $0x118] sm:$0xff] }
  0x70   :  { %2583 = vmatmul.msk.bf16.gmra.mxu2 %vm743_vm0, %v2681_v27  ;;  %2608 = vmatmul.msk.bf16.gmra.mxu3 %vm743_vm0, %v2706_v28 }
  0x7f   :  { %2534 = vmatmul.msk.bf16.gmra.mxu0 %vm743_vm0, %v2632_v29  ;;  %2559 = vmatmul.msk.bf16.gmra.mxu1 %vm743_vm0, %v2657_v30 }
  0x80   :  { %2584 = vmatmul.msk.bf16.gmra.mxu2 %vm743_vm0, %v2682_v31  ;;  %2609 = vmatmul.msk.bf16.gmra.mxu3 %vm743_vm0, %v2707_v32  ;;  %v2685_v31 = vld [vmem:[%s4288_s0 + $0x1e0] sm:$0xff] }
  0x8c   :  { %v1047_v35 = vpop.f32.mrf.mxu0  ;;  %v1172_v36 = vpop.f32.mrf.mxu1 }
  0x8d   :  { %v1048_v40 = vadd.f32 %v3542_v39, %v1047_v35  ;;  %v1173_v41 = vadd.f32 %v3542_v39, %v1172_v36 }
  0x8f   :  { %2535 = vmatmul.msk.bf16.gmra.mxu0 %vm743_vm0, %v2633_v33  ;;  %2560 = vmatmul.msk.bf16.gmra.mxu1 %vm743_vm0, %v2658_v34  ;;  %v1537_v48 = vmax.f32 %v1048_v40, 0.0  ;;  %v1587_v49 = vmax.f32 %v1173_v41, 0.0  ;;  %v2710_v34 = vld [vmem:[%s4288_s0 + $0x2a8] sm:$0xff] }
  0x90   :  { %2585 = vmatmul.msk.bf16.gmra.mxu2 %vm743_vm0, %v2683_v37  ;;  %2610 = vmatmul.msk.bf16.gmra.mxu3 %vm743_vm0, %v2708_v38 }
  0x93   :  { %v1297_v42 = vpop.f32.mrf.mxu2  ;;  %v1422_v43 = vpop.f32.mrf.mxu3 }
  0x94   :  { %v1049_v44 = vpop.f32.mrf.mxu0  ;;  %v1174_v45 = vpop.f32.mrf.mxu1  ;;  %v1423_v52 = vadd.f32 %v3542_v39, %v1422_v43  ;;  %v1298_v55 = vadd.f32 %v3542_v39, %v1297_v42 }
  0x95   :  { %v1050_v46 = vadd.f32 %v3542_v39, %v1049_v44  ;;  %v1175_v47 = vadd.f32 %v3542_v39, %v1174_v45 }
  0x96   :  { %v1687_v0 = vmax.f32 %v1423_v52, 0.0  ;;  %v1637_v3 = vmax.f32 %v1298_v55, 0.0 }
  0x97   :  { %v1538_v50 = vmax.f32 %v1050_v46, 0.0  ;;  %v1588_v51 = vmax.f32 %v1175_v47, 0.0 }
  0x99   :  { %v2727_v53 = vpack.c.bf16 %v1538_v50, %v1537_v48  ;;  %v2852_v54 = vpack.c.bf16 %v1588_v51, %v1587_v49 }
  0x9b   :  { %2728 = vst [vmem:[%s4291_s3] sm:$0xff] %v2727_v53   ;;  %v1299_v56 = vpop.f32.mrf.mxu2  ;;  %v1424_v59 = vpop.f32.mrf.mxu3 }
  0x9c   :  { %3238 = vst [vmem:[%s4291_s3 + $0xc8] sm:$0xff] %v2852_v54   ;;  %v1300_v60 = vadd.f32 %v3542_v39, %v1299_v56  ;;  %v1052_v61 = vpop.f32.mrf.mxu0  ;;  %v1177_v62 = vpop.f32.mrf.mxu1  ;;  %v1425_v1 = vadd.f32 %v3542_v39, %v1424_v59  ;;  %v2661_v59 = vld [vmem:[%s4288_s0 + $0x120] sm:$0xff] }
  0x9d   :  { %v1053_v8 = vadd.f32 %v3542_v39, %v1052_v61  ;;  %v1178_v9 = vadd.f32 %v3542_v39, %v1177_v62 }
  0x9e   :  { %v1638_v4 = vmax.f32 %v1300_v60, 0.0  ;;  %v1688_v5 = vmax.f32 %v1425_v1, 0.0 }
  0x9f   :  { %2536 = vmatmul.msk.bf16.gmra.mxu0 %vm743_vm0, %v2634_v57  ;;  %2561 = vmatmul.msk.bf16.gmra.mxu1 %vm743_vm0, %v2659_v58  ;;  %v1539_v16 = vmax.f32 %v1053_v8, 0.0  ;;  %v1589_v17 = vmax.f32 %v1178_v9, 0.0  ;;  %v2636_v58 = vld [vmem:[%s4288_s0 + $0x58] sm:$0xff] }
  0xa0   :  { %v2977_v6 = vpack.c.bf16 %v1638_v4, %v1637_v3  ;;  %2586 = vmatmul.msk.bf16.gmra.mxu2 %vm743_vm0, %v2684_v63  ;;  %v3102_v7 = vpack.c.bf16 %v1688_v5, %v1687_v0  ;;  %2611 = vmatmul.msk.bf16.gmra.mxu3 %vm743_vm0, %v2709_v2  ;;  %v2686_v0 = vld [vmem:[%s4288_s0 + $0x1e8] sm:$0xff]  ;;  %v2711_v3 = vld [vmem:[%s4288_s0 + $0x2b0] sm:$0xff] }
  0xa2   :  { %3263 = vst [vmem:[%s4291_s3 + $0x190] sm:$0xff] %v2977_v6  }
  0xa3   :  { %v1302_v10 = vpop.f32.mrf.mxu2  ;;  %3288 = vst [vmem:[%s4291_s3 + $0x258] sm:$0xff] %v3102_v7   ;;  %v1427_v11 = vpop.f32.mrf.mxu3 }
  0xa4   :  { %v1054_v12 = vpop.f32.mrf.mxu0  ;;  %v1179_v13 = vpop.f32.mrf.mxu1  ;;  %v1428_v20 = vadd.f32 %v3542_v39, %v1427_v11  ;;  %v1303_v23 = vadd.f32 %v3542_v39, %v1302_v10 }
  0xa5   :  { %v1055_v14 = vadd.f32 %v3542_v39, %v1054_v12  ;;  %v1180_v15 = vadd.f32 %v3542_v39, %v1179_v13 }
  0xa6   :  { %v1689_v32 = vmax.f32 %v1428_v20, 0.0  ;;  %v1639_v35 = vmax.f32 %v1303_v23, 0.0 }
  0xa7   :  { %v1540_v18 = vmax.f32 %v1055_v14, 0.0  ;;  %v1590_v19 = vmax.f32 %v1180_v15, 0.0 }
  0xa9   :  { %v2732_v21 = vpack.c.bf16 %v1540_v18, %v1539_v16  ;;  %v2857_v22 = vpack.c.bf16 %v1590_v19, %v1589_v17 }
  0xab   :  { %3214 = vst [vmem:[%s4291_s3 + $0x8] sm:$0xff] %v2732_v21   ;;  %v1304_v24 = vpop.f32.mrf.mxu2  ;;  %v1429_v27 = vpop.f32.mrf.mxu3 }
  0xac   :  { %3239 = vst [vmem:[%s4291_s3 + $0xd0] sm:$0xff] %v2857_v22   ;;  %v1305_v28 = vadd.f32 %v3542_v39, %v1304_v24  ;;  %v1057_v29 = vpop.f32.mrf.mxu0  ;;  %v1182_v30 = vpop.f32.mrf.mxu1  ;;  %v1430_v33 = vadd.f32 %v3542_v39, %v1429_v27  ;;  %v2662_v27 = vld [vmem:[%s4288_s0 + $0x128] sm:$0xff] }
  0xad   :  { %v1058_v41 = vadd.f32 %v3542_v39, %v1057_v29  ;;  %v1183_v42 = vadd.f32 %v3542_v39, %v1182_v30 }
  0xae   :  { %v1640_v36 = vmax.f32 %v1305_v28, 0.0  ;;  %v1690_v37 = vmax.f32 %v1430_v33, 0.0 }
  0xaf   :  { %2537 = vmatmul.msk.bf16.gmra.mxu0 %vm743_vm0, %v2635_v25  ;;  %2562 = vmatmul.msk.bf16.gmra.mxu1 %vm743_vm0, %v2660_v26  ;;  %v1541_v49 = vmax.f32 %v1058_v41, 0.0  ;;  %v1591_v50 = vmax.f32 %v1183_v42, 0.0  ;;  %v2637_v26 = vld [vmem:[%s4288_s0 + $0x60] sm:$0xff] }
  0xb0   :  { %v2982_v38 = vpack.c.bf16 %v1640_v36, %v1639_v35  ;;  %2587 = vmatmul.msk.bf16.gmra.mxu2 %vm743_vm0, %v2685_v31  ;;  %v3107_v40 = vpack.c.bf16 %v1690_v37, %v1689_v32  ;;  %2612 = vmatmul.msk.bf16.gmra.mxu3 %vm743_vm0, %v2710_v34  ;;  %v2687_v32 = vld [vmem:[%s4288_s0 + $0x1f0] sm:$0xff]  ;;  %v2712_v35 = vld [vmem:[%s4288_s0 + $0x2b8] sm:$0xff] }
  0xb2   :  { %3264 = vst [vmem:[%s4291_s3 + $0x198] sm:$0xff] %v2982_v38  }
  0xb3   :  { %v1307_v43 = vpop.f32.mrf.mxu2  ;;  %3289 = vst [vmem:[%s4291_s3 + $0x260] sm:$0xff] %v3107_v40   ;;  %v1432_v44 = vpop.f32.mrf.mxu3 }
  0xb4   :  { %v1059_v45 = vpop.f32.mrf.mxu0  ;;  %v1184_v46 = vpop.f32.mrf.mxu1  ;;  %v1433_v53 = vadd.f32 %v3542_v39, %v1432_v44  ;;  %v1308_v56 = vadd.f32 %v3542_v39, %v1307_v43 }
  0xb5   :  { %v1060_v47 = vadd.f32 %v3542_v39, %v1059_v45  ;;  %v1185_v48 = vadd.f32 %v3542_v39, %v1184_v46 }
  0xb6   :  { %v1691_v1 = vmax.f32 %v1433_v53, 0.0  ;;  %v1641_v4 = vmax.f32 %v1308_v56, 0.0 }
  0xb7   :  { %v1542_v51 = vmax.f32 %v1060_v47, 0.0  ;;  %v1592_v52 = vmax.f32 %v1185_v48, 0.0 }
  0xb9   :  { %v2737_v54 = vpack.c.bf16 %v1542_v51, %v1541_v49  ;;  %v2862_v55 = vpack.c.bf16 %v1592_v52, %v1591_v50 }
  0xbb   :  { %3215 = vst [vmem:[%s4291_s3 + $0x10] sm:$0xff] %v2737_v54   ;;  %v1309_v57 = vpop.f32.mrf.mxu2  ;;  %v1434_v60 = vpop.f32.mrf.mxu3 }
  0xbc   :  { %3240 = vst [vmem:[%s4291_s3 + $0xd8] sm:$0xff] %v2862_v55   ;;  %v1310_v61 = vadd.f32 %v3542_v39, %v1309_v57  ;;  %v1062_v62 = vpop.f32.mrf.mxu0  ;;  %v1187_v63 = vpop.f32.mrf.mxu1  ;;  %v1435_v2 = vadd.f32 %v3542_v39, %v1434_v60  ;;  %v2663_v60 = vld [vmem:[%s4288_s0 + $0x130] sm:$0xff] }
  0xbd   :  { %v1063_v9 = vadd.f32 %v3542_v39, %v1062_v62  ;;  %v1188_v10 = vadd.f32 %v3542_v39, %v1187_v63 }
  0xbe   :  { %v1642_v5 = vmax.f32 %v1310_v61, 0.0  ;;  %v1692_v6 = vmax.f32 %v1435_v2, 0.0 }
  0xbf   :  { %2538 = vmatmul.msk.bf16.gmra.mxu0 %vm743_vm0, %v2636_v58  ;;  %2563 = vmatmul.msk.bf16.gmra.mxu1 %vm743_vm0, %v2661_v59  ;;  %v1543_v17 = vmax.f32 %v1063_v9, 0.0  ;;  %v1593_v18 = vmax.f32 %v1188_v10, 0.0  ;;  %v2638_v59 = vld [vmem:[%s4288_s0 + $0x68] sm:$0xff] }
  0xc0   :  { %v2987_v7 = vpack.c.bf16 %v1642_v5, %v1641_v4  ;;  %2588 = vmatmul.msk.bf16.gmra.mxu2 %vm743_vm0, %v2686_v0  ;;  %v3112_v8 = vpack.c.bf16 %v1692_v6, %v1691_v1  ;;  %2613 = vmatmul.msk.bf16.gmra.mxu3 %vm743_vm0, %v2711_v3  ;;  %v2688_v1 = vld [vmem:[%s4288_s0 + $0x1f8] sm:$0xff]  ;;  %v2713_v4 = vld [vmem:[%s4288_s0 + $0x2c0] sm:$0xff] }
  0xc2   :  { %3265 = vst [vmem:[%s4291_s3 + $0x1a0] sm:$0xff] %v2987_v7  }
  0xc3   :  { %v1312_v11 = vpop.f32.mrf.mxu2  ;;  %3290 = vst [vmem:[%s4291_s3 + $0x268] sm:$0xff] %v3112_v8   ;;  %v1437_v12 = vpop.f32.mrf.mxu3 }
  0xc4   :  { %v1064_v13 = vpop.f32.mrf.mxu0  ;;  %v1189_v14 = vpop.f32.mrf.mxu1  ;;  %v1438_v21 = vadd.f32 %v3542_v39, %v1437_v12  ;;  %v1313_v24 = vadd.f32 %v3542_v39, %v1312_v11 }
  0xc5   :  { %v1065_v15 = vadd.f32 %v3542_v39, %v1064_v13  ;;  %v1190_v16 = vadd.f32 %v3542_v39, %v1189_v14 }
  0xc6   :  { %v1693_v33 = vmax.f32 %v1438_v21, 0.0  ;;  %v1643_v36 = vmax.f32 %v1313_v24, 0.0 }
  0xc7   :  { %v1544_v19 = vmax.f32 %v1065_v15, 0.0  ;;  %v1594_v20 = vmax.f32 %v1190_v16, 0.0 }
  0xc9   :  { %v2742_v22 = vpack.c.bf16 %v1544_v19, %v1543_v17  ;;  %v2867_v23 = vpack.c.bf16 %v1594_v20, %v1593_v18 }
  0xcb   :  { %3216 = vst [vmem:[%s4291_s3 + $0x18] sm:$0xff] %v2742_v22   ;;  %v1314_v25 = vpop.f32.mrf.mxu2  ;;  %v1439_v28 = vpop.f32.mrf.mxu3 }
  0xcc   :  { %3241 = vst [vmem:[%s4291_s3 + $0xe0] sm:$0xff] %v2867_v23   ;;  %v1315_v29 = vadd.f32 %v3542_v39, %v1314_v25  ;;  %v1067_v30 = vpop.f32.mrf.mxu0  ;;  %v1192_v31 = vpop.f32.mrf.mxu1  ;;  %v1440_v34 = vadd.f32 %v3542_v39, %v1439_v28  ;;  %v2664_v28 = vld [vmem:[%s4288_s0 + $0x138] sm:$0xff] }
  0xcd   :  { %v1068_v42 = vadd.f32 %v3542_v39, %v1067_v30  ;;  %v1193_v43 = vadd.f32 %v3542_v39, %v1192_v31 }
  0xce   :  { %v1644_v37 = vmax.f32 %v1315_v29, 0.0  ;;  %v1694_v38 = vmax.f32 %v1440_v34, 0.0 }
  0xcf   :  { %2539 = vmatmul.msk.bf16.gmra.mxu0 %vm743_vm0, %v2637_v26  ;;  %2564 = vmatmul.msk.bf16.gmra.mxu1 %vm743_vm0, %v2662_v27  ;;  %v1545_v50 = vmax.f32 %v1068_v42, 0.0  ;;  %v1595_v51 = vmax.f32 %v1193_v43, 0.0  ;;  %v2639_v27 = vld [vmem:[%s4288_s0 + $0x70] sm:$0xff] }
  0xd0   :  { %v2992_v40 = vpack.c.bf16 %v1644_v37, %v1643_v36  ;;  %2589 = vmatmul.msk.bf16.gmra.mxu2 %vm743_vm0, %v2687_v32  ;;  %v3117_v41 = vpack.c.bf16 %v1694_v38, %v1693_v33  ;;  %2614 = vmatmul.msk.bf16.gmra.mxu3 %vm743_vm0, %v2712_v35  ;;  %v2689_v33 = vld [vmem:[%s4288_s0 + $0x200] sm:$0xff]  ;;  %v2714_v36 = vld [vmem:[%s4288_s0 + $0x2c8] sm:$0xff] }
  0xd2   :  { %3266 = vst [vmem:[%s4291_s3 + $0x1a8] sm:$0xff] %v2992_v40  }
  0xd3   :  { %v1317_v44 = vpop.f32.mrf.mxu2  ;;  %3291 = vst [vmem:[%s4291_s3 + $0x270] sm:$0xff] %v3117_v41   ;;  %v1442_v45 = vpop.f32.mrf.mxu3 }
  0xd4   :  { %v1069_v46 = vpop.f32.mrf.mxu0  ;;  %v1194_v47 = vpop.f32.mrf.mxu1  ;;  %v1443_v54 = vadd.f32 %v3542_v39, %v1442_v45  ;;  %v1318_v57 = vadd.f32 %v3542_v39, %v1317_v44 }
  0xd5   :  { %v1070_v48 = vadd.f32 %v3542_v39, %v1069_v46  ;;  %v1195_v49 = vadd.f32 %v3542_v39, %v1194_v47 }
  0xd6   :  { %v1695_v2 = vmax.f32 %v1443_v54, 0.0  ;;  %v1645_v5 = vmax.f32 %v1318_v57, 0.0 }
  0xd7   :  { %v1546_v52 = vmax.f32 %v1070_v48, 0.0  ;;  %v1596_v53 = vmax.f32 %v1195_v49, 0.0 }
  0xd9   :  { %v2747_v55 = vpack.c.bf16 %v1546_v52, %v1545_v50  ;;  %v2872_v56 = vpack.c.bf16 %v1596_v53, %v1595_v51 }
  0xdb   :  { %3217 = vst [vmem:[%s4291_s3 + $0x20] sm:$0xff] %v2747_v55   ;;  %v1319_v58 = vpop.f32.mrf.mxu2  ;;  %v1444_v61 = vpop.f32.mrf.mxu3 }
  0xdc   :  { %3242 = vst [vmem:[%s4291_s3 + $0xe8] sm:$0xff] %v2872_v56   ;;  %v1320_v62 = vadd.f32 %v3542_v39, %v1319_v58  ;;  %v1072_v63 = vpop.f32.mrf.mxu0  ;;  %v1197_v0 = vpop.f32.mrf.mxu1  ;;  %v1445_v3 = vadd.f32 %v3542_v39, %v1444_v61  ;;  %v2665_v61 = vld [vmem:[%s4288_s0 + $0x140] sm:$0xff] }
  0xdd   :  { %v1073_v10 = vadd.f32 %v3542_v39, %v1072_v63  ;;  %v1198_v11 = vadd.f32 %v3542_v39, %v1197_v0 }
  0xde   :  { %v1646_v6 = vmax.f32 %v1320_v62, 0.0  ;;  %v1696_v7 = vmax.f32 %v1445_v3, 0.0 }
  0xdf   :  { %2540 = vmatmul.msk.bf16.gmra.mxu0 %vm743_vm0, %v2638_v59  ;;  %2565 = vmatmul.msk.bf16.gmra.mxu1 %vm743_vm0, %v2663_v60  ;;  %v1547_v18 = vmax.f32 %v1073_v10, 0.0  ;;  %v1597_v19 = vmax.f32 %v1198_v11, 0.0  ;;  %v2640_v60 = vld [vmem:[%s4288_s0 + $0x78] sm:$0xff] }
  0xe0   :  { %v2997_v8 = vpack.c.bf16 %v1646_v6, %v1645_v5  ;;  %2590 = vmatmul.msk.bf16.gmra.mxu2 %vm743_vm0, %v2688_v1  ;;  %v3122_v9 = vpack.c.bf16 %v1696_v7, %v1695_v2  ;;  %2615 = vmatmul.msk.bf16.gmra.mxu3 %vm743_vm0, %v2713_v4  ;;  %v2690_v2 = vld [vmem:[%s4288_s0 + $0x208] sm:$0xff]  ;;  %v2715_v5 = vld [vmem:[%s4288_s0 + $0x2d0] sm:$0xff] }
  0xe2   :  { %3267 = vst [vmem:[%s4291_s3 + $0x1b0] sm:$0xff] %v2997_v8  }
  0xe3   :  { %v1322_v12 = vpop.f32.mrf.mxu2  ;;  %3292 = vst [vmem:[%s4291_s3 + $0x278] sm:$0xff] %v3122_v9   ;;  %v1447_v13 = vpop.f32.mrf.mxu3 }
  0xe4   :  { %v1074_v14 = vpop.f32.mrf.mxu0  ;;  %v1199_v15 = vpop.f32.mrf.mxu1  ;;  %v1448_v22 = vadd.f32 %v3542_v39, %v1447_v13  ;;  %v1323_v25 = vadd.f32 %v3542_v39, %v1322_v12 }
  0xe5   :  { %v1075_v16 = vadd.f32 %v3542_v39, %v1074_v14  ;;  %v1200_v17 = vadd.f32 %v3542_v39, %v1199_v15 }
  0xe6   :  { %v1697_v34 = vmax.f32 %v1448_v22, 0.0  ;;  %v1647_v37 = vmax.f32 %v1323_v25, 0.0 }
  0xe7   :  { %v1548_v20 = vmax.f32 %v1075_v16, 0.0  ;;  %v1598_v21 = vmax.f32 %v1200_v17, 0.0 }
  0xe9   :  { %v2752_v23 = vpack.c.bf16 %v1548_v20, %v1547_v18  ;;  %v2877_v24 = vpack.c.bf16 %v1598_v21, %v1597_v19 }
  0xeb   :  { %3218 = vst [vmem:[%s4291_s3 + $0x28] sm:$0xff] %v2752_v23   ;;  %v1324_v26 = vpop.f32.mrf.mxu2  ;;  %v1449_v29 = vpop.f32.mrf.mxu3 }
  0xec   :  { %3243 = vst [vmem:[%s4291_s3 + $0xf0] sm:$0xff] %v2877_v24   ;;  %v1325_v30 = vadd.f32 %v3542_v39, %v1324_v26  ;;  %v1077_v31 = vpop.f32.mrf.mxu0  ;;  %v1202_v32 = vpop.f32.mrf.mxu1  ;;  %v1450_v35 = vadd.f32 %v3542_v39, %v1449_v29  ;;  %v2666_v29 = vld [vmem:[%s4288_s0 + $0x148] sm:$0xff] }
  0xed   :  { %v1078_v43 = vadd.f32 %v3542_v39, %v1077_v31  ;;  %v1203_v44 = vadd.f32 %v3542_v39, %v1202_v32 }
  0xee   :  { %v1648_v38 = vmax.f32 %v1325_v30, 0.0  ;;  %v1698_v40 = vmax.f32 %v1450_v35, 0.0 }
  0xef   :  { %2541 = vmatmul.msk.bf16.gmra.mxu0 %vm743_vm0, %v2639_v27  ;;  %2566 = vmatmul.msk.bf16.gmra.mxu1 %vm743_vm0, %v2664_v28  ;;  %v1549_v51 = vmax.f32 %v1078_v43, 0.0  ;;  %v1599_v52 = vmax.f32 %v1203_v44, 0.0  ;;  %v2641_v28 = vld [vmem:[%s4288_s0 + $0x80] sm:$0xff] }
  0xf0   :  { %v3002_v41 = vpack.c.bf16 %v1648_v38, %v1647_v37  ;;  %2591 = vmatmul.msk.bf16.gmra.mxu2 %vm743_vm0, %v2689_v33  ;;  %v3127_v42 = vpack.c.bf16 %v1698_v40, %v1697_v34  ;;  %2616 = vmatmul.msk.bf16.gmra.mxu3 %vm743_vm0, %v2714_v36  ;;  %v2691_v34 = vld [vmem:[%s4288_s0 + $0x210] sm:$0xff]  ;;  %v2716_v37 = vld [vmem:[%s4288_s0 + $0x2d8] sm:$0xff] }
  0xf2   :  { %3268 = vst [vmem:[%s4291_s3 + $0x1b8] sm:$0xff] %v3002_v41  }
  0xf3   :  { %v1327_v45 = vpop.f32.mrf.mxu2  ;;  %3293 = vst [vmem:[%s4291_s3 + $0x280] sm:$0xff] %v3127_v42   ;;  %v1452_v46 = vpop.f32.mrf.mxu3 }
  0xf4   :  { %v1079_v47 = vpop.f32.mrf.mxu0  ;;  %v1204_v48 = vpop.f32.mrf.mxu1  ;;  %v1453_v55 = vadd.f32 %v3542_v39, %v1452_v46  ;;  %v1328_v58 = vadd.f32 %v3542_v39, %v1327_v45 }
  0xf5   :  { %v1080_v49 = vadd.f32 %v3542_v39, %v1079_v47  ;;  %v1205_v50 = vadd.f32 %v3542_v39, %v1204_v48 }
  0xf6   :  { %v1699_v3 = vmax.f32 %v1453_v55, 0.0  ;;  %v1649_v6 = vmax.f32 %v1328_v58, 0.0 }
  0xf7   :  { %v1550_v53 = vmax.f32 %v1080_v49, 0.0  ;;  %v1600_v54 = vmax.f32 %v1205_v50, 0.0 }
  0xf9   :  { %v2757_v56 = vpack.c.bf16 %v1550_v53, %v1549_v51  ;;  %v2882_v57 = vpack.c.bf16 %v1600_v54, %v1599_v52 }
  0xfb   :  { %3219 = vst [vmem:[%s4291_s3 + $0x30] sm:$0xff] %v2757_v56   ;;  %v1329_v59 = vpop.f32.mrf.mxu2  ;;  %v1454_v62 = vpop.f32.mrf.mxu3 }
  0xfc   :  { %3244 = vst [vmem:[%s4291_s3 + $0xf8] sm:$0xff] %v2882_v57   ;;  %v1330_v63 = vadd.f32 %v3542_v39, %v1329_v59  ;;  %v1082_v0 = vpop.f32.mrf.mxu0  ;;  %v1207_v1 = vpop.f32.mrf.mxu1  ;;  %v1455_v4 = vadd.f32 %v3542_v39, %v1454_v62  ;;  %v2667_v62 = vld [vmem:[%s4288_s0 + $0x150] sm:$0xff] }
  0xfd   :  { %v1083_v11 = vadd.f32 %v3542_v39, %v1082_v0  ;;  %v1208_v12 = vadd.f32 %v3542_v39, %v1207_v1 }
  0xfe   :  { %v1650_v7 = vmax.f32 %v1330_v63, 0.0  ;;  %v1700_v8 = vmax.f32 %v1455_v4, 0.0 }
  0xff   :  { %2542 = vmatmul.msk.bf16.gmra.mxu0 %vm743_vm0, %v2640_v60  ;;  %2567 = vmatmul.msk.bf16.gmra.mxu1 %vm743_vm0, %v2665_v61  ;;  %v1551_v19 = vmax.f32 %v1083_v11, 0.0  ;;  %v1601_v20 = vmax.f32 %v1208_v12, 0.0  ;;  %v2642_v61 = vld [vmem:[%s4288_s0 + $0x88] sm:$0xff] }
 0x100   :  { %v3007_v9 = vpack.c.bf16 %v1650_v7, %v1649_v6  ;;  %2592 = vmatmul.msk.bf16.gmra.mxu2 %vm743_vm0, %v2690_v2  ;;  %v3132_v10 = vpack.c.bf16 %v1700_v8, %v1699_v3  ;;  %2617 = vmatmul.msk.bf16.gmra.mxu3 %vm743_vm0, %v2715_v5  ;;  %v2692_v3 = vld [vmem:[%s4288_s0 + $0x218] sm:$0xff]  ;;  %v2717_v6 = vld [vmem:[%s4288_s0 + $0x2e0] sm:$0xff] }
 0x102   :  { %3269 = vst [vmem:[%s4291_s3 + $0x1c0] sm:$0xff] %v3007_v9  }
 0x103   :  { %v1332_v13 = vpop.f32.mrf.mxu2  ;;  %3294 = vst [vmem:[%s4291_s3 + $0x288] sm:$0xff] %v3132_v10   ;;  %v1457_v14 = vpop.f32.mrf.mxu3 }
 0x104   :  { %v1084_v15 = vpop.f32.mrf.mxu0  ;;  %v1209_v16 = vpop.f32.mrf.mxu1  ;;  %v1458_v23 = vadd.f32 %v3542_v39, %v1457_v14  ;;  %v1333_v26 = vadd.f32 %v3542_v39, %v1332_v13 }
 0x105   :  { %v1085_v17 = vadd.f32 %v3542_v39, %v1084_v15  ;;  %v1210_v18 = vadd.f32 %v3542_v39, %v1209_v16 }
 0x106   :  { %v1701_v35 = vmax.f32 %v1458_v23, 0.0  ;;  %v1651_v38 = vmax.f32 %v1333_v26, 0.0 }
 0x107   :  { %v1552_v21 = vmax.f32 %v1085_v17, 0.0  ;;  %v1602_v22 = vmax.f32 %v1210_v18, 0.0 }
 0x109   :  { %v2762_v24 = vpack.c.bf16 %v1552_v21, %v1551_v19  ;;  %v2887_v25 = vpack.c.bf16 %v1602_v22, %v1601_v20 }
 0x10b   :  { %3220 = vst [vmem:[%s4291_s3 + $0x38] sm:$0xff] %v2762_v24   ;;  %v1334_v27 = vpop.f32.mrf.mxu2  ;;  %v1459_v30 = vpop.f32.mrf.mxu3 }
 0x10c   :  { %3245 = vst [vmem:[%s4291_s3 + $0x100] sm:$0xff] %v2887_v25   ;;  %v1335_v31 = vadd.f32 %v3542_v39, %v1334_v27  ;;  %v1087_v32 = vpop.f32.mrf.mxu0  ;;  %v1212_v33 = vpop.f32.mrf.mxu1  ;;  %v1460_v36 = vadd.f32 %v3542_v39, %v1459_v30  ;;  %v2668_v30 = vld [vmem:[%s4288_s0 + $0x158] sm:$0xff] }
 0x10d   :  { %v1088_v44 = vadd.f32 %v3542_v39, %v1087_v32  ;;  %v1213_v45 = vadd.f32 %v3542_v39, %v1212_v33 }
 0x10e   :  { %v1652_v40 = vmax.f32 %v1335_v31, 0.0  ;;  %v1702_v41 = vmax.f32 %v1460_v36, 0.0 }
 0x10f   :  { %2543 = vmatmul.msk.bf16.gmra.mxu0 %vm743_vm0, %v2641_v28  ;;  %2568 = vmatmul.msk.bf16.gmra.mxu1 %vm743_vm0, %v2666_v29  ;;  %v1553_v52 = vmax.f32 %v1088_v44, 0.0  ;;  %v1603_v53 = vmax.f32 %v1213_v45, 0.0  ;;  %v2643_v29 = vld [vmem:[%s4288_s0 + $0x90] sm:$0xff] }
 0x110   :  { %v3012_v42 = vpack.c.bf16 %v1652_v40, %v1651_v38  ;;  %2593 = vmatmul.msk.bf16.gmra.mxu2 %vm743_vm0, %v2691_v34  ;;  %v3137_v43 = vpack.c.bf16 %v1702_v41, %v1701_v35  ;;  %2618 = vmatmul.msk.bf16.gmra.mxu3 %vm743_vm0, %v2716_v37  ;;  %v2693_v35 = vld [vmem:[%s4288_s0 + $0x220] sm:$0xff]  ;;  %v2718_v38 = vld [vmem:[%s4288_s0 + $0x2e8] sm:$0xff] }
 0x112   :  { %3270 = vst [vmem:[%s4291_s3 + $0x1c8] sm:$0xff] %v3012_v42  }
 0x113   :  { %v1337_v46 = vpop.f32.mrf.mxu2  ;;  %3295 = vst [vmem:[%s4291_s3 + $0x290] sm:$0xff] %v3137_v43   ;;  %v1462_v47 = vpop.f32.mrf.mxu3 }
 0x114   :  { %v1089_v48 = vpop.f32.mrf.mxu0  ;;  %v1214_v49 = vpop.f32.mrf.mxu1  ;;  %v1463_v56 = vadd.f32 %v3542_v39, %v1462_v47  ;;  %v1338_v59 = vadd.f32 %v3542_v39, %v1337_v46 }
 0x115   :  { %v1090_v50 = vadd.f32 %v3542_v39, %v1089_v48  ;;  %v1215_v51 = vadd.f32 %v3542_v39, %v1214_v49 }
 0x116   :  { %v1703_v4 = vmax.f32 %v1463_v56, 0.0  ;;  %v1653_v7 = vmax.f32 %v1338_v59, 0.0 }
 0x117   :  { %v1554_v54 = vmax.f32 %v1090_v50, 0.0  ;;  %v1604_v55 = vmax.f32 %v1215_v51, 0.0 }
 0x119   :  { %v2767_v57 = vpack.c.bf16 %v1554_v54, %v1553_v52  ;;  %v2892_v58 = vpack.c.bf16 %v1604_v55, %v1603_v53 }
 0x11b   :  { %3221 = vst [vmem:[%s4291_s3 + $0x40] sm:$0xff] %v2767_v57   ;;  %v1339_v60 = vpop.f32.mrf.mxu2  ;;  %v1464_v63 = vpop.f32.mrf.mxu3 }
 0x11c   :  { %3246 = vst [vmem:[%s4291_s3 + $0x108] sm:$0xff] %v2892_v58   ;;  %v1340_v0 = vadd.f32 %v3542_v39, %v1339_v60  ;;  %v1092_v1 = vpop.f32.mrf.mxu0  ;;  %v1217_v2 = vpop.f32.mrf.mxu1  ;;  %v1465_v5 = vadd.f32 %v3542_v39, %v1464_v63  ;;  %v2669_v63 = vld [vmem:[%s4288_s0 + $0x160] sm:$0xff] }
 0x11d   :  { %v1093_v12 = vadd.f32 %v3542_v39, %v1092_v1  ;;  %v1218_v13 = vadd.f32 %v3542_v39, %v1217_v2 }
 0x11e   :  { %v1654_v8 = vmax.f32 %v1340_v0, 0.0  ;;  %v1704_v9 = vmax.f32 %v1465_v5, 0.0 }
 0x11f   :  { %2544 = vmatmul.msk.bf16.gmra.mxu0 %vm743_vm0, %v2642_v61  ;;  %2569 = vmatmul.msk.bf16.gmra.mxu1 %vm743_vm0, %v2667_v62  ;;  %v1555_v20 = vmax.f32 %v1093_v12, 0.0  ;;  %v1605_v21 = vmax.f32 %v1218_v13, 0.0  ;;  %v2644_v62 = vld [vmem:[%s4288_s0 + $0x98] sm:$0xff] }
 0x120   :  { %v3017_v10 = vpack.c.bf16 %v1654_v8, %v1653_v7  ;;  %2594 = vmatmul.msk.bf16.gmra.mxu2 %vm743_vm0, %v2692_v3  ;;  %v3142_v11 = vpack.c.bf16 %v1704_v9, %v1703_v4  ;;  %2619 = vmatmul.msk.bf16.gmra.mxu3 %vm743_vm0, %v2717_v6  ;;  %v2694_v4 = vld [vmem:[%s4288_s0 + $0x228] sm:$0xff]  ;;  %v2719_v7 = vld [vmem:[%s4288_s0 + $0x2f0] sm:$0xff] }
 0x122   :  { %3271 = vst [vmem:[%s4291_s3 + $0x1d0] sm:$0xff] %v3017_v10  }
 0x123   :  { %v1342_v14 = vpop.f32.mrf.mxu2  ;;  %3296 = vst [vmem:[%s4291_s3 + $0x298] sm:$0xff] %v3142_v11   ;;  %v1467_v15 = vpop.f32.mrf.mxu3 }
 0x124   :  { %v1094_v16 = vpop.f32.mrf.mxu0  ;;  %v1219_v17 = vpop.f32.mrf.mxu1  ;;  %v1468_v24 = vadd.f32 %v3542_v39, %v1467_v15  ;;  %v1343_v27 = vadd.f32 %v3542_v39, %v1342_v14 }
 0x125   :  { %v1095_v18 = vadd.f32 %v3542_v39, %v1094_v16  ;;  %v1220_v19 = vadd.f32 %v3542_v39, %v1219_v17 }
 0x126   :  { %v1705_v36 = vmax.f32 %v1468_v24, 0.0  ;;  %v1655_v40 = vmax.f32 %v1343_v27, 0.0 }
 0x127   :  { %v1556_v22 = vmax.f32 %v1095_v18, 0.0  ;;  %v1606_v23 = vmax.f32 %v1220_v19, 0.0 }
 0x129   :  { %v2772_v25 = vpack.c.bf16 %v1556_v22, %v1555_v20  ;;  %v2897_v26 = vpack.c.bf16 %v1606_v23, %v1605_v21 }
 0x12b   :  { %3222 = vst [vmem:[%s4291_s3 + $0x48] sm:$0xff] %v2772_v25   ;;  %v1344_v28 = vpop.f32.mrf.mxu2  ;;  %v1469_v31 = vpop.f32.mrf.mxu3 }
 0x12c   :  { %3247 = vst [vmem:[%s4291_s3 + $0x110] sm:$0xff] %v2897_v26   ;;  %v1345_v32 = vadd.f32 %v3542_v39, %v1344_v28  ;;  %v1097_v33 = vpop.f32.mrf.mxu0  ;;  %v1222_v34 = vpop.f32.mrf.mxu1  ;;  %v1470_v37 = vadd.f32 %v3542_v39, %v1469_v31  ;;  %v2670_v31 = vld [vmem:[%s4288_s0 + $0x168] sm:$0xff] }
 0x12d   :  { %v1098_v45 = vadd.f32 %v3542_v39, %v1097_v33  ;;  %v1223_v46 = vadd.f32 %v3542_v39, %v1222_v34 }
 0x12e   :  { %v1656_v41 = vmax.f32 %v1345_v32, 0.0  ;;  %v1706_v42 = vmax.f32 %v1470_v37, 0.0 }
 0x12f   :  { %2545 = vmatmul.msk.bf16.gmra.mxu0 %vm743_vm0, %v2643_v29  ;;  %2570 = vmatmul.msk.bf16.gmra.mxu1 %vm743_vm0, %v2668_v30  ;;  %v1557_v53 = vmax.f32 %v1098_v45, 0.0  ;;  %v1607_v54 = vmax.f32 %v1223_v46, 0.0  ;;  %v2645_v30 = vld [vmem:[%s4288_s0 + $0xa0] sm:$0xff] }
 0x130   :  { %v3022_v43 = vpack.c.bf16 %v1656_v41, %v1655_v40  ;;  %2595 = vmatmul.msk.bf16.gmra.mxu2 %vm743_vm0, %v2693_v35  ;;  %v3147_v44 = vpack.c.bf16 %v1706_v42, %v1705_v36  ;;  %2620 = vmatmul.msk.bf16.gmra.mxu3 %vm743_vm0, %v2718_v38  ;;  %v2695_v36 = vld [vmem:[%s4288_s0 + $0x230] sm:$0xff]  ;;  %v2720_v40 = vld [vmem:[%s4288_s0 + $0x2f8] sm:$0xff] }
 0x132   :  { %3272 = vst [vmem:[%s4291_s3 + $0x1d8] sm:$0xff] %v3022_v43  }
 0x133   :  { %v1347_v47 = vpop.f32.mrf.mxu2  ;;  %3297 = vst [vmem:[%s4291_s3 + $0x2a0] sm:$0xff] %v3147_v44   ;;  %v1472_v48 = vpop.f32.mrf.mxu3 }
 0x134   :  { %v1099_v49 = vpop.f32.mrf.mxu0  ;;  %v1224_v50 = vpop.f32.mrf.mxu1  ;;  %v1473_v57 = vadd.f32 %v3542_v39, %v1472_v48  ;;  %v1348_v60 = vadd.f32 %v3542_v39, %v1347_v47 }
 0x135   :  { %v1100_v51 = vadd.f32 %v3542_v39, %v1099_v49  ;;  %v1225_v52 = vadd.f32 %v3542_v39, %v1224_v50 }
 0x136   :  { %v1707_v5 = vmax.f32 %v1473_v57, 0.0  ;;  %v1657_v8 = vmax.f32 %v1348_v60, 0.0 }
 0x137   :  { %v1558_v55 = vmax.f32 %v1100_v51, 0.0  ;;  %v1608_v56 = vmax.f32 %v1225_v52, 0.0 }
 0x139   :  { %v2777_v58 = vpack.c.bf16 %v1558_v55, %v1557_v53  ;;  %v2902_v59 = vpack.c.bf16 %v1608_v56, %v1607_v54 }
 0x13b   :  { %3223 = vst [vmem:[%s4291_s3 + $0x50] sm:$0xff] %v2777_v58   ;;  %v1349_v61 = vpop.f32.mrf.mxu2  ;;  %v1474_v0 = vpop.f32.mrf.mxu3 }
 0x13c   :  { %3248 = vst [vmem:[%s4291_s3 + $0x118] sm:$0xff] %v2902_v59   ;;  %v1350_v1 = vadd.f32 %v3542_v39, %v1349_v61  ;;  %v1102_v2 = vpop.f32.mrf.mxu0  ;;  %v1227_v3 = vpop.f32.mrf.mxu1  ;;  %v1475_v6 = vadd.f32 %v3542_v39, %v1474_v0  ;;  %v2671_v0 = vld [vmem:[%s4288_s0 + $0x170] sm:$0xff] }
 0x13d   :  { %v1103_v13 = vadd.f32 %v3542_v39, %v1102_v2  ;;  %v1228_v14 = vadd.f32 %v3542_v39, %v1227_v3 }
 0x13e   :  { %v1658_v9 = vmax.f32 %v1350_v1, 0.0  ;;  %v1708_v10 = vmax.f32 %v1475_v6, 0.0 }
 0x13f   :  { %2546 = vmatmul.msk.bf16.gmra.mxu0 %vm743_vm0, %v2644_v62  ;;  %2571 = vmatmul.msk.bf16.gmra.mxu1 %vm743_vm0, %v2669_v63  ;;  %v1559_v21 = vmax.f32 %v1103_v13, 0.0  ;;  %v1609_v22 = vmax.f32 %v1228_v14, 0.0  ;;  %v2646_v63 = vld [vmem:[%s4288_s0 + $0xa8] sm:$0xff] }
 0x140   :  { %v3027_v11 = vpack.c.bf16 %v1658_v9, %v1657_v8  ;;  %2596 = vmatmul.msk.bf16.gmra.mxu2 %vm743_vm0, %v2694_v4  ;;  %v3152_v12 = vpack.c.bf16 %v1708_v10, %v1707_v5  ;;  %2621 = vmatmul.msk.bf16.gmra.mxu3 %vm743_vm0, %v2719_v7  ;;  %v2696_v5 = vld [vmem:[%s4288_s0 + $0x238] sm:$0xff]  ;;  %v4002_v7 = vld [vmem:[#allocation4] ss:$0 sm:$0xff]  ;;  %v2721_v9 = vld [vmem:[%s4288_s0 + $0x300] sm:$0xff] }
 0x142   :  { %3273 = vst [vmem:[%s4291_s3 + $0x1e0] sm:$0xff] %v3027_v11  }
 0x143   :  { %v1352_v15 = vpop.f32.mrf.mxu2  ;;  %3298 = vst [vmem:[%s4291_s3 + $0x2a8] sm:$0xff] %v3152_v12   ;;  %v1477_v16 = vpop.f32.mrf.mxu3 }
 0x144   :  { %v1104_v17 = vpop.f32.mrf.mxu0  ;;  %v1229_v18 = vpop.f32.mrf.mxu1  ;;  %v1478_v25 = vadd.f32 %v3542_v39, %v1477_v16  ;;  %v1353_v28 = vadd.f32 %v3542_v39, %v1352_v15 }
 0x145   :  { %v1105_v19 = vadd.f32 %v3542_v39, %v1104_v17  ;;  %v1230_v20 = vadd.f32 %v3542_v39, %v1229_v18 }
 0x146   :  { %v1709_v37 = vmax.f32 %v1478_v25, 0.0  ;;  %v1659_v41 = vmax.f32 %v1353_v28, 0.0 }
 0x147   :  { %v1560_v23 = vmax.f32 %v1105_v19, 0.0  ;;  %v1610_v24 = vmax.f32 %v1230_v20, 0.0 }
 0x149   :  { %v2782_v26 = vpack.c.bf16 %v1560_v23, %v1559_v21  ;;  %v2907_v27 = vpack.c.bf16 %v1610_v24, %v1609_v22 }
 0x14b   :  { %3224 = vst [vmem:[%s4291_s3 + $0x58] sm:$0xff] %v2782_v26   ;;  %v1354_v29 = vpop.f32.mrf.mxu2  ;;  %v1479_v32 = vpop.f32.mrf.mxu3 }
 0x14c   :  { %3249 = vst [vmem:[%s4291_s3 + $0x120] sm:$0xff] %v2907_v27   ;;  %v1355_v33 = vadd.f32 %v3542_v39, %v1354_v29  ;;  %v1107_v34 = vpop.f32.mrf.mxu0  ;;  %v1232_v35 = vpop.f32.mrf.mxu1  ;;  %v1480_v38 = vadd.f32 %v3542_v39, %v1479_v32  ;;  %v2672_v32 = vld [vmem:[%s4288_s0 + $0x178] sm:$0xff] }
 0x14d   :  { %v1108_v46 = vadd.f32 %v3542_v39, %v1107_v34  ;;  %v1233_v47 = vadd.f32 %v3542_v39, %v1232_v35 }
 0x14e   :  { %v1660_v42 = vmax.f32 %v1355_v33, 0.0  ;;  %v1710_v43 = vmax.f32 %v1480_v38, 0.0 }
 0x14f   :  { %2547 = vmatmul.msk.bf16.gmra.mxu0 %vm743_vm0, %v2645_v30  ;;  %2572 = vmatmul.msk.bf16.gmra.mxu1 %vm743_vm0, %v2670_v31  ;;  %v1561_v54 = vmax.f32 %v1108_v46, 0.0  ;;  %v1611_v55 = vmax.f32 %v1233_v47, 0.0  ;;  %v2647_v31 = vld [vmem:[%s4288_s0 + $0xb0] sm:$0xff] }
 0x150   :  { %v3032_v44 = vpack.c.bf16 %v1660_v42, %v1659_v41  ;;  %2597 = vmatmul.msk.bf16.gmra.mxu2 %vm743_vm0, %v2695_v36  ;;  %v3157_v45 = vpack.c.bf16 %v1710_v43, %v1709_v37  ;;  %2622 = vmatmul.msk.bf16.gmra.mxu3 %vm743_vm0, %v2720_v40  ;;  %v2697_v37 = vld [vmem:[%s4288_s0 + $0x240] sm:$0xff]  ;;  %v2722_v41 = vld [vmem:[%s4288_s0 + $0x308] sm:$0xff] }
 0x152   :  { %3274 = vst [vmem:[%s4291_s3 + $0x1e8] sm:$0xff] %v3032_v44  }
 0x153   :  { %v1357_v48 = vpop.f32.mrf.mxu2  ;;  %3299 = vst [vmem:[%s4291_s3 + $0x2b0] sm:$0xff] %v3157_v45   ;;  %v1482_v49 = vpop.f32.mrf.mxu3 }
 0x154   :  { %v1109_v50 = vpop.f32.mrf.mxu0  ;;  %v1234_v51 = vpop.f32.mrf.mxu1  ;;  %v1483_v58 = vadd.f32 %v3542_v39, %v1482_v49  ;;  %v1358_v61 = vadd.f32 %v3542_v39, %v1357_v48 }
 0x155   :  { %v1110_v52 = vadd.f32 %v3542_v39, %v1109_v50  ;;  %v1235_v53 = vadd.f32 %v3542_v39, %v1234_v51 }
 0x156   :  { %v1711_v6 = vmax.f32 %v1483_v58, 0.0  ;;  %v1661_v10 = vmax.f32 %v1358_v61, 0.0 }
 0x157   :  { %v1562_v56 = vmax.f32 %v1110_v52, 0.0  ;;  %v1612_v57 = vmax.f32 %v1235_v53, 0.0 }
 0x159   :  { %v2787_v59 = vpack.c.bf16 %v1562_v56, %v1561_v54  ;;  %v2912_v60 = vpack.c.bf16 %v1612_v57, %v1611_v55 }
 0x15b   :  { %3225 = vst [vmem:[%s4291_s3 + $0x60] sm:$0xff] %v2787_v59   ;;  %v1359_v62 = vpop.f32.mrf.mxu2  ;;  %v1484_v1 = vpop.f32.mrf.mxu3 }
 0x15c   :  { %3250 = vst [vmem:[%s4291_s3 + $0x128] sm:$0xff] %v2912_v60   ;;  %v1360_v2 = vadd.f32 %v3542_v39, %v1359_v62  ;;  %v1112_v3 = vpop.f32.mrf.mxu0  ;;  %v1237_v4 = vpop.f32.mrf.mxu1  ;;  %v1485_v8 = vadd.f32 %v4002_v7, %v1484_v1  ;;  %v2673_v1 = vld [vmem:[%s4288_s0 + $0x180] sm:$0xff] }
 0x15d   :  { %v1113_v14 = vadd.f32 %v4002_v7, %v1112_v3  ;;  %v1238_v15 = vadd.f32 %v4002_v7, %v1237_v4 }
 0x15e   :  { %v1662_v11 = vmax.f32 %v1360_v2, 0.0  ;;  %v1712_v12 = vmax.f32 %v1485_v8, 0.0 }
 0x15f   :  { %2548 = vmatmul.msk.bf16.gmra.mxu0 %vm743_vm0, %v2646_v63  ;;  %2573 = vmatmul.msk.bf16.gmra.mxu1 %vm743_vm0, %v2671_v0  ;;  %v1563_v22 = vmax.f32 %v1113_v14, 0.0  ;;  %v1613_v23 = vmax.f32 %v1238_v15, 0.0  ;;  %v2648_v0 = vld [vmem:[%s4288_s0 + $0xb8] sm:$0xff] }
 0x160   :  { %v3037_v39 = vpack.c.bf16 %v1662_v11, %v1661_v10  ;;  %2598 = vmatmul.msk.bf16.gmra.mxu2 %vm743_vm0, %v2696_v5  ;;  %v3162_v13 = vpack.c.bf16 %v1712_v12, %v1711_v6  ;;  %2623 = vmatmul.msk.bf16.gmra.mxu3 %vm743_vm0, %v2721_v9  ;;  %v2698_v6 = vld [vmem:[%s4288_s0 + $0x248] sm:$0xff] }
 0x162   :  { %3275 = vst [vmem:[%s4291_s3 + $0x1f0] sm:$0xff] %v3037_v39  }
 0x163   :  { %v1362_v16 = vpop.f32.mrf.mxu2  ;;  %3300 = vst [vmem:[%s4291_s3 + $0x2b8] sm:$0xff] %v3162_v13   ;;  %v1487_v17 = vpop.f32.mrf.mxu3 }
 0x164   :  { %v1114_v18 = vpop.f32.mrf.mxu0  ;;  %v1239_v19 = vpop.f32.mrf.mxu1  ;;  %v1488_v26 = vadd.f32 %v4002_v7, %v1487_v17  ;;  %v1363_v29 = vadd.f32 %v4002_v7, %v1362_v16 }
 0x165   :  { %v1115_v20 = vadd.f32 %v4002_v7, %v1114_v18  ;;  %v1240_v21 = vadd.f32 %v4002_v7, %v1239_v19 }
 0x166   :  { %v1713_v38 = vmax.f32 %v1488_v26, 0.0  ;;  %v1663_v42 = vmax.f32 %v1363_v29, 0.0 }
 0x167   :  { %v1564_v24 = vmax.f32 %v1115_v20, 0.0  ;;  %v1614_v25 = vmax.f32 %v1240_v21, 0.0 }
 0x169   :  { %v2792_v27 = vpack.c.bf16 %v1564_v24, %v1563_v22  ;;  %v2917_v28 = vpack.c.bf16 %v1614_v25, %v1613_v23 }
 0x16b   :  { %3226 = vst [vmem:[%s4291_s3 + $0x68] sm:$0xff] %v2792_v27   ;;  %v1364_v30 = vpop.f32.mrf.mxu2  ;;  %v1489_v33 = vpop.f32.mrf.mxu3 }
 0x16c   :  { %3251 = vst [vmem:[%s4291_s3 + $0x130] sm:$0xff] %v2917_v28   ;;  %v1365_v34 = vadd.f32 %v4002_v7, %v1364_v30  ;;  %v1117_v35 = vpop.f32.mrf.mxu0  ;;  %v1242_v36 = vpop.f32.mrf.mxu1  ;;  %v1490_v40 = vadd.f32 %v4002_v7, %v1489_v33 }
 0x16d   :  { %v1118_v47 = vadd.f32 %v4002_v7, %v1117_v35  ;;  %v1243_v48 = vadd.f32 %v4002_v7, %v1242_v36 }
 0x16e   :  { %v1664_v43 = vmax.f32 %v1365_v34, 0.0  ;;  %v1714_v44 = vmax.f32 %v1490_v40, 0.0 }
 0x16f   :  { %2549 = vmatmul.msk.bf16.gmra.mxu0 %vm743_vm0, %v2647_v31  ;;  %2574 = vmatmul.msk.bf16.gmra.mxu1 %vm743_vm0, %v2672_v32  ;;  %v1565_v55 = vmax.f32 %v1118_v47, 0.0  ;;  %v1615_v56 = vmax.f32 %v1243_v48, 0.0  ;;  %v2649_v31 = vld [vmem:[%s4288_s0 + $0xc0] sm:$0xff]  ;;  %v2674_v32 = vld [vmem:[%s4288_s0 + $0x188] sm:$0xff] }
 0x170   :  { %v3042_v45 = vpack.c.bf16 %v1664_v43, %v1663_v42  ;;  %2599 = vmatmul.msk.bf16.gmra.mxu2 %vm743_vm0, %v2697_v37  ;;  %v3167_v46 = vpack.c.bf16 %v1714_v44, %v1713_v38  ;;  %2624 = vmatmul.msk.bf16.gmra.mxu3 %vm743_vm0, %v2722_v41  ;;  %v2699_v37 = vld [vmem:[%s4288_s0 + $0x250] sm:$0xff] }
 0x172   :  { %3276 = vst [vmem:[%s4291_s3 + $0x1f8] sm:$0xff] %v3042_v45  }
 0x173   :  { %v1367_v49 = vpop.f32.mrf.mxu2  ;;  %3301 = vst [vmem:[%s4291_s3 + $0x2c0] sm:$0xff] %v3167_v46   ;;  %v1492_v50 = vpop.f32.mrf.mxu3 }
 0x174   :  { %v1119_v51 = vpop.f32.mrf.mxu0  ;;  %v1244_v52 = vpop.f32.mrf.mxu1  ;;  %v1493_v59 = vadd.f32 %v4002_v7, %v1492_v50  ;;  %v1368_v62 = vadd.f32 %v4002_v7, %v1367_v49 }
 0x175   :  { %v1120_v53 = vadd.f32 %v4002_v7, %v1119_v51  ;;  %v1245_v54 = vadd.f32 %v4002_v7, %v1244_v52 }
 0x176   :  { %v1715_v8 = vmax.f32 %v1493_v59, 0.0  ;;  %v1665_v10 = vmax.f32 %v1368_v62, 0.0 }
 0x177   :  { %v1566_v57 = vmax.f32 %v1120_v53, 0.0  ;;  %v1616_v58 = vmax.f32 %v1245_v54, 0.0 }
 0x179   :  { %v2797_v60 = vpack.c.bf16 %v1566_v57, %v1565_v55  ;;  %v2922_v61 = vpack.c.bf16 %v1616_v58, %v1615_v56 }
 0x17b   :  { %3227 = vst [vmem:[%s4291_s3 + $0x70] sm:$0xff] %v2797_v60   ;;  %v1369_v63 = vpop.f32.mrf.mxu2  ;;  %v1494_v2 = vpop.f32.mrf.mxu3 }
 0x17c   :  { %3252 = vst [vmem:[%s4291_s3 + $0x138] sm:$0xff] %v2922_v61   ;;  %v1370_v3 = vadd.f32 %v4002_v7, %v1369_v63  ;;  %v1122_v4 = vpop.f32.mrf.mxu0  ;;  %v1247_v5 = vpop.f32.mrf.mxu1  ;;  %v1495_v9 = vadd.f32 %v4002_v7, %v1494_v2 }
 0x17d   :  { %v1123_v14 = vadd.f32 %v4002_v7, %v1122_v4  ;;  %v1248_v15 = vadd.f32 %v4002_v7, %v1247_v5 }
 0x17e   :  { %v1666_v11 = vmax.f32 %v1370_v3, 0.0  ;;  %v1716_v12 = vmax.f32 %v1495_v9, 0.0 }
 0x17f   :  { %2550 = vmatmul.msk.bf16.gmra.mxu0 %vm743_vm0, %v2648_v0  ;;  %2575 = vmatmul.msk.bf16.gmra.mxu1 %vm743_vm0, %v2673_v1  ;;  %v1567_v22 = vmax.f32 %v1123_v14, 0.0  ;;  %v1617_v23 = vmax.f32 %v1248_v15, 0.0 }
 0x180   :  { %v3047_v39 = vpack.c.bf16 %v1666_v11, %v1665_v10  ;;  %2600 = vmatmul.msk.bf16.gmra.mxu2 %vm743_vm0, %v2698_v6  ;;  %v3172_v13 = vpack.c.bf16 %v1716_v12, %v1715_v8 }
 0x182   :  { %3277 = vst [vmem:[%s4291_s3 + $0x200] sm:$0xff] %v3047_v39  }
 0x183   :  { %v1372_v16 = vpop.f32.mrf.mxu2  ;;  %3302 = vst [vmem:[%s4291_s3 + $0x2c8] sm:$0xff] %v3172_v13   ;;  %v1497_v17 = vpop.f32.mrf.mxu3 }
 0x184   :  { %v1124_v18 = vpop.f32.mrf.mxu0  ;;  %v1249_v19 = vpop.f32.mrf.mxu1  ;;  %v1498_v26 = vadd.f32 %v4002_v7, %v1497_v17  ;;  %v1373_v29 = vadd.f32 %v4002_v7, %v1372_v16 }
 0x185   :  { %v1125_v20 = vadd.f32 %v4002_v7, %v1124_v18  ;;  %v1250_v21 = vadd.f32 %v4002_v7, %v1249_v19 }
 0x186   :  { %v1717_v38 = vmax.f32 %v1498_v26, 0.0  ;;  %v1667_v41 = vmax.f32 %v1373_v29, 0.0 }
 0x187   :  { %v1568_v24 = vmax.f32 %v1125_v20, 0.0  ;;  %v1618_v25 = vmax.f32 %v1250_v21, 0.0 }
 0x189   :  { %v2802_v27 = vpack.c.bf16 %v1568_v24, %v1567_v22  ;;  %v2927_v28 = vpack.c.bf16 %v1618_v25, %v1617_v23 }
 0x18b   :  { %3228 = vst [vmem:[%s4291_s3 + $0x78] sm:$0xff] %v2802_v27   ;;  %v1374_v30 = vpop.f32.mrf.mxu2  ;;  %v1499_v33 = vpop.f32.mrf.mxu3 }
 0x18c   :  { %3253 = vst [vmem:[%s4291_s3 + $0x140] sm:$0xff] %v2927_v28   ;;  %v1375_v34 = vadd.f32 %v4002_v7, %v1374_v30  ;;  %v1127_v35 = vpop.f32.mrf.mxu0  ;;  %v1252_v36 = vpop.f32.mrf.mxu1  ;;  %v1500_v40 = vadd.f32 %v4002_v7, %v1499_v33 }
 0x18d   :  { %v1128_v46 = vadd.f32 %v4002_v7, %v1127_v35  ;;  %v1253_v47 = vadd.f32 %v4002_v7, %v1252_v36 }
 0x18e   :  { %v1668_v42 = vmax.f32 %v1375_v34, 0.0  ;;  %v1718_v43 = vmax.f32 %v1500_v40, 0.0 }
 0x18f   :  { %2551 = vmatmul.msk.bf16.gmra.mxu0 %vm743_vm0, %v2649_v31  ;;  %2576 = vmatmul.msk.bf16.gmra.mxu1 %vm743_vm0, %v2674_v32  ;;  %v1569_v54 = vmax.f32 %v1128_v46, 0.0  ;;  %v1619_v55 = vmax.f32 %v1253_v47, 0.0 }
 0x190   :  { %v3052_v44 = vpack.c.bf16 %v1668_v42, %v1667_v41  ;;  %2601 = vmatmul.msk.bf16.gmra.mxu2 %vm743_vm0, %v2699_v37  ;;  %v3177_v45 = vpack.c.bf16 %v1718_v43, %v1717_v38 }
 0x192   :  { %3278 = vst [vmem:[%s4291_s3 + $0x208] sm:$0xff] %v3052_v44  }
 0x193   :  { %v1377_v48 = vpop.f32.mrf.mxu2  ;;  %3303 = vst [vmem:[%s4291_s3 + $0x2d0] sm:$0xff] %v3177_v45   ;;  %v1502_v49 = vpop.f32.mrf.mxu3 }
 0x194   :  { %v1129_v50 = vpop.f32.mrf.mxu0  ;;  %v1254_v51 = vpop.f32.mrf.mxu1  ;;  %v1503_v58 = vadd.f32 %v4002_v7, %v1502_v49  ;;  %v1378_v61 = vadd.f32 %v4002_v7, %v1377_v48 }
 0x195   :  { %v1130_v52 = vadd.f32 %v4002_v7, %v1129_v50  ;;  %v1255_v53 = vadd.f32 %v4002_v7, %v1254_v51 }
 0x196   :  { %v1719_v3 = vmax.f32 %v1503_v58, 0.0  ;;  %v1669_v5 = vmax.f32 %v1378_v61, 0.0 }
 0x197   :  { %v1570_v56 = vmax.f32 %v1130_v52, 0.0  ;;  %v1620_v57 = vmax.f32 %v1255_v53, 0.0 }
 0x199   :  { %v2807_v59 = vpack.c.bf16 %v1570_v56, %v1569_v54  ;;  %v2932_v60 = vpack.c.bf16 %v1620_v57, %v1619_v55 }
 0x19b   :  { %3229 = vst [vmem:[%s4291_s3 + $0x80] sm:$0xff] %v2807_v59   ;;  %v1379_v62 = vpop.f32.mrf.mxu2  ;;  %v1504_v63 = vpop.f32.mrf.mxu3 }
 0x19c   :  { %3254 = vst [vmem:[%s4291_s3 + $0x148] sm:$0xff] %v2932_v60   ;;  %v1380_v0 = vadd.f32 %v4002_v7, %v1379_v62  ;;  %v1132_v1 = vpop.f32.mrf.mxu0  ;;  %v1257_v2 = vpop.f32.mrf.mxu1  ;;  %v1505_v4 = vadd.f32 %v4002_v7, %v1504_v63 }
 0x19d   :  { %v1133_v11 = vadd.f32 %v4002_v7, %v1132_v1  ;;  %v1258_v12 = vadd.f32 %v4002_v7, %v1257_v2 }
 0x19e   :  { %v1670_v6 = vmax.f32 %v1380_v0, 0.0  ;;  %v1720_v8 = vmax.f32 %v1505_v4, 0.0 }
 0x19f   :  { %v1571_v18 = vmax.f32 %v1133_v11, 0.0  ;;  %v1621_v19 = vmax.f32 %v1258_v12, 0.0 }
 0x1a0   :  { %v3057_v9 = vpack.c.bf16 %v1670_v6, %v1669_v5  ;;  %v3182_v10 = vpack.c.bf16 %v1720_v8, %v1719_v3 }
 0x1a2   :  { %3279 = vst [vmem:[%s4291_s3 + $0x210] sm:$0xff] %v3057_v9  }
 0x1a3   :  { %v1382_v39 = vpop.f32.mrf.mxu2  ;;  %3304 = vst [vmem:[%s4291_s3 + $0x2d8] sm:$0xff] %v3182_v10   ;;  %v1507_v13 = vpop.f32.mrf.mxu3 }
 0x1a4   :  { %v1134_v14 = vpop.f32.mrf.mxu0  ;;  %v1259_v15 = vpop.f32.mrf.mxu1  ;;  %v1508_v22 = vadd.f32 %v4002_v7, %v1507_v13  ;;  %v1383_v25 = vadd.f32 %v4002_v7, %v1382_v39 }
 0x1a5   :  { %v1135_v16 = vadd.f32 %v4002_v7, %v1134_v14  ;;  %v1260_v17 = vadd.f32 %v4002_v7, %v1259_v15 }
 0x1a6   :  { %v1721_v31 = vmax.f32 %v1508_v22, 0.0  ;;  %v1671_v33 = vmax.f32 %v1383_v25, 0.0 }
 0x1a7   :  { %v1572_v20 = vmax.f32 %v1135_v16, 0.0  ;;  %v1622_v21 = vmax.f32 %v1260_v17, 0.0 }
 0x1a9   :  { %v2812_v23 = vpack.c.bf16 %v1572_v20, %v1571_v18  ;;  %v2937_v24 = vpack.c.bf16 %v1622_v21, %v1621_v19 }
 0x1ab   :  { %3230 = vst [vmem:[%s4291_s3 + $0x88] sm:$0xff] %v2812_v23   ;;  %v1384_v26 = vpop.f32.mrf.mxu2  ;;  %v1509_v27 = vpop.f32.mrf.mxu3 }
 0x1ac   :  { %3255 = vst [vmem:[%s4291_s3 + $0x150] sm:$0xff] %v2937_v24   ;;  %v1385_v28 = vadd.f32 %v4002_v7, %v1384_v26  ;;  %v1137_v29 = vpop.f32.mrf.mxu0  ;;  %v1262_v30 = vpop.f32.mrf.mxu1  ;;  %v1510_v32 = vadd.f32 %v4002_v7, %v1509_v27 }
 0x1ad   :  { %v1138_v38 = vadd.f32 %v4002_v7, %v1137_v29  ;;  %v1263_v40 = vadd.f32 %v4002_v7, %v1262_v30 }
 0x1ae   :  { %v1672_v34 = vmax.f32 %v1385_v28, 0.0  ;;  %v1722_v35 = vmax.f32 %v1510_v32, 0.0 }
 0x1af   :  { %v1573_v47 = vmax.f32 %v1138_v38, 0.0  ;;  %v1623_v48 = vmax.f32 %v1263_v40, 0.0 }
 0x1b0   :  { %v3062_v36 = vpack.c.bf16 %v1672_v34, %v1671_v33  ;;  %v3187_v37 = vpack.c.bf16 %v1722_v35, %v1721_v31 }
 0x1b2   :  { %3280 = vst [vmem:[%s4291_s3 + $0x218] sm:$0xff] %v3062_v36  }
 0x1b3   :  { %v1387_v41 = vpop.f32.mrf.mxu2  ;;  %3305 = vst [vmem:[%s4291_s3 + $0x2e0] sm:$0xff] %v3187_v37   ;;  %v1512_v42 = vpop.f32.mrf.mxu3 }
 0x1b4   :  { %v1139_v43 = vpop.f32.mrf.mxu0  ;;  %v1264_v44 = vpop.f32.mrf.mxu1  ;;  %v1513_v51 = vadd.f32 %v4002_v7, %v1512_v42  ;;  %v1388_v54 = vadd.f32 %v4002_v7, %v1387_v41 }
 0x1b5   :  { %v1140_v45 = vadd.f32 %v4002_v7, %v1139_v43  ;;  %v1265_v46 = vadd.f32 %v4002_v7, %v1264_v44 }
 0x1b6   :  { %v1723_v60 = vmax.f32 %v1513_v51, 0.0  ;;  %v1673_v62 = vmax.f32 %v1388_v54, 0.0 }
 0x1b7   :  { %v1574_v49 = vmax.f32 %v1140_v45, 0.0  ;;  %v1624_v50 = vmax.f32 %v1265_v46, 0.0 }
 0x1b9   :  { %v2817_v52 = vpack.c.bf16 %v1574_v49, %v1573_v47  ;;  %v2942_v53 = vpack.c.bf16 %v1624_v50, %v1623_v48 }
 0x1bb   :  { %3231 = vst [vmem:[%s4291_s3 + $0x90] sm:$0xff] %v2817_v52   ;;  %v1389_v55 = vpop.f32.mrf.mxu2  ;;  %v1514_v56 = vpop.f32.mrf.mxu3 }
 0x1bc   :  { %3256 = vst [vmem:[%s4291_s3 + $0x158] sm:$0xff] %v2942_v53   ;;  %v1390_v57 = vadd.f32 %v4002_v7, %v1389_v55  ;;  %v1142_v58 = vpop.f32.mrf.mxu0  ;;  %v1267_v59 = vpop.f32.mrf.mxu1  ;;  %v1515_v61 = vadd.f32 %v4002_v7, %v1514_v56 }
 0x1bd   :  { %v1143_v3 = vadd.f32 %v4002_v7, %v1142_v58  ;;  %v1268_v4 = vadd.f32 %v4002_v7, %v1267_v59 }
 0x1be   :  { %v1674_v63 = vmax.f32 %v1390_v57, 0.0  ;;  %v1724_v0 = vmax.f32 %v1515_v61, 0.0 }
 0x1bf   :  { %v1575_v12 = vmax.f32 %v1143_v3, 0.0  ;;  %v1625_v39 = vmax.f32 %v1268_v4, 0.0 }
 0x1c0   :  { %v3067_v1 = vpack.c.bf16 %v1674_v63, %v1673_v62  ;;  %v3192_v2 = vpack.c.bf16 %v1724_v0, %v1723_v60 }
 0x1c2   :  { %3281 = vst [vmem:[%s4291_s3 + $0x220] sm:$0xff] %v3067_v1  }
 0x1c3   :  { %v1392_v5 = vpop.f32.mrf.mxu2  ;;  %3306 = vst [vmem:[%s4291_s3 + $0x2e8] sm:$0xff] %v3192_v2   ;;  %v1517_v6 = vpop.f32.mrf.mxu3 }
 0x1c4   :  { %v1144_v8 = vpop.f32.mrf.mxu0  ;;  %v1269_v9 = vpop.f32.mrf.mxu1  ;;  %v1518_v15 = vadd.f32 %v4002_v7, %v1517_v6  ;;  %v1393_v18 = vadd.f32 %v4002_v7, %v1392_v5 }
 0x1c5   :  { %v1145_v10 = vadd.f32 %v4002_v7, %v1144_v8  ;;  %v1270_v11 = vadd.f32 %v4002_v7, %v1269_v9 }
 0x1c6   :  { %v1725_v24 = vmax.f32 %v1518_v15, 0.0  ;;  %v1675_v26 = vmax.f32 %v1393_v18, 0.0 }
 0x1c7   :  { %v1576_v13 = vmax.f32 %v1145_v10, 0.0  ;;  %v1626_v14 = vmax.f32 %v1270_v11, 0.0 }
 0x1c9   :  { %v2822_v16 = vpack.c.bf16 %v1576_v13, %v1575_v12  ;;  %v2947_v17 = vpack.c.bf16 %v1626_v14, %v1625_v39 }
 0x1cb   :  { %3232 = vst [vmem:[%s4291_s3 + $0x98] sm:$0xff] %v2822_v16   ;;  %v1394_v19 = vpop.f32.mrf.mxu2  ;;  %v1519_v20 = vpop.f32.mrf.mxu3 }
 0x1cc   :  { %3257 = vst [vmem:[%s4291_s3 + $0x160] sm:$0xff] %v2947_v17   ;;  %v1395_v21 = vadd.f32 %v4002_v7, %v1394_v19  ;;  %v1147_v22 = vpop.f32.mrf.mxu0  ;;  %v1272_v23 = vpop.f32.mrf.mxu1  ;;  %v1520_v25 = vadd.f32 %v4002_v7, %v1519_v20 }
 0x1cd   :  { %v1148_v31 = vadd.f32 %v4002_v7, %v1147_v22  ;;  %v1273_v32 = vadd.f32 %v4002_v7, %v1272_v23 }
 0x1ce   :  { %v1676_v27 = vmax.f32 %v1395_v21, 0.0  ;;  %v1726_v28 = vmax.f32 %v1520_v25, 0.0 }
 0x1cf   :  { %v1577_v40 = vmax.f32 %v1148_v31, 0.0  ;;  %v1627_v41 = vmax.f32 %v1273_v32, 0.0 }
 0x1d0   :  { %v3072_v29 = vpack.c.bf16 %v1676_v27, %v1675_v26  ;;  %v3197_v30 = vpack.c.bf16 %v1726_v28, %v1725_v24 }
 0x1d2   :  { %3282 = vst [vmem:[%s4291_s3 + $0x228] sm:$0xff] %v3072_v29  }
 0x1d3   :  { %v1397_v33 = vpop.f32.mrf.mxu2  ;;  %3307 = vst [vmem:[%s4291_s3 + $0x2f0] sm:$0xff] %v3197_v30   ;;  %v1522_v34 = vpop.f32.mrf.mxu3 }
 0x1d4   :  { %v1149_v35 = vpop.f32.mrf.mxu0  ;;  %v1274_v36 = vpop.f32.mrf.mxu1  ;;  %v1523_v44 = vadd.f32 %v4002_v7, %v1522_v34  ;;  %v1398_v47 = vadd.f32 %v4002_v7, %v1397_v33 }
 0x1d5   :  { %v1150_v37 = vadd.f32 %v4002_v7, %v1149_v35  ;;  %v1275_v38 = vadd.f32 %v4002_v7, %v1274_v36 }
 0x1d6   :  { %v1727_v53 = vmax.f32 %v1523_v44, 0.0  ;;  %v1677_v55 = vmax.f32 %v1398_v47, 0.0 }
 0x1d7   :  { %v1578_v42 = vmax.f32 %v1150_v37, 0.0  ;;  %v1628_v43 = vmax.f32 %v1275_v38, 0.0 }
 0x1d9   :  { %v2827_v45 = vpack.c.bf16 %v1578_v42, %v1577_v40  ;;  %v2952_v46 = vpack.c.bf16 %v1628_v43, %v1627_v41 }
 0x1db   :  { %3233 = vst [vmem:[%s4291_s3 + $0xa0] sm:$0xff] %v2827_v45   ;;  %v1399_v48 = vpop.f32.mrf.mxu2  ;;  %v1524_v49 = vpop.f32.mrf.mxu3 }
 0x1dc   :  { %3258 = vst [vmem:[%s4291_s3 + $0x168] sm:$0xff] %v2952_v46   ;;  %v1400_v50 = vadd.f32 %v4002_v7, %v1399_v48  ;;  %v1152_v51 = vpop.f32.mrf.mxu0  ;;  %v1277_v52 = vpop.f32.mrf.mxu1  ;;  %v1525_v54 = vadd.f32 %v4002_v7, %v1524_v49 }
 0x1dd   :  { %v1153_v60 = vadd.f32 %v4002_v7, %v1152_v51  ;;  %v1278_v61 = vadd.f32 %v4002_v7, %v1277_v52 }
 0x1de   :  { %v1678_v56 = vmax.f32 %v1400_v50, 0.0  ;;  %v1728_v57 = vmax.f32 %v1525_v54, 0.0 }
 0x1df   :  { %v1579_v4 = vmax.f32 %v1153_v60, 0.0  ;;  %v1629_v5 = vmax.f32 %v1278_v61, 0.0 }
 0x1e0   :  { %v3077_v58 = vpack.c.bf16 %v1678_v56, %v1677_v55  ;;  %v3202_v59 = vpack.c.bf16 %v1728_v57, %v1727_v53 }
 0x1e2   :  { %3283 = vst [vmem:[%s4291_s3 + $0x230] sm:$0xff] %v3077_v58  }
 0x1e3   :  { %v1402_v62 = vpop.f32.mrf.mxu2  ;;  %3308 = vst [vmem:[%s4291_s3 + $0x2f8] sm:$0xff] %v3202_v59   ;;  %v1527_v63 = vpop.f32.mrf.mxu3 }
 0x1e4   :  { %v1154_v0 = vpop.f32.mrf.mxu0  ;;  %v1279_v1 = vpop.f32.mrf.mxu1  ;;  %v1528_v9 = vadd.f32 %v4002_v7, %v1527_v63  ;;  %v1403_v12 = vadd.f32 %v4002_v7, %v1402_v62 }
 0x1e5   :  { %v1155_v2 = vadd.f32 %v4002_v7, %v1154_v0  ;;  %v1280_v3 = vadd.f32 %v4002_v7, %v1279_v1 }
 0x1e6   :  { %v1729_v17 = vmax.f32 %v1528_v9, 0.0  ;;  %v1679_v19 = vmax.f32 %v1403_v12, 0.0 }
 0x1e7   :  { %v1580_v6 = vmax.f32 %v1155_v2, 0.0  ;;  %v1630_v8 = vmax.f32 %v1280_v3, 0.0 }
 0x1e9   :  { %v2832_v10 = vpack.c.bf16 %v1580_v6, %v1579_v4  ;;  %v2957_v11 = vpack.c.bf16 %v1630_v8, %v1629_v5 }
 0x1eb   :  { %3234 = vst [vmem:[%s4291_s3 + $0xa8] sm:$0xff] %v2832_v10   ;;  %v1404_v39 = vpop.f32.mrf.mxu2  ;;  %v1529_v13 = vpop.f32.mrf.mxu3 }
 0x1ec   :  { %3259 = vst [vmem:[%s4291_s3 + $0x170] sm:$0xff] %v2957_v11   ;;  %v1405_v14 = vadd.f32 %v4002_v7, %v1404_v39  ;;  %v1157_v15 = vpop.f32.mrf.mxu0  ;;  %v1282_v16 = vpop.f32.mrf.mxu1  ;;  %v1530_v18 = vadd.f32 %v4002_v7, %v1529_v13 }
 0x1ed   :  { %v1158_v24 = vadd.f32 %v4002_v7, %v1157_v15  ;;  %v1283_v25 = vadd.f32 %v4002_v7, %v1282_v16 }
 0x1ee   :  { %v1680_v20 = vmax.f32 %v1405_v14, 0.0  ;;  %v1730_v21 = vmax.f32 %v1530_v18, 0.0 }
 0x1ef   :  { %v1581_v32 = vmax.f32 %v1158_v24, 0.0  ;;  %v1631_v33 = vmax.f32 %v1283_v25, 0.0 }
 0x1f0   :  { %v3082_v22 = vpack.c.bf16 %v1680_v20, %v1679_v19  ;;  %v3207_v23 = vpack.c.bf16 %v1730_v21, %v1729_v17 }
 0x1f2   :  { %3284 = vst [vmem:[%s4291_s3 + $0x238] sm:$0xff] %v3082_v22  }
 0x1f3   :  { %v1407_v26 = vpop.f32.mrf.mxu2  ;;  %3309 = vst [vmem:[%s4291_s3 + $0x300] sm:$0xff] %v3207_v23   ;;  %v1532_v27 = vpop.f32.mrf.mxu3 }
 0x1f4   :  { %v1159_v28 = vpop.f32.mrf.mxu0  ;;  %v1284_v29 = vpop.f32.mrf.mxu1  ;;  %v1533_v36 = vadd.f32 %v4002_v7, %v1532_v27  ;;  %v1408_v40 = vadd.f32 %v4002_v7, %v1407_v26 }
 0x1f5   :  { %v1160_v30 = vadd.f32 %v4002_v7, %v1159_v28  ;;  %v1285_v31 = vadd.f32 %v4002_v7, %v1284_v29 }
 0x1f6   :  { %v1731_v46 = vmax.f32 %v1533_v36, 0.0  ;;  %v1681_v48 = vmax.f32 %v1408_v40, 0.0 }
 0x1f7   :  { %v1582_v34 = vmax.f32 %v1160_v30, 0.0  ;;  %v1632_v35 = vmax.f32 %v1285_v31, 0.0 }
 0x1f9   :  { %v2837_v37 = vpack.c.bf16 %v1582_v34, %v1581_v32  ;;  %v2962_v38 = vpack.c.bf16 %v1632_v35, %v1631_v33 }
 0x1fb   :  { %3235 = vst [vmem:[%s4291_s3 + $0xb0] sm:$0xff] %v2837_v37   ;;  %v1409_v41 = vpop.f32.mrf.mxu2  ;;  %v1534_v42 = vpop.f32.mrf.mxu3 }
 0x1fc   :  { %3260 = vst [vmem:[%s4291_s3 + $0x178] sm:$0xff] %v2962_v38   ;;  %v1410_v43 = vadd.f32 %v4002_v7, %v1409_v41  ;;  %v1162_v44 = vpop.f32.mrf.mxu0  ;;  %v1287_v45 = vpop.f32.mrf.mxu1  ;;  %v1535_v47 = vadd.f32 %v4002_v7, %v1534_v42 }
 0x1fd   :  { %v1163_v53 = vadd.f32 %v4002_v7, %v1162_v44  ;;  %v1288_v54 = vadd.f32 %v4002_v7, %v1287_v45 }
 0x1fe   :  { %v1682_v49 = vmax.f32 %v1410_v43, 0.0  ;;  %v1732_v50 = vmax.f32 %v1535_v47, 0.0 }
 0x1ff   :  { %v1583_v60 = vmax.f32 %v1163_v53, 0.0  ;;  %v1633_v61 = vmax.f32 %v1288_v54, 0.0 }
 0x200   :  { %v3087_v51 = vpack.c.bf16 %v1682_v49, %v1681_v48  ;;  %v3212_v52 = vpack.c.bf16 %v1732_v50, %v1731_v46 }
 0x202   :  { %3285 = vst [vmem:[%s4291_s3 + $0x240] sm:$0xff] %v3087_v51  }
 0x203   :  { %v1412_v55 = vpop.f32.mrf.mxu2  ;;  %3310 = vst [vmem:[%s4291_s3 + $0x308] sm:$0xff] %v3212_v52  }
 0x204   :  { %v1164_v56 = vpop.f32.mrf.mxu0  ;;  %v1289_v57 = vpop.f32.mrf.mxu1  ;;  %v1413_v2 = vadd.f32 %v4002_v7, %v1412_v55 }
 0x205   :  { %v1165_v58 = vadd.f32 %v4002_v7, %v1164_v56  ;;  %v1290_v59 = vadd.f32 %v4002_v7, %v1289_v57 }
 0x206   :  { %v1683_v8 = vmax.f32 %v1413_v2, 0.0 }
 0x207   :  { %v1584_v62 = vmax.f32 %v1165_v58, 0.0  ;;  %v1634_v63 = vmax.f32 %v1290_v59, 0.0 }
 0x209   :  { %v2842_v0 = vpack.c.bf16 %v1584_v62, %v1583_v60  ;;  %v2967_v1 = vpack.c.bf16 %v1634_v63, %v1633_v61 }
 0x20b   :  { %3236 = vst [vmem:[%s4291_s3 + $0xb8] sm:$0xff] %v2842_v0   ;;  %v1414_v3 = vpop.f32.mrf.mxu2 }
 0x20c   :  { %3261 = vst [vmem:[%s4291_s3 + $0x180] sm:$0xff] %v2967_v1   ;;  %v1415_v4 = vadd.f32 %v4002_v7, %v1414_v3  ;;  %v1167_v5 = vpop.f32.mrf.mxu0  ;;  %v1292_v6 = vpop.f32.mrf.mxu1 }
 0x20d   :  { %v1168_v11 = vadd.f32 %v4002_v7, %v1167_v5  ;;  %v1293_v12 = vadd.f32 %v4002_v7, %v1292_v6 }
 0x20e   :  { %v1684_v9 = vmax.f32 %v1415_v4, 0.0 }
 0x20f   :  { %v1585_v17 = vmax.f32 %v1168_v11, 0.0  ;;  %v1635_v18 = vmax.f32 %v1293_v12, 0.0 }
 0x210   :  { %v3092_v10 = vpack.c.bf16 %v1684_v9, %v1683_v8 }
 0x212   :  { %3286 = vst [vmem:[%s4291_s3 + $0x248] sm:$0xff] %v3092_v10  }
 0x213   :  { %v1417_v39 = vpop.f32.mrf.mxu2 }
 0x214   :  { %v1169_v13 = vpop.f32.mrf.mxu0  ;;  %v1294_v14 = vpop.f32.mrf.mxu1  ;;  %v1418_v23 = vadd.f32 %v4002_v7, %v1417_v39 }
 0x215   :  { %v1170_v15 = vadd.f32 %v4002_v7, %v1169_v13  ;;  %v1295_v16 = vadd.f32 %v4002_v7, %v1294_v14 }
 0x216   :  { %v1685_v26 = vmax.f32 %v1418_v23, 0.0 }
 0x217   :  { %v1586_v19 = vmax.f32 %v1170_v15, 0.0  ;;  %v1636_v20 = vmax.f32 %v1295_v16, 0.0 }
 0x219   :  { %v2847_v21 = vpack.c.bf16 %v1586_v19, %v1585_v17  ;;  %v2972_v22 = vpack.c.bf16 %v1636_v20, %v1635_v18 }
 0x21b   :  { %3237 = vst [vmem:[%s4291_s3 + $0xc0] sm:$0xff] %v2847_v21   ;;  %v1419_v24 = vpop.f32.mrf.mxu2 }
 0x21c   :  { %3262 = vst [vmem:[%s4291_s3 + $0x188] sm:$0xff] %v2972_v22   ;;  %v1420_v25 = vadd.f32 %v4002_v7, %v1419_v24 }
 0x21e   :  { %v1686_v27 = vmax.f32 %v1420_v25, 0.0 }
 0x220   :  { %v3097_v28 = vpack.c.bf16 %v1686_v27, %v1685_v26 }
 0x222   :  { %3287 = vst [vmem:[%s4291_s3 + $0x250] sm:$0xff] %v3097_v28  }
 0x223   :  { %2129 = vsyncpa [#allocation3], 1 }
 0x224   :  { %2130 = vsyncpa [#allocation5], 1 }

// kernel: autoencoder_forward.7
= control target key start
LH: loop header
LB: loop body
LE: loop exit
PB: predicated region body
PF: predicated region fallthrough
CT: control target
= control target key end

     0   :  { %s729_s1 = inlined_call_operand.vmem [shape: bf16[256,128], index: 1, kind: input, shape index: {}]   ;;  %s730_s2 = inlined_call_operand.vmem [shape: f32[1,128], index: 2, kind: input, shape index: {}]   ;;  %s731_s0 = inlined_call_operand.vmem [shape: bf16[104,256], index: 0, kind: input, shape index: {}]   ;;  %s732_s3 = inlined_call_operand.vmem [shape: bf16[104,128], index: 3, kind: output, shape index: {}]  }
   0x1   :  { %v486_v0 = vld [vmem:[%s729_s1 + $0x38] sm:$0xff]  ;;  %v485_v2 = vld [vmem:[%s729_s1 + $0x30] sm:$0xff]  ;;  %v484_v4 = vld [vmem:[%s729_s1 + $0x28] sm:$0xff] }
   0x2   :  { %v494_v1 = vld [vmem:[%s729_s1 + $0x78] sm:$0xff]  ;;  %226 = vmatpush.bf16.msra.mxu0 %v486_v0  ;;  %530 = vmatpush.bf16.msra.mxu2 %v486_v0  ;;  %v493_v3 = vld [vmem:[%s729_s1 + $0x70] sm:$0xff]  ;;  %v492_v5 = vld [vmem:[%s729_s1 + $0x68] sm:$0xff] }
   0x3   :  { %269 = vmatpush.bf16.msra.mxu1 %v494_v1  ;;  %538 = vmatpush.bf16.msra.mxu3 %v494_v1  ;;  %v483_v6 = vld [vmem:[%s729_s1 + $0x20] sm:$0xff]  ;;  %v482_v8 = vld [vmem:[%s729_s1 + $0x18] sm:$0xff]  ;;  %v481_v10 = vld [vmem:[%s729_s1 + $0x10] sm:$0xff] }
   0x4   :  { %v491_v7 = vld [vmem:[%s729_s1 + $0x60] sm:$0xff]  ;;  %v490_v9 = vld [vmem:[%s729_s1 + $0x58] sm:$0xff]  ;;  %v489_v11 = vld [vmem:[%s729_s1 + $0x50] sm:$0xff] }
   0x5   :  { %v480_v12 = vld [vmem:[%s729_s1 + $0x8] sm:$0xff]  ;;  %v479_v14 = vld [vmem:[%s729_s1] sm:$0xff]  ;;  %v381_v18 = vld [vmem:[%s731_s0 + $0x30] sm:$0xf] }
   0x6   :  { %227 = vmatpush.bf16.msra.mxu0 %v485_v2  ;;  %531 = vmatpush.bf16.msra.mxu2 %v485_v2  ;;  %v488_v13 = vld [vmem:[%s729_s1 + $0x48] sm:$0xff]  ;;  %v487_v15 = vld [vmem:[%s729_s1 + $0x40] sm:$0xff]  ;;  %v474_v19 = vld [vmem:[%s731_s0 + $0x34] sm:$0xf0] }
   0x7   :  { %270 = vmatpush.bf16.msra.mxu1 %v493_v3  ;;  %539 = vmatpush.bf16.msra.mxu3 %v493_v3  ;;  %v357_v16 = vld [vmem:[%s731_s0] sm:$0xf]  ;;  %v468_v17 = vld [vmem:[%s731_s0 + $0x4] sm:$0xf0]  ;;  %v467_v20 = vld [vmem:[%s731_s0 + $0x4] sm:$0xf]  ;;  %v382_v25 = vor.u32 %v474_v19, %v381_v18 }
   0x8   :  { %v359_v21 = vld [vmem:[%s731_s0 + $0x8] sm:$0xf0]  ;;  %v475_v22 = vld [vmem:[%s731_s0 + $0x44] sm:$0xf]  ;;  %v358_v24 = vor.u32 %v468_v17, %v357_v16  ;;  %v365_v28 = vld [vmem:[%s731_s0 + $0x10] sm:$0xf] }
   0x9   :  { %v391_v23 = vld [vmem:[%s731_s0 + $0x48] sm:$0xf0]  ;;  %v362_v26 = vor.u32 %v467_v20, %v359_v21  ;;  %v470_v29 = vld [vmem:[%s731_s0 + $0x14] sm:$0xf0]  ;;  %v389_v30 = vld [vmem:[%s731_s0 + $0x40] sm:$0xf] }
   0xa   :  { %228 = vmatpush.bf16.msra.mxu0 %v484_v4  ;;  %532 = vmatpush.bf16.msra.mxu2 %v484_v4  ;;  %v394_v27 = vor.u32 %v475_v22, %v391_v23  ;;  %v476_v31 = vld [vmem:[%s731_s0 + $0x44] sm:$0xf0]  ;;  %v469_v32 = vld [vmem:[%s731_s0 + $0x14] sm:$0xf]  ;;  %v367_v33 = vld [vmem:[%s731_s0 + $0x18] sm:$0xf0]  ;;  %v366_v36 = vor.u32 %v470_v29, %v365_v28 }
   0xb   :  { %271 = vmatpush.bf16.msra.mxu1 %v492_v5  ;;  %540 = vmatpush.bf16.msra.mxu3 %v492_v5  ;;  %v477_v34 = vld [vmem:[%s731_s0 + $0x54] sm:$0xf]  ;;  %v399_v35 = vld [vmem:[%s731_s0 + $0x58] sm:$0xf0]  ;;  %v390_v37 = vor.u32 %v476_v31, %v389_v30  ;;  %v370_v38 = vor.u32 %v469_v32, %v367_v33  ;;  %v26_v40 = vld [vmem:[%s731_s0 + $0x60] sm:$0xff] }
   0xc   :  { %v402_v39 = vor.u32 %v477_v34, %v399_v35  ;;  %v373_v41 = vld [vmem:[%s731_s0 + $0x20] sm:$0xf]  ;;  %v472_v42 = vld [vmem:[%s731_s0 + $0x24] sm:$0xf0]  ;;  %v397_v43 = vld [vmem:[%s731_s0 + $0x50] sm:$0xf]  ;;  %v101_v45 = vunpack.c.h.b16 %v26_v40  ;;  %v100_v52 = vunpack.c.l.b16 %v26_v40 }
   0xd   :  { %v478_v44 = vld [vmem:[%s731_s0 + $0x54] sm:$0xf0]  ;;  %v471_v46 = vld [vmem:[%s731_s0 + $0x24] sm:$0xf]  ;;  %v375_v47 = vld [vmem:[%s731_s0 + $0x28] sm:$0xf0]  ;;  %v374_v48 = vor.u32 %v472_v42, %v373_v41 }
   0xe   :  { %229 = vmatpush.bf16.msra.mxu0 %v483_v6  ;;  %533 = vmatpush.bf16.msra.mxu2 %v483_v6  ;;  %v398_v49 = vor.u32 %v478_v44, %v397_v43  ;;  %v378_v50 = vor.u32 %v471_v46, %v375_v47  ;;  %v115_v51 = vpack.c.b16 %v101_v45, %v101_v45  ;;  %v473_v53 = vld [vmem:[%s731_s0 + $0x34] sm:$0xf]  ;;  %v383_v54 = vld [vmem:[%s731_s0 + $0x38] sm:$0xf0]  ;;  %v693_v58 = vld [vmem:[%s730_s2] ss:$0 sm:$0xff] }
   0xf   :  { %272 = vmatpush.bf16.msra.mxu1 %v491_v7  ;;  %541 = vmatpush.bf16.msra.mxu3 %v491_v7  ;;  %v114_v55 = vpack.c.b16 %v100_v52, %v100_v52  ;;  %v386_v56 = vor.u32 %v473_v53, %v383_v54 }
  0x12   :  { %230 = vmatpush.bf16.msra.mxu0 %v482_v8  ;;  %534 = vmatpush.bf16.msra.mxu2 %v482_v8 }
  0x13   :  { %273 = vmatpush.bf16.msra.mxu1 %v490_v9  ;;  %542 = vmatpush.bf16.msra.mxu3 %v490_v9 }
  0x16   :  { %231 = vmatpush.bf16.msra.mxu0 %v481_v10  ;;  %535 = vmatpush.bf16.msra.mxu2 %v481_v10 }
  0x17   :  { %274 = vmatpush.bf16.msra.mxu1 %v489_v11  ;;  %543 = vmatpush.bf16.msra.mxu3 %v489_v11 }
  0x1a   :  { %232 = vmatpush.bf16.msra.mxu0 %v480_v12  ;;  %536 = vmatpush.bf16.msra.mxu2 %v480_v12 }
  0x1b   :  { %275 = vmatpush.bf16.msra.mxu1 %v488_v13  ;;  %544 = vmatpush.bf16.msra.mxu3 %v488_v13 }
  0x1e   :  { %233 = vmatpush.bf16.msra.mxu0 %v479_v14  ;;  %537 = vmatpush.bf16.msra.mxu2 %v479_v14 }
  0x1f   :  { %276 = vmatpush.bf16.msra.mxu1 %v487_v15  ;;  %545 = vmatpush.bf16.msra.mxu3 %v487_v15 }
  0x21   :  { %234 = vmatmul.bf16.vlgmr.msra.gmra.mxu0 %v358_v24  ;;  %249 = vmatmul.bf16.vlgmr.msra.gmra.mxu2 %v382_v25 }
  0x22   :  { %277 = vmatmul.bf16.vlgmr.msra.gmra.mxu1 %v362_v26  ;;  %297 = vmatmul.bf16.vlgmr.msra.gmra.mxu3 %v394_v27 }
  0x31   :  { %239 = vmatmul.bf16.gmra.mxu0 %v366_v36  ;;  %254 = vmatmul.bf16.gmra.mxu2 %v390_v37 }
  0x32   :  { %282 = vmatmul.bf16.gmra.mxu1 %v370_v38  ;;  %302 = vmatmul.bf16.gmra.mxu3 %v402_v39 }
  0x41   :  { %244 = vmatmul.bf16.gmra.mxu0 %v374_v48  ;;  %259 = vmatmul.bf16.gmra.mxu2 %v398_v49 }
  0x42   :  { %287 = vmatmul.bf16.gmra.mxu1 %v378_v50  ;;  %307 = vmatmul.bf16.gmra.mxu3 %v115_v51 }
  0x51   :  { %264 = vmatmul.bf16.gmra.mxu2 %v114_v55 }
  0x52   :  { %292 = vmatmul.bf16.gmra.mxu1 %v386_v56 }
  0x9e   :  { %v235_v57 = vpop.f32.mrf.mxu0 }
  0x9f   :  { %v278_v59 = vpop.f32.mrf.mxu1  ;;  %v236_v60 = vadd.f32 %v693_v58, %v235_v57 }
  0xa1   :  { %v279_v0 = vadd.f32 %v278_v59, %v236_v60 }
  0xa3   :  { %v312_v4 = vmax.f32 %v279_v0, 0.0 }
  0xa4   :  { %v250_v61 = vpop.f32.mrf.mxu2 }
  0xa5   :  { %v298_v62 = vpop.f32.mrf.mxu3  ;;  %v251_v54 = vadd.f32 %v693_v58, %v250_v61 }
  0xa6   :  { %v237_v63 = vpop.f32.mrf.mxu0 }
  0xa7   :  { %v238_v1 = vadd.f32 %v693_v58, %v237_v63  ;;  %v280_v2 = vpop.f32.mrf.mxu1 }
  0xa9   :  { %v281_v3 = vadd.f32 %v280_v2, %v238_v1 }
  0xab   :  { %v313_v5 = vmax.f32 %v281_v3, 0.0 }
  0xac   :  { %v252_v6 = vpop.f32.mrf.mxu2 }
  0xad   :  { %v498_v7 = vpack.c.bf16 %v313_v5, %v312_v4  ;;  %v300_v8 = vpop.f32.mrf.mxu3  ;;  %v253_v57 = vadd.f32 %v693_v58, %v252_v6 }
  0xae   :  { %v240_v9 = vpop.f32.mrf.mxu0 }
  0xaf   :  { %499 = vst [vmem:[%s732_s3] sm:$0xff] %v498_v7   ;;  %v283_v10 = vpop.f32.mrf.mxu1  ;;  %v241_v11 = vadd.f32 %v693_v58, %v240_v9 }
  0xb1   :  { %v284_v15 = vadd.f32 %v283_v10, %v241_v11 }
  0xb3   :  { %v314_v20 = vmax.f32 %v284_v15, 0.0 }
  0xb4   :  { %v255_v12 = vpop.f32.mrf.mxu2 }
  0xb5   :  { %v303_v13 = vpop.f32.mrf.mxu3  ;;  %v256_v18 = vadd.f32 %v693_v58, %v255_v12 }
  0xb6   :  { %v242_v14 = vpop.f32.mrf.mxu0 }
  0xb7   :  { %v243_v16 = vadd.f32 %v693_v58, %v242_v14  ;;  %v285_v17 = vpop.f32.mrf.mxu1  ;;  %v299_v23 = vadd.f32 %v298_v62, %v256_v18 }
  0xb9   :  { %v286_v19 = vadd.f32 %v285_v17, %v243_v16  ;;  %v320_v30 = vmax.f32 %v299_v23, 0.0 }
  0xbb   :  { %v315_v21 = vmax.f32 %v286_v19, 0.0 }
  0xbc   :  { %v257_v22 = vpop.f32.mrf.mxu2 }
  0xbd   :  { %v503_v24 = vpack.c.bf16 %v315_v21, %v314_v20  ;;  %v258_v25 = vadd.f32 %v693_v58, %v257_v22  ;;  %v305_v26 = vpop.f32.mrf.mxu3 }
  0xbe   :  { %v245_v27 = vpop.f32.mrf.mxu0 }
  0xbf   :  { %525 = vst [vmem:[%s732_s3 + $0x8] sm:$0xff] %v503_v24   ;;  %v301_v28 = vadd.f32 %v300_v8, %v258_v25  ;;  %v288_v29 = vpop.f32.mrf.mxu1  ;;  %v246_v33 = vadd.f32 %v693_v58, %v245_v27 }
  0xc1   :  { %v321_v31 = vmax.f32 %v301_v28, 0.0  ;;  %v289_v37 = vadd.f32 %v288_v29, %v246_v33 }
  0xc3   :  { %v518_v32 = vpack.c.bf16 %v321_v31, %v320_v30  ;;  %v316_v42 = vmax.f32 %v289_v37, 0.0 }
  0xc4   :  { %v260_v34 = vpop.f32.mrf.mxu2 }
  0xc5   :  { %528 = vst [vmem:[%s732_s3 + $0x20] sm:$0xff] %v518_v32   ;;  %v308_v35 = vpop.f32.mrf.mxu3  ;;  %v261_v40 = vadd.f32 %v693_v58, %v260_v34 }
  0xc6   :  { %v247_v36 = vpop.f32.mrf.mxu0 }
  0xc7   :  { %v248_v38 = vadd.f32 %v693_v58, %v247_v36  ;;  %v290_v39 = vpop.f32.mrf.mxu1  ;;  %v304_v45 = vadd.f32 %v303_v13, %v261_v40 }
  0xc9   :  { %v291_v41 = vadd.f32 %v290_v39, %v248_v38  ;;  %v322_v51 = vmax.f32 %v304_v45, 0.0 }
  0xcb   :  { %v317_v43 = vmax.f32 %v291_v41, 0.0 }
  0xcc   :  { %v262_v44 = vpop.f32.mrf.mxu2 }
  0xcd   :  { %v508_v46 = vpack.c.bf16 %v317_v43, %v316_v42  ;;  %v263_v47 = vadd.f32 %v693_v58, %v262_v44  ;;  %v310_v48 = vpop.f32.mrf.mxu3 }
  0xcf   :  { %526 = vst [vmem:[%s732_s3 + $0x10] sm:$0xff] %v508_v46   ;;  %v306_v49 = vadd.f32 %v305_v26, %v263_v47  ;;  %v293_v50 = vpop.f32.mrf.mxu1 }
  0xd0   :  { %v294_v59 = vadd.f32 %v293_v50, %v251_v54 }
  0xd1   :  { %v323_v52 = vmax.f32 %v306_v49, 0.0 }
  0xd2   :  { %v318_v1 = vmax.f32 %v294_v59, 0.0 }
  0xd3   :  { %v523_v53 = vpack.c.bf16 %v323_v52, %v322_v51 }
  0xd4   :  { %v265_v55 = vpop.f32.mrf.mxu2 }
  0xd5   :  { %529 = vst [vmem:[%s732_s3 + $0x28] sm:$0xff] %v523_v53   ;;  %v266_v56 = vadd.f32 %v693_v58, %v265_v55 }
  0xd7   :  { %v309_v60 = vadd.f32 %v308_v35, %v266_v56  ;;  %v295_v62 = vpop.f32.mrf.mxu1 }
  0xd8   :  { %v296_v63 = vadd.f32 %v295_v62, %v253_v57 }
  0xd9   :  { %v324_v0 = vmax.f32 %v309_v60, 0.0 }
  0xda   :  { %v319_v2 = vmax.f32 %v296_v63, 0.0 }
  0xdb   :  { %v337_v3 = vpack.c.bf16 %v324_v0, %v324_v0 }
  0xdc   :  { %v513_v4 = vpack.c.bf16 %v319_v2, %v318_v1  ;;  %v267_v5 = vpop.f32.mrf.mxu2 }
  0xdd   :  { %350 = vst [vmem:[%s732_s3 + $0x30] sm:$0xf] %v337_v3 }
  0xde   :  { %527 = vst [vmem:[%s732_s3 + $0x18] sm:$0xff] %v513_v4  }

// kernel: autoencoder_forward.8
= control target key start
LH: loop header
LB: loop body
LE: loop exit
PB: predicated region body
PF: predicated region fallthrough
CT: control target
= control target key end

     0   :  { %vm378_vm0 = vcmask 261120   ;;  %s1464_s1 = inlined_call_operand.vmem [shape: bf16[32,3200], index: 1, kind: input, shape index: {}]   ;;  %s1465_s0 = inlined_call_operand.vmem [shape: bf16[8,32], index: 0, kind: input, shape index: {}]   ;;  %s1466_s2 = inlined_call_operand.vmem [shape: f32[1,3200], index: 2, kind: input, shape index: {}]   ;;  %s1467_s3 = inlined_call_operand.vmem [shape: bf16[8,3200], index: 3, kind: output, shape index: {}]  }
   0x1   :  { %v864_v0 = vld [vmem:[%s1464_s1 + $0xc8] sm:$0xf]  ;;  %v1024_v1 = vld [vmem:[%s1464_s1 + $0x128] sm:$0xf0]  ;;  %v866_v4 = vld [vmem:[%s1464_s1 + $0x12c] sm:$0xf0] }
   0x2   :  { %v1012_v2 = vld [vmem:[%s1464_s1 + $0xcc] sm:$0xf]  ;;  %v865_v3 = vor.u32 %v1024_v1, %v864_v0  ;;  %v872_v5 = vld [vmem:[%s1464_s1 + $0xd0] sm:$0xf]  ;;  %v1025_v6 = vld [vmem:[%s1464_s1 + $0x130] sm:$0xf0] }
   0x3   :  { %v869_v7 = vor.u32 %v1012_v2, %v866_v4  ;;  %v873_v8 = vor.u32 %v1025_v6, %v872_v5  ;;  %v1013_v9 = vld [vmem:[%s1464_s1 + $0xd4] sm:$0xf]  ;;  %v874_v10 = vld [vmem:[%s1464_s1 + $0x134] sm:$0xf0]  ;;  %v764_v11 = vld [vmem:[%s1464_s1] sm:$0xf] }
   0x4   :  { %388 = vmatpush.bf16.msra.mxu0 %v865_v3  ;;  %v877_v12 = vor.u32 %v1013_v9, %v874_v10  ;;  %v999_v13 = vld [vmem:[%s1464_s1 + $0x60] sm:$0xf0]  ;;  %v766_v15 = vld [vmem:[%s1464_s1 + $0x64] sm:$0xf0]  ;;  %v1000_v19 = vld [vmem:[%s1464_s1 + $0x68] sm:$0xf0] }
   0x5   :  { %v987_v14 = vld [vmem:[%s1464_s1 + $0x4] sm:$0xf]  ;;  %401 = vmatpush.bf16.msra.mxu1 %v869_v7  ;;  %414 = vmatpush.bf16.msra.mxu2 %v873_v8  ;;  %v765_v16 = vor.u32 %v999_v13, %v764_v11  ;;  %v772_v18 = vld [vmem:[%s1464_s1 + $0x8] sm:$0xf]  ;;  %v988_v20 = vld [vmem:[%s1464_s1 + $0xc] sm:$0xf] }
   0x6   :  { %v769_v17 = vor.u32 %v987_v14, %v766_v15  ;;  %427 = vmatpush.bf16.msra.mxu3 %v877_v12  ;;  %v773_v21 = vor.u32 %v1000_v19, %v772_v18  ;;  %v774_v22 = vld [vmem:[%s1464_s1 + $0x6c] sm:$0xf0]  ;;  %v1109_v23 = vld [vmem:[%s1465_s0] sm:$0xf]  ;;  %v880_v24 = vld [vmem:[%s1464_s1 + $0xd8] sm:$0xf] }
   0x7   :  { %v777_v25 = vor.u32 %v988_v20, %v774_v22  ;;  %v1026_v26 = vld [vmem:[%s1464_s1 + $0x138] sm:$0xf0]  ;;  %v780_v27 = vld [vmem:[%s1464_s1 + $0x10] sm:$0xf]  ;;  %v1001_v28 = vld [vmem:[%s1464_s1 + $0x70] sm:$0xf0] }
   0x8   :  { %389 = vmatpush.bf16.msra.mxu0 %v765_v16  ;;  %v881_v29 = vor.u32 %v1026_v26, %v880_v24  ;;  %v1014_v30 = vld [vmem:[%s1464_s1 + $0xdc] sm:$0xf]  ;;  %v882_v31 = vld [vmem:[%s1464_s1 + $0x13c] sm:$0xf0]  ;;  %v1027_v34 = vld [vmem:[%s1464_s1 + $0x140] sm:$0xf0]  ;;  %v781_v37 = vor.u32 %v1001_v28, %v780_v27 }
   0x9   :  { %v888_v32 = vld [vmem:[%s1464_s1 + $0xe0] sm:$0xf]  ;;  %402 = vmatpush.bf16.msra.mxu1 %v769_v17  ;;  %415 = vmatpush.bf16.msra.mxu2 %v773_v21  ;;  %v885_v33 = vor.u32 %v1014_v30, %v882_v31  ;;  %v1015_v35 = vld [vmem:[%s1464_s1 + $0xe4] sm:$0xf]  ;;  %v890_v36 = vld [vmem:[%s1464_s1 + $0x144] sm:$0xf0] }
   0xa   :  { %428 = vmatpush.bf16.msra.mxu3 %v777_v25  ;;  %v889_v38 = vor.u32 %v1027_v34, %v888_v32  ;;  %v893_v39 = vor.u32 %v1015_v35, %v890_v36  ;;  %v989_v40 = vld [vmem:[%s1464_s1 + $0x14] sm:$0xf]  ;;  %v782_v41 = vld [vmem:[%s1464_s1 + $0x74] sm:$0xf0]  ;;  %v1002_v44 = vld [vmem:[%s1464_s1 + $0x78] sm:$0xf0] }
   0xb   :  { %v788_v42 = vld [vmem:[%s1464_s1 + $0x18] sm:$0xf]  ;;  %962 = vmatmul.msk.bf16.vlgmr.msra.gmra.mxu0 %vm378_vm0, %v1109_v23  ;;  %v785_v43 = vor.u32 %v989_v40, %v782_v41  ;;  %v990_v45 = vld [vmem:[%s1464_s1 + $0x1c] sm:$0xf]  ;;  %v790_v46 = vld [vmem:[%s1464_s1 + $0x7c] sm:$0xf0] }
   0xc   :  { %440 = vmatpush.bf16.msrb.mxu0 %v881_v29  ;;  %963 = vmatmul.msk.bf16.vlgmr.msra.gmra.mxu1 %vm378_vm0, %v1109_v23  ;;  %v896_v47 = vld [vmem:[%s1464_s1 + $0xe8] sm:$0xf]  ;;  %v1028_v48 = vld [vmem:[%s1464_s1 + $0x148] sm:$0xf0]  ;;  %v796_v49 = vld [vmem:[%s1464_s1 + $0x20] sm:$0xf]  ;;  %v789_v50 = vor.u32 %v1002_v44, %v788_v42  ;;  %v793_v55 = vor.u32 %v990_v45, %v790_v46 }
   0xd   :  { %453 = vmatpush.bf16.msrb.mxu1 %v885_v33  ;;  %964 = vmatmul.msk.bf16.vlgmr.msra.gmra.mxu2 %vm378_vm0, %v1109_v23  ;;  %v897_v51 = vor.u32 %v1028_v48, %v896_v47  ;;  %v1003_v52 = vld [vmem:[%s1464_s1 + $0x80] sm:$0xf0]  ;;  %v1016_v53 = vld [vmem:[%s1464_s1 + $0xec] sm:$0xf]  ;;  %v898_v54 = vld [vmem:[%s1464_s1 + $0x14c] sm:$0xf0] }
   0xe   :  { %965 = vmatmul.msk.bf16.vlgmr.msra.gmra.mxu3 %vm378_vm0, %v1109_v23  ;;  %466 = vmatpush.bf16.msrb.mxu2 %v889_v38  ;;  %v901_v56 = vor.u32 %v1016_v53, %v898_v54  ;;  %v904_v57 = vld [vmem:[%s1464_s1 + $0xf0] sm:$0xf]  ;;  %v1029_v58 = vld [vmem:[%s1464_s1 + $0x150] sm:$0xf0]  ;;  %v797_v60 = vor.u32 %v1003_v52, %v796_v49  ;;  %v906_v62 = vld [vmem:[%s1464_s1 + $0x154] sm:$0xf0] }
   0xf   :  { %479 = vmatpush.bf16.msrb.mxu3 %v893_v39  ;;  %v1017_v59 = vld [vmem:[%s1464_s1 + $0xf4] sm:$0xf]  ;;  %v905_v61 = vor.u32 %v1029_v58, %v904_v57  ;;  %v991_v63 = vld [vmem:[%s1464_s1 + $0x24] sm:$0xf]  ;;  %v798_v0 = vld [vmem:[%s1464_s1 + $0x84] sm:$0xf0] }
  0x10   :  { %441 = vmatpush.bf16.msrb.mxu0 %v781_v37  ;;  %v909_v1 = vor.u32 %v1017_v59, %v906_v62  ;;  %v801_v2 = vor.u32 %v991_v63, %v798_v0  ;;  %v804_v3 = vld [vmem:[%s1464_s1 + $0x28] sm:$0xf]  ;;  %v1004_v4 = vld [vmem:[%s1464_s1 + $0x88] sm:$0xf0]  ;;  %v806_v6 = vld [vmem:[%s1464_s1 + $0x8c] sm:$0xf0] }
  0x11   :  { %454 = vmatpush.bf16.msrb.mxu1 %v785_v43  ;;  %v992_v5 = vld [vmem:[%s1464_s1 + $0x2c] sm:$0xf]  ;;  %v805_v7 = vor.u32 %v1004_v4, %v804_v3  ;;  %v912_v9 = vld [vmem:[%s1464_s1 + $0xf8] sm:$0xf]  ;;  %v1030_v10 = vld [vmem:[%s1464_s1 + $0x158] sm:$0xf0] }
  0x12   :  { %467 = vmatpush.bf16.msrb.mxu2 %v789_v50  ;;  %v809_v8 = vor.u32 %v992_v5, %v806_v6  ;;  %v1018_v11 = vld [vmem:[%s1464_s1 + $0xfc] sm:$0xf]  ;;  %v914_v12 = vld [vmem:[%s1464_s1 + $0x15c] sm:$0xf0]  ;;  %v1031_v14 = vld [vmem:[%s1464_s1 + $0x160] sm:$0xf0]  ;;  %v913_v17 = vor.u32 %v1030_v10, %v912_v9 }
  0x13   :  { %480 = vmatpush.bf16.msrb.mxu3 %v793_v55  ;;  %v920_v13 = vld [vmem:[%s1464_s1 + $0x100] sm:$0xf]  ;;  %v1019_v15 = vld [vmem:[%s1464_s1 + $0x104] sm:$0xf]  ;;  %v922_v16 = vld [vmem:[%s1464_s1 + $0x164] sm:$0xf0]  ;;  %v917_v20 = vor.u32 %v1018_v11, %v914_v12 }
  0x14   :  { %492 = vmatpush.bf16.msra.mxu0 %v897_v51  ;;  %v812_v18 = vld [vmem:[%s1464_s1 + $0x30] sm:$0xf]  ;;  %v1005_v19 = vld [vmem:[%s1464_s1 + $0x90] sm:$0xf0]  ;;  %v921_v21 = vor.u32 %v1031_v14, %v920_v13  ;;  %v925_v24 = vor.u32 %v1019_v15, %v922_v16  ;;  %v814_v25 = vld [vmem:[%s1464_s1 + $0x94] sm:$0xf0] }
  0x15   :  { %505 = vmatpush.bf16.msra.mxu1 %v901_v56  ;;  %v993_v22 = vld [vmem:[%s1464_s1 + $0x34] sm:$0xf]  ;;  %v820_v26 = vld [vmem:[%s1464_s1 + $0x38] sm:$0xf]  ;;  %v1006_v27 = vld [vmem:[%s1464_s1 + $0x98] sm:$0xf0]  ;;  %v813_v30 = vor.u32 %v1005_v19, %v812_v18 }
  0x16   :  { %518 = vmatpush.bf16.msra.mxu2 %v905_v61  ;;  %v994_v28 = vld [vmem:[%s1464_s1 + $0x3c] sm:$0xf]  ;;  %v822_v29 = vld [vmem:[%s1464_s1 + $0x9c] sm:$0xf0]  ;;  %v817_v31 = vor.u32 %v993_v22, %v814_v25  ;;  %v821_v32 = vor.u32 %v1006_v27, %v820_v26  ;;  %v928_v34 = vld [vmem:[%s1464_s1 + $0x108] sm:$0xf] }
  0x17   :  { %531 = vmatpush.bf16.msra.mxu3 %v909_v1  ;;  %v825_v33 = vor.u32 %v994_v28, %v822_v29  ;;  %v1032_v35 = vld [vmem:[%s1464_s1 + $0x168] sm:$0xf0]  ;;  %v930_v37 = vld [vmem:[%s1464_s1 + $0x16c] sm:$0xf0]  ;;  %v1033_v39 = vld [vmem:[%s1464_s1 + $0x170] sm:$0xf0] }
  0x18   :  { %493 = vmatpush.bf16.msra.mxu0 %v797_v60  ;;  %v1020_v36 = vld [vmem:[%s1464_s1 + $0x10c] sm:$0xf]  ;;  %v936_v38 = vld [vmem:[%s1464_s1 + $0x110] sm:$0xf]  ;;  %v1021_v40 = vld [vmem:[%s1464_s1 + $0x114] sm:$0xf]  ;;  %v929_v42 = vor.u32 %v1032_v35, %v928_v34 }
  0x19   :  { %506 = vmatpush.bf16.msra.mxu1 %v801_v2  ;;  %v938_v41 = vld [vmem:[%s1464_s1 + $0x174] sm:$0xf0]  ;;  %v828_v43 = vld [vmem:[%s1464_s1 + $0x40] sm:$0xf]  ;;  %v1007_v44 = vld [vmem:[%s1464_s1 + $0xa0] sm:$0xf0]  ;;  %v933_v45 = vor.u32 %v1020_v36, %v930_v37  ;;  %v937_v46 = vor.u32 %v1033_v39, %v936_v38 }
  0x1a   :  { %519 = vmatpush.bf16.msra.mxu2 %v805_v7  ;;  %v995_v47 = vld [vmem:[%s1464_s1 + $0x44] sm:$0xf]  ;;  %v941_v48 = vor.u32 %v1021_v40, %v938_v41  ;;  %v830_v49 = vld [vmem:[%s1464_s1 + $0xa4] sm:$0xf0]  ;;  %v1008_v51 = vld [vmem:[%s1464_s1 + $0xa8] sm:$0xf0]  ;;  %v829_v54 = vor.u32 %v1007_v44, %v828_v43 }
  0x1b   :  { %532 = vmatpush.bf16.msra.mxu3 %v809_v8  ;;  %966 = vmatmul.msk.bf16.vlgmr.msrb.gmra.mxu0 %vm378_vm0, %v1109_v23  ;;  %v836_v50 = vld [vmem:[%s1464_s1 + $0x48] sm:$0xf]  ;;  %v996_v52 = vld [vmem:[%s1464_s1 + $0x4c] sm:$0xf]  ;;  %v838_v53 = vld [vmem:[%s1464_s1 + $0xac] sm:$0xf0]  ;;  %v833_v55 = vor.u32 %v995_v47, %v830_v49 }
  0x1c   :  { %967 = vmatmul.msk.bf16.vlgmr.msrb.gmra.mxu1 %vm378_vm0, %v1109_v23  ;;  %544 = vmatpush.bf16.msrb.mxu0 %v913_v17  ;;  %v837_v56 = vor.u32 %v1008_v51, %v836_v50  ;;  %v841_v57 = vor.u32 %v996_v52, %v838_v53  ;;  %v944_v58 = vld [vmem:[%s1464_s1 + $0x118] sm:$0xf]  ;;  %v1034_v59 = vld [vmem:[%s1464_s1 + $0x178] sm:$0xf0]  ;;  %v946_v61 = vld [vmem:[%s1464_s1 + $0x17c] sm:$0xf0] }
  0x1d   :  { %968 = vmatmul.msk.bf16.vlgmr.msrb.gmra.mxu2 %vm378_vm0, %v1109_v23  ;;  %557 = vmatpush.bf16.msrb.mxu1 %v917_v20  ;;  %v1022_v60 = vld [vmem:[%s1464_s1 + $0x11c] sm:$0xf]  ;;  %v952_v62 = vld [vmem:[%s1464_s1 + $0x120] sm:$0xf]  ;;  %v1035_v63 = vld [vmem:[%s1464_s1 + $0x180] sm:$0xf0]  ;;  %v945_v2 = vor.u32 %v1034_v59, %v944_v58 }
  0x1e   :  { %969 = vmatmul.msk.bf16.vlgmr.msrb.gmra.mxu3 %vm378_vm0, %v1109_v23  ;;  %570 = vmatpush.bf16.msrb.mxu2 %v921_v21  ;;  %v1023_v0 = vld [vmem:[%s1464_s1 + $0x124] sm:$0xf]  ;;  %v954_v1 = vld [vmem:[%s1464_s1 + $0x184] sm:$0xf0]  ;;  %v844_v3 = vld [vmem:[%s1464_s1 + $0x50] sm:$0xf]  ;;  %v949_v5 = vor.u32 %v1022_v60, %v946_v61  ;;  %v953_v6 = vor.u32 %v1035_v63, %v952_v62 }
  0x1f   :  { %583 = vmatpush.bf16.msrb.mxu3 %v925_v24  ;;  %v1009_v4 = vld [vmem:[%s1464_s1 + $0xb0] sm:$0xf0]  ;;  %v957_v8 = vor.u32 %v1023_v0, %v954_v1  ;;  %v846_v9 = vld [vmem:[%s1464_s1 + $0xb4] sm:$0xf0]  ;;  %v1010_v11 = vld [vmem:[%s1464_s1 + $0xb8] sm:$0xf0] }
  0x20   :  { %545 = vmatpush.bf16.msrb.mxu0 %v813_v30  ;;  %v997_v7 = vld [vmem:[%s1464_s1 + $0x54] sm:$0xf]  ;;  %v852_v10 = vld [vmem:[%s1464_s1 + $0x58] sm:$0xf]  ;;  %v998_v12 = vld [vmem:[%s1464_s1 + $0x5c] sm:$0xf]  ;;  %v845_v14 = vor.u32 %v1009_v4, %v844_v3 }
  0x21   :  { %558 = vmatpush.bf16.msrb.mxu1 %v817_v31  ;;  %v854_v13 = vld [vmem:[%s1464_s1 + $0xbc] sm:$0xf0]  ;;  %v849_v15 = vor.u32 %v997_v7, %v846_v9  ;;  %v853_v16 = vor.u32 %v1010_v11, %v852_v10  ;;  %v960_v18 = vld [vmem:[%s1464_s1 + $0x128] sm:$0xf]  ;;  %v1036_v19 = vld [vmem:[%s1464_s1 + $0x188] sm:$0xf0] }
  0x22   :  { %571 = vmatpush.bf16.msrb.mxu2 %v821_v32  ;;  %v857_v17 = vor.u32 %v998_v12, %v854_v13  ;;  %v961_v20 = vor.u32 %v1036_v19, %v960_v18  ;;  %v860_v21 = vld [vmem:[%s1464_s1 + $0x60] sm:$0xf]  ;;  %v1011_v22 = vld [vmem:[%s1464_s1 + $0xc0] sm:$0xf0]  ;;  %v69_v1 = vld [vmem:[%s1466_s2 + $0x8] sm:$0xff] }
  0x23   :  { %584 = vmatpush.bf16.msrb.mxu3 %v825_v33  ;;  %v861_v24 = vor.u32 %v1011_v22, %v860_v21  ;;  %v68_v25 = vld [vmem:[%s1466_s2] sm:$0xff]  ;;  %v84_v4 = vperm.slane %v69_v1, 0 }
  0x24   :  { %v76_v26 = vperm.slane %v68_v25, 0  ;;  %v77_v27 = vperm.slane %v68_v25, 1  ;;  %v78_v34 = vperm.slane %v68_v25, 2  ;;  %v79_v35 = vperm.slane %v68_v25, 3 }
  0x2b   :  { %970 = vmatmul.msk.bf16.vlgmr.msra.gmra.mxu0 %vm378_vm0, %v1109_v23 }
  0x2c   :  { %971 = vmatmul.msk.bf16.vlgmr.msra.gmra.mxu1 %vm378_vm0, %v1109_v23  ;;  %596 = vmatpush.bf16.msra.mxu0 %v929_v42 }
  0x2d   :  { %972 = vmatmul.msk.bf16.vlgmr.msra.gmra.mxu2 %vm378_vm0, %v1109_v23  ;;  %609 = vmatpush.bf16.msra.mxu1 %v933_v45  ;;  %v80_v45 = vperm.slane %v68_v25, 4 }
  0x2e   :  { %973 = vmatmul.msk.bf16.vlgmr.msra.gmra.mxu3 %vm378_vm0, %v1109_v23  ;;  %622 = vmatpush.bf16.msra.mxu2 %v937_v46  ;;  %v81_v46 = vperm.slane %v68_v25, 5 }
  0x2f   :  { %635 = vmatpush.bf16.msra.mxu3 %v941_v48 }
  0x30   :  { %597 = vmatpush.bf16.msra.mxu0 %v829_v54 }
  0x31   :  { %610 = vmatpush.bf16.msra.mxu1 %v833_v55  ;;  %v82_v55 = vperm.slane %v68_v25, 6 }
  0x32   :  { %623 = vmatpush.bf16.msra.mxu2 %v837_v56  ;;  %v83_v56 = vperm.slane %v68_v25, 7 }
  0x33   :  { %636 = vmatpush.bf16.msra.mxu3 %v841_v57 }
  0x3b   :  { %974 = vmatmul.msk.bf16.vlgmr.msrb.gmra.mxu0 %vm378_vm0, %v1109_v23 }
  0x3c   :  { %975 = vmatmul.msk.bf16.vlgmr.msrb.gmra.mxu1 %vm378_vm0, %v1109_v23  ;;  %648 = vmatpush.bf16.msrb.mxu0 %v945_v2 }
  0x3d   :  { %976 = vmatmul.msk.bf16.vlgmr.msrb.gmra.mxu2 %vm378_vm0, %v1109_v23  ;;  %661 = vmatpush.bf16.msrb.mxu1 %v949_v5  ;;  %v85_v5 = vperm.slane %v69_v1, 1 }
  0x3e   :  { %977 = vmatmul.msk.bf16.vlgmr.msrb.gmra.mxu3 %vm378_vm0, %v1109_v23  ;;  %674 = vmatpush.bf16.msrb.mxu2 %v953_v6 }
  0x3f   :  { %687 = vmatpush.bf16.msrb.mxu3 %v957_v8 }
  0x40   :  { %649 = vmatpush.bf16.msrb.mxu0 %v845_v14  ;;  %v86_v14 = vperm.slane %v69_v1, 2 }
  0x41   :  { %662 = vmatpush.bf16.msrb.mxu1 %v849_v15  ;;  %v87_v15 = vperm.slane %v69_v1, 3 }
  0x42   :  { %675 = vmatpush.bf16.msrb.mxu2 %v853_v16 }
  0x43   :  { %688 = vmatpush.bf16.msrb.mxu3 %v857_v17 }
  0x4b   :  { %978 = vmatmul.msk.bf16.vlgmr.msra.gmra.mxu0 %vm378_vm0, %v1109_v23 }
  0x4c   :  { %979 = vmatmul.msk.bf16.vlgmr.msra.gmra.mxu1 %vm378_vm0, %v1109_v23  ;;  %700 = vmatpush.bf16.msra.mxu0 %v961_v20 }
  0x4d   :  { %980 = vmatmul.msk.bf16.vlgmr.msra.gmra.mxu2 %vm378_vm0, %v1109_v23 }
  0x4e   :  { %981 = vmatmul.msk.bf16.vlgmr.msra.gmra.mxu3 %vm378_vm0, %v1109_v23 }
  0x50   :  { %701 = vmatpush.bf16.msra.mxu0 %v861_v24 }
  0x5b   :  { %982 = vmatmul.msk.bf16.vlgmr.msrb.gmra.mxu0 %vm378_vm0, %v1109_v23 }
  0x5c   :  { %983 = vmatmul.msk.bf16.vlgmr.msrb.gmra.mxu1 %vm378_vm0, %v1109_v23 }
  0x5d   :  { %984 = vmatmul.msk.bf16.vlgmr.msrb.gmra.mxu2 %vm378_vm0, %v1109_v23 }
  0x5e   :  { %985 = vmatmul.msk.bf16.vlgmr.msrb.gmra.mxu3 %vm378_vm0, %v1109_v23 }
  0x6b   :  { %986 = vmatmul.msk.bf16.vlgmr.msra.gmra.mxu0 %vm378_vm0, %v1109_v23 }
  0x88   :  { %v391_v28 = vpop.f32.mrf.mxu0 }
  0x89   :  { %v392_v29 = vadd.f32 %v391_v28, %v76_v26  ;;  %v404_v30 = vpop.f32.mrf.mxu1  ;;  %v89_v28 = vperm.slane %v69_v1, 5 }
  0x8a   :  { %v405_v31 = vadd.f32 %v404_v30, %v77_v27  ;;  %v88_v27 = vperm.slane %v69_v1, 4 }
  0x8b   :  { %v707_v32 = vmax.f32 %v392_v29, 0.0 }
  0x8c   :  { %v708_v33 = vmax.f32 %v405_v31, 0.0 }
  0x8e   :  { %v732_v36 = vpack.c.bf16 %v708_v33, %v707_v32 }
  0x90   :  { %v417_v37 = vpop.f32.mrf.mxu2  ;;  %745 = vst [vmem:[%s1467_s3] sm:$0xff] %v732_v36  ;;  %v393_v23 = vpop.f32.mrf.mxu0 }
  0x91   :  { %v418_v38 = vadd.f32 %v417_v37, %v78_v34  ;;  %v430_v39 = vpop.f32.mrf.mxu3  ;;  %v406_v40 = vpop.f32.mrf.mxu1  ;;  %v90_v37 = vperm.slane %v69_v1, 6  ;;  %v91_v23 = vperm.slane %v69_v1, 7 }
  0x92   :  { %v431_v41 = vadd.f32 %v430_v39, %v79_v35 }
  0x93   :  { %v709_v42 = vmax.f32 %v418_v38, 0.0 }
  0x94   :  { %v710_v43 = vmax.f32 %v431_v41, 0.0 }
  0x96   :  { %v733_v44 = vpack.c.bf16 %v710_v43, %v709_v42 }
  0x98   :  { %746 = vst [vmem:[%s1467_s3 + $0x8] sm:$0xff] %v733_v44  ;;  %v419_v47 = vpop.f32.mrf.mxu2  ;;  %v443_v49 = vpop.f32.mrf.mxu0 }
  0x99   :  { %v432_v48 = vpop.f32.mrf.mxu3  ;;  %v444_v50 = vadd.f32 %v443_v49, %v80_v45  ;;  %v456_v51 = vpop.f32.mrf.mxu1 }
  0x9a   :  { %v457_v52 = vadd.f32 %v456_v51, %v81_v46  ;;  %v70_v46 = vld [vmem:[%s1466_s2 + $0x10] sm:$0xff] }
  0x9b   :  { %v711_v53 = vmax.f32 %v444_v50, 0.0  ;;  %v92_v49 = vperm.slane %v70_v46, 0  ;;  %v93_v50 = vperm.slane %v70_v46, 1 }
  0x9c   :  { %v712_v54 = vmax.f32 %v457_v52, 0.0 }
  0x9e   :  { %v734_v57 = vpack.c.bf16 %v712_v54, %v711_v53 }
  0xa0   :  { %v469_v58 = vpop.f32.mrf.mxu2  ;;  %747 = vst [vmem:[%s1467_s3 + $0x10] sm:$0xff] %v734_v57  ;;  %v445_v59 = vpop.f32.mrf.mxu0 }
  0xa1   :  { %v470_v60 = vadd.f32 %v469_v58, %v82_v55  ;;  %v482_v61 = vpop.f32.mrf.mxu3  ;;  %v458_v62 = vpop.f32.mrf.mxu1  ;;  %v94_v59 = vperm.slane %v70_v46, 2 }
  0xa2   :  { %v483_v63 = vadd.f32 %v482_v61, %v83_v56 }
  0xa3   :  { %v713_v0 = vmax.f32 %v470_v60, 0.0  ;;  %v95_v60 = vperm.slane %v70_v46, 3 }
  0xa4   :  { %v714_v2 = vmax.f32 %v483_v63, 0.0 }
  0xa6   :  { %v735_v3 = vpack.c.bf16 %v714_v2, %v713_v0 }
  0xa8   :  { %748 = vst [vmem:[%s1467_s3 + $0x18] sm:$0xff] %v735_v3  ;;  %v471_v6 = vpop.f32.mrf.mxu2  ;;  %v495_v8 = vpop.f32.mrf.mxu0 }
  0xa9   :  { %v484_v7 = vpop.f32.mrf.mxu3  ;;  %v496_v9 = vadd.f32 %v495_v8, %v84_v4  ;;  %v508_v10 = vpop.f32.mrf.mxu1  ;;  %v97_v8 = vperm.slane %v70_v46, 5 }
  0xaa   :  { %v509_v11 = vadd.f32 %v508_v10, %v85_v5  ;;  %v96_v7 = vperm.slane %v70_v46, 4 }
  0xab   :  { %v715_v12 = vmax.f32 %v496_v9, 0.0 }
  0xac   :  { %v716_v13 = vmax.f32 %v509_v11, 0.0 }
  0xae   :  { %v736_v16 = vpack.c.bf16 %v716_v13, %v715_v12 }
  0xb0   :  { %v521_v17 = vpop.f32.mrf.mxu2  ;;  %749 = vst [vmem:[%s1467_s3 + $0x20] sm:$0xff] %v736_v16  ;;  %v497_v18 = vpop.f32.mrf.mxu0 }
  0xb1   :  { %v522_v19 = vadd.f32 %v521_v17, %v86_v14  ;;  %v534_v20 = vpop.f32.mrf.mxu3  ;;  %v510_v21 = vpop.f32.mrf.mxu1  ;;  %v98_v17 = vperm.slane %v70_v46, 6  ;;  %v99_v18 = vperm.slane %v70_v46, 7 }
  0xb2   :  { %v535_v22 = vadd.f32 %v534_v20, %v87_v15 }
  0xb3   :  { %v717_v24 = vmax.f32 %v522_v19, 0.0 }
  0xb4   :  { %v718_v25 = vmax.f32 %v535_v22, 0.0 }
  0xb6   :  { %v737_v26 = vpack.c.bf16 %v718_v25, %v717_v24 }
  0xb8   :  { %750 = vst [vmem:[%s1467_s3 + $0x28] sm:$0xff] %v737_v26  ;;  %v523_v29 = vpop.f32.mrf.mxu2  ;;  %v547_v31 = vpop.f32.mrf.mxu0 }
  0xb9   :  { %v536_v30 = vpop.f32.mrf.mxu3  ;;  %v548_v32 = vadd.f32 %v547_v31, %v88_v27  ;;  %v560_v33 = vpop.f32.mrf.mxu1 }
  0xba   :  { %v561_v34 = vadd.f32 %v560_v33, %v89_v28  ;;  %v1037_v30 = vld [vmem:[%s1466_s2 + $0x18] ss:$0 sm:$0xff] }
  0xbb   :  { %v719_v35 = vmax.f32 %v548_v32, 0.0 }
  0xbc   :  { %v720_v36 = vmax.f32 %v561_v34, 0.0 }
  0xbe   :  { %v738_v38 = vpack.c.bf16 %v720_v36, %v719_v35 }
  0xc0   :  { %v573_v39 = vpop.f32.mrf.mxu2  ;;  %751 = vst [vmem:[%s1467_s3 + $0x30] sm:$0xff] %v738_v38  ;;  %v549_v40 = vpop.f32.mrf.mxu0 }
  0xc1   :  { %v574_v41 = vadd.f32 %v573_v39, %v90_v37  ;;  %v586_v42 = vpop.f32.mrf.mxu3  ;;  %v562_v43 = vpop.f32.mrf.mxu1 }
  0xc2   :  { %v587_v44 = vadd.f32 %v586_v42, %v91_v23 }
  0xc3   :  { %v721_v45 = vmax.f32 %v574_v41, 0.0 }
  0xc4   :  { %v722_v47 = vmax.f32 %v587_v44, 0.0 }
  0xc6   :  { %v739_v48 = vpack.c.bf16 %v722_v47, %v721_v45 }
  0xc8   :  { %752 = vst [vmem:[%s1467_s3 + $0x38] sm:$0xff] %v739_v48  ;;  %v575_v51 = vpop.f32.mrf.mxu2  ;;  %v599_v53 = vpop.f32.mrf.mxu0 }
  0xc9   :  { %v588_v52 = vpop.f32.mrf.mxu3  ;;  %v600_v54 = vadd.f32 %v599_v53, %v92_v49  ;;  %v612_v55 = vpop.f32.mrf.mxu1 }
  0xca   :  { %v613_v56 = vadd.f32 %v612_v55, %v93_v50 }
  0xcb   :  { %v723_v57 = vmax.f32 %v600_v54, 0.0 }
  0xcc   :  { %v724_v58 = vmax.f32 %v613_v56, 0.0 }
  0xce   :  { %v740_v61 = vpack.c.bf16 %v724_v58, %v723_v57 }
  0xd0   :  { %v625_v62 = vpop.f32.mrf.mxu2  ;;  %753 = vst [vmem:[%s1467_s3 + $0x40] sm:$0xff] %v740_v61  ;;  %v601_v63 = vpop.f32.mrf.mxu0 }
  0xd1   :  { %v626_v0 = vadd.f32 %v625_v62, %v94_v59  ;;  %v638_v1 = vpop.f32.mrf.mxu3  ;;  %v614_v2 = vpop.f32.mrf.mxu1 }
  0xd2   :  { %v639_v3 = vadd.f32 %v638_v1, %v95_v60 }
  0xd3   :  { %v725_v4 = vmax.f32 %v626_v0, 0.0 }
  0xd4   :  { %v726_v5 = vmax.f32 %v639_v3, 0.0 }
  0xd6   :  { %v741_v6 = vpack.c.bf16 %v726_v5, %v725_v4 }
  0xd8   :  { %754 = vst [vmem:[%s1467_s3 + $0x48] sm:$0xff] %v741_v6  ;;  %v627_v9 = vpop.f32.mrf.mxu2  ;;  %v651_v11 = vpop.f32.mrf.mxu0 }
  0xd9   :  { %v640_v10 = vpop.f32.mrf.mxu3  ;;  %v652_v12 = vadd.f32 %v651_v11, %v96_v7  ;;  %v664_v13 = vpop.f32.mrf.mxu1 }
  0xda   :  { %v665_v14 = vadd.f32 %v664_v13, %v97_v8 }
  0xdb   :  { %v727_v15 = vmax.f32 %v652_v12, 0.0 }
  0xdc   :  { %v728_v16 = vmax.f32 %v665_v14, 0.0 }
  0xde   :  { %v742_v19 = vpack.c.bf16 %v728_v16, %v727_v15 }
  0xe0   :  { %v677_v20 = vpop.f32.mrf.mxu2  ;;  %755 = vst [vmem:[%s1467_s3 + $0x50] sm:$0xff] %v742_v19  ;;  %v653_v21 = vpop.f32.mrf.mxu0 }
  0xe1   :  { %v678_v22 = vadd.f32 %v677_v20, %v98_v17  ;;  %v690_v24 = vpop.f32.mrf.mxu3  ;;  %v666_v26 = vpop.f32.mrf.mxu1 }
  0xe2   :  { %v691_v25 = vadd.f32 %v690_v24, %v99_v18 }
  0xe3   :  { %v729_v27 = vmax.f32 %v678_v22, 0.0 }
  0xe4   :  { %v730_v28 = vmax.f32 %v691_v25, 0.0 }
  0xe6   :  { %v743_v29 = vpack.c.bf16 %v730_v28, %v729_v27 }
  0xe8   :  { %756 = vst [vmem:[%s1467_s3 + $0x58] sm:$0xff] %v743_v29  ;;  %v679_v31 = vpop.f32.mrf.mxu2  ;;  %v703_v33 = vpop.f32.mrf.mxu0 }
  0xe9   :  { %v692_v32 = vpop.f32.mrf.mxu3  ;;  %v704_v34 = vadd.f32 %v1037_v30, %v703_v33 }
  0xeb   :  { %v731_v35 = vmax.f32 %v704_v34, 0.0 }
  0xed   :  { %v744_v36 = vpack.c.bf16 %v731_v35, %v731_v35 }
  0xef   :  { %757 = vst [vmem:[%s1467_s3 + $0x60] sm:$0xf] %v744_v36 }
  0xf0   :  { %v705_v37 = vpop.f32.mrf.mxu0 }

// kernel: autoencoder_forward.9
= control target key start
LH: loop header
LB: loop body
LE: loop exit
PB: predicated region body
PF: predicated region fallthrough
CT: control target
= control target key end

     0   :  { %vm513_vm0 = vcmask 523264   ;;  %s1584_s1 = inlined_call_operand.vmem [shape: bf16[576,128], index: 1, kind: input, shape index: {}]   ;;  %s1585_s2 = inlined_call_operand.vmem [shape: f32[1,128], index: 2, kind: input, shape index: {}]   ;;  %s1586_s0 = inlined_call_operand.vmem [shape: bf16[104,576], index: 0, kind: input, shape index: {}]   ;;  %s1587_s3 = inlined_call_operand.vmem [shape: bf16[104,128], index: 3, kind: output, shape index: {}]  }
   0x1   :  { %v1101_v0 = vld [vmem:[%s1584_s1 + $0x38] sm:$0xff]  ;;  %v1100_v1 = vld [vmem:[%s1584_s1 + $0x30] sm:$0xff]  ;;  %v1099_v2 = vld [vmem:[%s1584_s1 + $0x28] sm:$0xff] }
   0x2   :  { %1165 = vmatpush.bf16.msra.mxu1 %v1101_v0  ;;  %1166 = vmatpush.bf16.msra.mxu2 %v1101_v0  ;;  %v1098_v3 = vld [vmem:[%s1584_s1 + $0x20] sm:$0xff]  ;;  %v1097_v4 = vld [vmem:[%s1584_s1 + $0x18] sm:$0xff]  ;;  %v1096_v5 = vld [vmem:[%s1584_s1 + $0x10] sm:$0xff] }
   0x3   :  { %1167 = vmatpush.bf16.msra.mxu3 %v1101_v0  ;;  %535 = vmatpush.bf16.msra.mxu0 %v1101_v0  ;;  %v1095_v6 = vld [vmem:[%s1584_s1 + $0x8] sm:$0xff]  ;;  %v1234_v7 = vld [vmem:[%s1586_s0 + $0xf0] sm:$0xff]  ;;  %v1094_v8 = vld [vmem:[%s1584_s1] sm:$0xff] }
   0x4   :  { %v835_v9 = vld [vmem:[%s1586_s0 + $0x50] sm:$0xf]  ;;  %v1076_v10 = vld [vmem:[%s1586_s0 + $0x60] sm:$0xf0]  ;;  %v875_v11 = vld [vmem:[%s1586_s0 + $0xa0] sm:$0xf]  ;;  %v229_v15 = vunpack.c.l.b16 %v1234_v7 }
   0x5   :  { %v1086_v12 = vld [vmem:[%s1586_s0 + $0xb0] sm:$0xf0]  ;;  %v795_v13 = vld [vmem:[%s1586_s0] sm:$0xf]  ;;  %v1125_v16 = vld [vmem:[%s1584_s1 + $0xf8] sm:$0xff]  ;;  %v836_v18 = vor.u32 %v1076_v10, %v835_v9 }
   0x6   :  { %1168 = vmatpush.bf16.msra.mxu1 %v1100_v1  ;;  %1169 = vmatpush.bf16.msra.mxu2 %v1100_v1  ;;  %v1066_v14 = vld [vmem:[%s1586_s0 + $0x10] sm:$0xf0]  ;;  %v1117_v17 = vld [vmem:[%s1584_s1 + $0xb8] sm:$0xff]  ;;  %v876_v19 = vor.u32 %v1086_v12, %v875_v11  ;;  %v264_v23 = vpack.c.b16 %v229_v15, %v229_v15  ;;  %v1123_v28 = vld [vmem:[%s1584_s1 + $0xe8] sm:$0xff] }
   0x7   :  { %1170 = vmatpush.bf16.msra.mxu3 %v1100_v1  ;;  %536 = vmatpush.bf16.msra.mxu0 %v1100_v1  ;;  %v796_v20 = vor.u32 %v1066_v14, %v795_v13  ;;  %v1109_v21 = vld [vmem:[%s1584_s1 + $0x78] sm:$0xff]  ;;  %v1124_v24 = vld [vmem:[%s1584_s1 + $0xf0] sm:$0xff]  ;;  %v1115_v29 = vld [vmem:[%s1584_s1 + $0xa8] sm:$0xff] }
   0x8   :  { %v1129_v22 = vld [vmem:[%s1584_s1 + $0x118] sm:$0xff]  ;;  %v1116_v25 = vld [vmem:[%s1584_s1 + $0xb0] sm:$0xff]  ;;  %v1107_v30 = vld [vmem:[%s1584_s1 + $0x68] sm:$0xff] }
   0x9   :  { %v1108_v26 = vld [vmem:[%s1584_s1 + $0x70] sm:$0xff]  ;;  %v1127_v31 = vld [vmem:[%s1584_s1 + $0x108] sm:$0xff]  ;;  %v1122_v32 = vld [vmem:[%s1584_s1 + $0xe0] sm:$0xff] }
   0xa   :  { %1171 = vmatpush.bf16.msra.mxu1 %v1099_v2  ;;  %1172 = vmatpush.bf16.msra.mxu2 %v1099_v2  ;;  %v1128_v27 = vld [vmem:[%s1584_s1 + $0x110] sm:$0xff]  ;;  %v1114_v33 = vld [vmem:[%s1584_s1 + $0xa0] sm:$0xff]  ;;  %v855_v35 = vld [vmem:[%s1586_s0 + $0x78] sm:$0xf] }
   0xb   :  { %1173 = vmatpush.bf16.msra.mxu3 %v1099_v2  ;;  %537 = vmatpush.bf16.msra.mxu0 %v1099_v2  ;;  %v1106_v34 = vld [vmem:[%s1584_s1 + $0x60] sm:$0xff]  ;;  %v1081_v36 = vld [vmem:[%s1586_s0 + $0x88] sm:$0xf0]  ;;  %v895_v37 = vld [vmem:[%s1586_s0 + $0xc8] sm:$0xf] }
   0xc   :  { %v1091_v38 = vld [vmem:[%s1586_s0 + $0xd8] sm:$0xf0]  ;;  %v815_v39 = vld [vmem:[%s1586_s0 + $0x28] sm:$0xf]  ;;  %v1126_v41 = vld [vmem:[%s1584_s1 + $0x100] sm:$0xff]  ;;  %v856_v44 = vor.u32 %v1081_v36, %v855_v35 }
   0xd   :  { %v1071_v40 = vld [vmem:[%s1586_s0 + $0x38] sm:$0xf0]  ;;  %v896_v45 = vor.u32 %v1091_v38, %v895_v37  ;;  %v1120_v48 = vld [vmem:[%s1584_s1 + $0xd0] sm:$0xff]  ;;  %v1119_v51 = vld [vmem:[%s1584_s1 + $0xc8] sm:$0xff] }
   0xe   :  { %1174 = vmatpush.bf16.msra.mxu1 %v1098_v3  ;;  %1175 = vmatpush.bf16.msra.mxu2 %v1098_v3  ;;  %v1121_v42 = vld [vmem:[%s1584_s1 + $0xd8] sm:$0xff]  ;;  %v816_v46 = vor.u32 %v1071_v40, %v815_v39  ;;  %v1112_v49 = vld [vmem:[%s1584_s1 + $0x90] sm:$0xff]  ;;  %v1111_v52 = vld [vmem:[%s1584_s1 + $0x88] sm:$0xff] }
   0xf   :  { %1176 = vmatpush.bf16.msra.mxu3 %v1098_v3  ;;  %538 = vmatpush.bf16.msra.mxu0 %v1098_v3  ;;  %v1113_v43 = vld [vmem:[%s1584_s1 + $0x98] sm:$0xff]  ;;  %v1104_v50 = vld [vmem:[%s1584_s1 + $0x50] sm:$0xff]  ;;  %v1103_v53 = vld [vmem:[%s1584_s1 + $0x48] sm:$0xff] }
  0x10   :  { %v1105_v47 = vld [vmem:[%s1584_s1 + $0x58] sm:$0xff]  ;;  %v1118_v54 = vld [vmem:[%s1584_s1 + $0xc0] sm:$0xff]  ;;  %v1065_v56 = vld [vmem:[%s1586_s0 + $0xc] sm:$0xf] }
  0x11   :  { %v1110_v55 = vld [vmem:[%s1584_s1 + $0x80] sm:$0xff]  ;;  %v797_v60 = vld [vmem:[%s1586_s0 + $0x14] sm:$0xf0]  ;;  %v803_v61 = vld [vmem:[%s1586_s0 + $0x8] sm:$0xf] }
  0x12   :  { %1177 = vmatpush.bf16.msra.mxu1 %v1097_v4  ;;  %1178 = vmatpush.bf16.msra.mxu2 %v1097_v4  ;;  %v805_v57 = vld [vmem:[%s1586_s0 + $0x1c] sm:$0xf0]  ;;  %v1064_v59 = vld [vmem:[%s1586_s0 + $0x4] sm:$0xf]  ;;  %v1067_v62 = vld [vmem:[%s1586_s0 + $0x18] sm:$0xf0] }
  0x13   :  { %1179 = vmatpush.bf16.msra.mxu3 %v1097_v4  ;;  %539 = vmatpush.bf16.msra.mxu0 %v1097_v4  ;;  %v1102_v58 = vld [vmem:[%s1584_s1 + $0x40] sm:$0xff]  ;;  %v808_v63 = vor.u32 %v1065_v56, %v805_v57  ;;  %v811_v0 = vld [vmem:[%s1586_s0 + $0x10] sm:$0xf]  ;;  %v800_v2 = vor.u32 %v1064_v59, %v797_v60  ;;  %v804_v3 = vor.u32 %v1067_v62, %v803_v61  ;;  %v831_v13 = vld [vmem:[%s1586_s0 + $0x38] sm:$0xf] }
  0x14   :  { %v1068_v1 = vld [vmem:[%s1586_s0 + $0x20] sm:$0xf0]  ;;  %v817_v9 = vld [vmem:[%s1586_s0 + $0x3c] sm:$0xf0]  ;;  %v823_v10 = vld [vmem:[%s1586_s0 + $0x30] sm:$0xf] }
  0x15   :  { %v812_v4 = vor.u32 %v1068_v1, %v811_v0  ;;  %v1072_v11 = vld [vmem:[%s1586_s0 + $0x40] sm:$0xf0]  ;;  %v1073_v14 = vld [vmem:[%s1586_s0 + $0x48] sm:$0xf0]  ;;  %v1082_v35 = vld [vmem:[%s1586_s0 + $0x90] sm:$0xf0] }
  0x16   :  { %1180 = vmatpush.bf16.msra.mxu1 %v1096_v5  ;;  %1181 = vmatpush.bf16.msra.mxu2 %v1096_v5  ;;  %v871_v37 = vld [vmem:[%s1586_s0 + $0x88] sm:$0xf]  ;;  %v1083_v38 = vld [vmem:[%s1586_s0 + $0x98] sm:$0xf0]  ;;  %v1089_v56 = vld [vmem:[%s1586_s0 + $0xcc] sm:$0xf] }
  0x17   :  { %1182 = vmatpush.bf16.msra.mxu3 %v1096_v5  ;;  %540 = vmatpush.bf16.msra.mxu0 %v1096_v5  ;;  %v1070_v5 = vld [vmem:[%s1586_s0 + $0x34] sm:$0xf]  ;;  %v897_v57 = vld [vmem:[%s1586_s0 + $0xdc] sm:$0xf0]  ;;  %v1092_v59 = vld [vmem:[%s1586_s0 + $0xe0] sm:$0xf0] }
  0x18   :  { %v911_v61 = vld [vmem:[%s1586_s0 + $0xd8] sm:$0xf]  ;;  %v1093_v62 = vld [vmem:[%s1586_s0 + $0xe8] sm:$0xf0] }
  0x19   :  { %v912_v1 = vor.u32 %v1093_v62, %v911_v61 }
  0x1a   :  { %1183 = vmatpush.bf16.msra.mxu1 %v1095_v6  ;;  %1184 = vmatpush.bf16.msra.mxu2 %v1095_v6 }
  0x1b   :  { %1185 = vmatpush.bf16.msra.mxu3 %v1095_v6  ;;  %541 = vmatpush.bf16.msra.mxu0 %v1095_v6  ;;  %v825_v6 = vld [vmem:[%s1586_s0 + $0x44] sm:$0xf0] }
  0x1c   :  { %v828_v12 = vor.u32 %v1070_v5, %v825_v6  ;;  %v230_v5 = vunpack.c.h.b16 %v1234_v7 }
  0x1e   :  { %1186 = vmatpush.bf16.msra.mxu1 %v1094_v8  ;;  %1187 = vmatpush.bf16.msra.mxu2 %v1094_v8 }
  0x1f   :  { %1188 = vmatpush.bf16.msra.mxu3 %v1094_v8  ;;  %542 = vmatpush.bf16.msra.mxu0 %v1094_v8  ;;  %v1069_v8 = vld [vmem:[%s1586_s0 + $0x2c] sm:$0xf] }
  0x20   :  { %v820_v15 = vor.u32 %v1069_v8, %v817_v9 }
  0x21   :  { %553 = vmatmul.bf16.vlgmr.msra.gmra.mxu1 %v836_v18  ;;  %563 = vmatmul.bf16.vlgmr.msra.gmra.mxu2 %v876_v19  ;;  %v1075_v18 = vld [vmem:[%s1586_s0 + $0x5c] sm:$0xf]  ;;  %v845_v19 = vld [vmem:[%s1586_s0 + $0x6c] sm:$0xf0] }
  0x22   :  { %621 = vmatpush.bf16.msrb.mxu2 %v1117_v17  ;;  %543 = vmatmul.bf16.vlgmr.msra.gmra.mxu0 %v796_v20  ;;  %v832_v17 = vor.u32 %v1073_v14, %v831_v13  ;;  %v1074_v20 = vld [vmem:[%s1586_s0 + $0x54] sm:$0xf] }
  0x23   :  { %664 = vmatpush.bf16.msrb.mxu3 %v1125_v16  ;;  %578 = vmatpush.bf16.msrb.mxu1 %v1109_v21  ;;  %v824_v16 = vor.u32 %v1072_v11, %v823_v10  ;;  %v837_v21 = vld [vmem:[%s1586_s0 + $0x64] sm:$0xf0]  ;;  %v265_v10 = vpack.c.b16 %v230_v5, %v230_v5 }
  0x24   :  { %711 = vmatpush.bf16.msrb.mxu0 %v1129_v22  ;;  %573 = vmatmul.bf16.vlgmr.msra.gmra.mxu3 %v264_v23  ;;  %v843_v22 = vld [vmem:[%s1586_s0 + $0x58] sm:$0xf]  ;;  %v1077_v23 = vld [vmem:[%s1586_s0 + $0x68] sm:$0xf0] }
  0x26   :  { %622 = vmatpush.bf16.msrb.mxu2 %v1116_v25  ;;  %v851_v25 = vld [vmem:[%s1586_s0 + $0x60] sm:$0xf] }
  0x27   :  { %665 = vmatpush.bf16.msrb.mxu3 %v1124_v24  ;;  %579 = vmatpush.bf16.msrb.mxu1 %v1108_v26  ;;  %v848_v24 = vor.u32 %v1075_v18, %v845_v19  ;;  %v1078_v26 = vld [vmem:[%s1586_s0 + $0x70] sm:$0xf0] }
  0x28   :  { %712 = vmatpush.bf16.msrb.mxu0 %v1128_v27  ;;  %v840_v27 = vor.u32 %v1074_v20, %v837_v21 }
  0x2a   :  { %623 = vmatpush.bf16.msrb.mxu2 %v1115_v29  ;;  %v852_v29 = vor.u32 %v1078_v26, %v851_v25 }
  0x2b   :  { %666 = vmatpush.bf16.msrb.mxu3 %v1123_v28  ;;  %580 = vmatpush.bf16.msrb.mxu1 %v1107_v30  ;;  %v844_v28 = vor.u32 %v1077_v23, %v843_v22  ;;  %v1080_v30 = vld [vmem:[%s1586_s0 + $0x84] sm:$0xf] }
  0x2c   :  { %713 = vmatpush.bf16.msrb.mxu0 %v1127_v31  ;;  %v865_v31 = vld [vmem:[%s1586_s0 + $0x94] sm:$0xf0] }
  0x2d   :  { %v868_v36 = vor.u32 %v1080_v30, %v865_v31 }
  0x2e   :  { %624 = vmatpush.bf16.msrb.mxu2 %v1114_v33  ;;  %v857_v33 = vld [vmem:[%s1586_s0 + $0x8c] sm:$0xf0] }
  0x2f   :  { %667 = vmatpush.bf16.msrb.mxu3 %v1122_v32  ;;  %581 = vmatpush.bf16.msrb.mxu1 %v1106_v34  ;;  %v1079_v32 = vld [vmem:[%s1586_s0 + $0x7c] sm:$0xf]  ;;  %v863_v34 = vld [vmem:[%s1586_s0 + $0x80] sm:$0xf] }
  0x30   :  { %714 = vmatpush.bf16.msrb.mxu0 %v1126_v41  ;;  %v860_v39 = vor.u32 %v1079_v32, %v857_v33  ;;  %v864_v40 = vor.u32 %v1082_v35, %v863_v34  ;;  %v872_v41 = vor.u32 %v1083_v38, %v871_v37 }
  0x31   :  { %558 = vmatmul.bf16.gmra.mxu1 %v856_v44  ;;  %568 = vmatmul.bf16.gmra.mxu2 %v896_v45  ;;  %v1084_v44 = vld [vmem:[%s1586_s0 + $0xa4] sm:$0xf]  ;;  %v877_v45 = vld [vmem:[%s1586_s0 + $0xb4] sm:$0xf0] }
  0x32   :  { %625 = vmatpush.bf16.msrb.mxu2 %v1113_v43  ;;  %548 = vmatmul.bf16.gmra.mxu0 %v816_v46  ;;  %v885_v43 = vld [vmem:[%s1586_s0 + $0xbc] sm:$0xf0]  ;;  %v883_v46 = vld [vmem:[%s1586_s0 + $0xa8] sm:$0xf] }
  0x33   :  { %668 = vmatpush.bf16.msrb.mxu3 %v1121_v42  ;;  %582 = vmatpush.bf16.msrb.mxu1 %v1105_v47  ;;  %v1085_v42 = vld [vmem:[%s1586_s0 + $0xac] sm:$0xf]  ;;  %v1087_v47 = vld [vmem:[%s1586_s0 + $0xb8] sm:$0xf0] }
  0x36   :  { %626 = vmatpush.bf16.msrb.mxu2 %v1112_v49  ;;  %v891_v49 = vld [vmem:[%s1586_s0 + $0xb0] sm:$0xf] }
  0x37   :  { %669 = vmatpush.bf16.msrb.mxu3 %v1120_v48  ;;  %583 = vmatpush.bf16.msrb.mxu1 %v1104_v50  ;;  %v888_v48 = vor.u32 %v1085_v42, %v885_v43  ;;  %v1088_v50 = vld [vmem:[%s1586_s0 + $0xc0] sm:$0xf0] }
  0x3a   :  { %627 = vmatpush.bf16.msrb.mxu2 %v1111_v52  ;;  %v884_v52 = vor.u32 %v1087_v47, %v883_v46 }
  0x3b   :  { %670 = vmatpush.bf16.msrb.mxu3 %v1119_v51  ;;  %584 = vmatpush.bf16.msrb.mxu1 %v1103_v53  ;;  %v880_v51 = vor.u32 %v1084_v44, %v877_v45  ;;  %v892_v53 = vor.u32 %v1088_v50, %v891_v49 }
  0x3e   :  { %628 = vmatpush.bf16.msrb.mxu2 %v1110_v55  ;;  %v905_v55 = vld [vmem:[%s1586_s0 + $0xe4] sm:$0xf0] }
  0x3f   :  { %671 = vmatpush.bf16.msrb.mxu3 %v1118_v54  ;;  %585 = vmatpush.bf16.msrb.mxu1 %v1102_v58  ;;  %v1090_v54 = vld [vmem:[%s1586_s0 + $0xd4] sm:$0xf]  ;;  %v903_v58 = vld [vmem:[%s1586_s0 + $0xd0] sm:$0xf] }
  0x40   :  { %v908_v60 = vor.u32 %v1090_v54, %v905_v55  ;;  %v904_v0 = vor.u32 %v1092_v59, %v903_v58 }
  0x41   :  { %629 = vmatmul.bf16.vlgmr.msrb.gmra.mxu2 %v804_v3 }
  0x42   :  { %672 = vmatmul.bf16.vlgmr.msrb.gmra.mxu3 %v808_v63  ;;  %586 = vmatmul.bf16.vlgmr.msrb.gmra.mxu1 %v800_v2  ;;  %v900_v63 = vor.u32 %v1089_v56, %v897_v57  ;;  %v52_v2 = vld [vmem:[%s1586_s0 + $0xf8] sm:$0xff] }
  0x43   :  { %1057 = vmatmul.msk.bf16.vlgmr.msrb.gmra.mxu0 %vm513_vm0, %v812_v4  ;;  %v232_v3 = vunpack.c.h.b16 %v52_v2  ;;  %v53_v4 = vld [vmem:[%s1586_s0 + $0x100] sm:$0xf]  ;;  %v231_v6 = vunpack.c.l.b16 %v52_v2 }
  0x44   :  { %v233_v8 = vunpack.c.l.b16 %v53_v4 }
  0x45   :  { %v267_v9 = vpack.c.b16 %v232_v3, %v232_v3  ;;  %v266_v11 = vpack.c.b16 %v231_v6, %v231_v6 }
  0x46   :  { %v268_v13 = vpack.c.b16 %v233_v8, %v233_v8 }
  0x51   :  { %634 = vmatmul.bf16.gmra.mxu2 %v824_v16 }
  0x52   :  { %677 = vmatmul.bf16.gmra.mxu3 %v828_v12  ;;  %591 = vmatmul.bf16.gmra.mxu1 %v820_v15  ;;  %v1523_v15 = vld [vmem:[%s1585_s2] ss:$0 sm:$0xff] }
  0x53   :  { %1058 = vmatmul.msk.bf16.gmra.mxu0 %vm513_vm0, %v832_v17 }
  0x61   :  { %639 = vmatmul.bf16.gmra.mxu2 %v844_v28 }
  0x62   :  { %682 = vmatmul.bf16.gmra.mxu3 %v848_v24  ;;  %596 = vmatmul.bf16.gmra.mxu1 %v840_v27 }
  0x63   :  { %1059 = vmatmul.msk.bf16.gmra.mxu0 %vm513_vm0, %v852_v29 }
  0x71   :  { %644 = vmatmul.bf16.gmra.mxu2 %v864_v40 }
  0x72   :  { %687 = vmatmul.bf16.gmra.mxu3 %v868_v36  ;;  %601 = vmatmul.bf16.gmra.mxu1 %v860_v39 }
  0x73   :  { %1060 = vmatmul.msk.bf16.gmra.mxu0 %vm513_vm0, %v872_v41 }
  0x81   :  { %649 = vmatmul.bf16.gmra.mxu2 %v884_v52 }
  0x82   :  { %692 = vmatmul.bf16.gmra.mxu3 %v888_v48  ;;  %606 = vmatmul.bf16.gmra.mxu1 %v880_v51 }
  0x83   :  { %1061 = vmatmul.msk.bf16.gmra.mxu0 %vm513_vm0, %v892_v53 }
  0x91   :  { %654 = vmatmul.bf16.gmra.mxu2 %v904_v0 }
  0x92   :  { %697 = vmatmul.bf16.gmra.mxu3 %v908_v60  ;;  %611 = vmatmul.bf16.gmra.mxu1 %v900_v63 }
  0x93   :  { %1062 = vmatmul.msk.bf16.gmra.mxu0 %vm513_vm0, %v912_v1 }
  0x9e   :  { %v1517_v12 = vpop.f32.mrf.mxu1 }
  0x9f   :  { %v544_v14 = vpop.f32.mrf.mxu0 }
  0xa0   :  { %v545_v35 = vadd.f32 %v1523_v15, %v544_v14 }
  0xa1   :  { %659 = vmatmul.bf16.gmra.mxu2 %v266_v11  ;;  %v555_v11 = vadd.f32 %v1523_v15, %v1517_v12 }
  0xa2   :  { %702 = vmatmul.bf16.gmra.mxu3 %v267_v9  ;;  %616 = vmatmul.bf16.gmra.mxu1 %v265_v10 }
  0xa3   :  { %1063 = vmatmul.msk.bf16.gmra.mxu0 %vm513_vm0, %v268_v13 }
  0xa4   :  { %v564_v7 = vpop.f32.mrf.mxu2 }
  0xa5   :  { %v1526_v16 = vadd.f32 %v1523_v15, %v564_v7 }
  0xa6   :  { %v1528_v17 = vpop.f32.mrf.mxu1 }
  0xa7   :  { %v574_v18 = vpop.f32.mrf.mxu3  ;;  %v546_v19 = vpop.f32.mrf.mxu0 }
  0xa8   :  { %v1531_v20 = vadd.f32 %v1523_v15, %v574_v18  ;;  %v547_v41 = vadd.f32 %v1523_v15, %v546_v19 }
  0xac   :  { %v566_v21 = vpop.f32.mrf.mxu2 }
  0xad   :  { %v1534_v22 = vadd.f32 %v1523_v15, %v566_v21 }
  0xae   :  { %v1536_v23 = vpop.f32.mrf.mxu1 }
  0xaf   :  { %v576_v24 = vpop.f32.mrf.mxu3  ;;  %v549_v25 = vpop.f32.mrf.mxu0 }
  0xb0   :  { %v550_v53 = vadd.f32 %v1523_v15, %v549_v25 }
  0xb4   :  { %v569_v26 = vpop.f32.mrf.mxu2 }
  0xb5   :  { %v1539_v27 = vadd.f32 %v1523_v15, %v569_v26  ;;  %v557_v26 = vadd.f32 %v1523_v15, %v1528_v17 }
  0xb6   :  { %v1541_v28 = vpop.f32.mrf.mxu1 }
  0xb7   :  { %v551_v29 = vpop.f32.mrf.mxu0 }
  0xb8   :  { %v552_v62 = vadd.f32 %v1523_v15, %v551_v29 }
  0xbc   :  { %v571_v30 = vpop.f32.mrf.mxu2 }
  0xbd   :  { %v1544_v31 = vadd.f32 %v1523_v15, %v571_v30 }
  0xbf   :  { %v587_v32 = vpop.f32.mrf.mxu1 }
  0xc0   :  { %v716_v33 = vpop.f32.mrf.mxu0  ;;  %v588_v37 = vadd.f32 %v587_v32, %v545_v35 }
  0xc4   :  { %v630_v36 = vpop.f32.mrf.mxu2 }
  0xc5   :  { %v673_v34 = vpop.f32.mrf.mxu3  ;;  %v631_v39 = vadd.f32 %v630_v36, %v588_v37 }
  0xc7   :  { %v589_v38 = vpop.f32.mrf.mxu1  ;;  %v674_v43 = vadd.f32 %v673_v34, %v631_v39 }
  0xc8   :  { %v718_v40 = vpop.f32.mrf.mxu0  ;;  %v590_v44 = vadd.f32 %v589_v38, %v547_v41 }
  0xc9   :  { %v717_v48 = vadd.f32 %v716_v33, %v674_v43 }
  0xcb   :  { %v750_v54 = vmax.f32 %v717_v48, 0.0  ;;  %v562_v48 = vadd.f32 %v1523_v15, %v1541_v28 }
  0xcc   :  { %v632_v45 = vpop.f32.mrf.mxu2 }
  0xcd   :  { %v675_v42 = vpop.f32.mrf.mxu3  ;;  %v633_v46 = vadd.f32 %v632_v45, %v590_v44 }
  0xcf   :  { %v592_v47 = vpop.f32.mrf.mxu1  ;;  %v676_v49 = vadd.f32 %v675_v42, %v633_v46 }
  0xd0   :  { %v721_v50 = vpop.f32.mrf.mxu0  ;;  %v593_v58 = vadd.f32 %v592_v47, %v550_v53 }
  0xd1   :  { %v719_v51 = vadd.f32 %v718_v40, %v676_v49  ;;  %v560_v40 = vadd.f32 %v1523_v15, %v1536_v23 }
  0xd3   :  { %v751_v55 = vmax.f32 %v719_v51, 0.0 }
  0xd4   :  { %v635_v56 = vpop.f32.mrf.mxu2 }
  0xd5   :  { %v678_v52 = vpop.f32.mrf.mxu3  ;;  %v1133_v57 = vpack.c.bf16 %v751_v55, %v750_v54  ;;  %v636_v60 = vadd.f32 %v635_v56, %v593_v58 }
  0xd7   :  { %v594_v59 = vpop.f32.mrf.mxu1  ;;  %1134 = vst [vmem:[%s1587_s3] sm:$0xff] %v1133_v57   ;;  %v679_v0 = vadd.f32 %v678_v52, %v636_v60 }
  0xd8   :  { %v723_v61 = vpop.f32.mrf.mxu0  ;;  %v595_v1 = vadd.f32 %v594_v59, %v552_v62 }
  0xd9   :  { %v722_v5 = vadd.f32 %v721_v50, %v679_v0 }
  0xdb   :  { %v752_v13 = vmax.f32 %v722_v5, 0.0 }
  0xdc   :  { %v637_v2 = vpop.f32.mrf.mxu2 }
  0xdd   :  { %v680_v63 = vpop.f32.mrf.mxu3  ;;  %v638_v3 = vadd.f32 %v637_v2, %v595_v1 }
  0xdf   :  { %v597_v4 = vpop.f32.mrf.mxu1  ;;  %v681_v6 = vadd.f32 %v680_v63, %v638_v3 }
  0xe0   :  { %v726_v8 = vpop.f32.mrf.mxu0  ;;  %v598_v19 = vadd.f32 %v597_v4, %v555_v11 }
  0xe1   :  { %v724_v9 = vadd.f32 %v723_v61, %v681_v6 }
  0xe3   :  { %v753_v14 = vmax.f32 %v724_v9, 0.0 }
  0xe4   :  { %v640_v7 = vpop.f32.mrf.mxu2 }
  0xe5   :  { %v683_v10 = vpop.f32.mrf.mxu3  ;;  %v1138_v18 = vpack.c.bf16 %v753_v14, %v752_v13  ;;  %v641_v24 = vadd.f32 %v640_v7, %v598_v19 }
  0xe7   :  { %v599_v21 = vpop.f32.mrf.mxu1  ;;  %1160 = vst [vmem:[%s1587_s3 + $0x8] sm:$0xff] %v1138_v18   ;;  %v684_v30 = vadd.f32 %v683_v10, %v641_v24 }
  0xe8   :  { %v728_v25 = vpop.f32.mrf.mxu0  ;;  %v600_v32 = vadd.f32 %v599_v21, %v557_v26 }
  0xe9   :  { %v727_v35 = vadd.f32 %v726_v8, %v684_v30 }
  0xeb   :  { %v754_v41 = vmax.f32 %v727_v35, 0.0 }
  0xec   :  { %v642_v33 = vpop.f32.mrf.mxu2 }
  0xed   :  { %v685_v29 = vpop.f32.mrf.mxu3  ;;  %v643_v12 = vadd.f32 %v642_v33, %v600_v32 }
  0xef   :  { %v602_v34 = vpop.f32.mrf.mxu1  ;;  %v686_v36 = vadd.f32 %v685_v29, %v643_v12 }
  0xf0   :  { %v731_v37 = vpop.f32.mrf.mxu0  ;;  %v603_v45 = vadd.f32 %v602_v34, %v560_v40 }
  0xf1   :  { %v729_v38 = vadd.f32 %v728_v25, %v686_v36 }
  0xf3   :  { %v755_v42 = vmax.f32 %v729_v38, 0.0 }
  0xf4   :  { %v645_v43 = vpop.f32.mrf.mxu2 }
  0xf5   :  { %v688_v39 = vpop.f32.mrf.mxu3  ;;  %v1143_v44 = vpack.c.bf16 %v755_v42, %v754_v41  ;;  %v646_v46 = vadd.f32 %v645_v43, %v603_v45 }
  0xf7   :  { %v604_v17 = vpop.f32.mrf.mxu1  ;;  %1161 = vst [vmem:[%s1587_s3 + $0x10] sm:$0xff] %v1143_v44   ;;  %v689_v50 = vadd.f32 %v688_v39, %v646_v46 }
  0xf8   :  { %v733_v47 = vpop.f32.mrf.mxu0  ;;  %v605_v51 = vadd.f32 %v604_v17, %v562_v48 }
  0xf9   :  { %v732_v54 = vadd.f32 %v731_v37, %v689_v50 }
  0xfb   :  { %v756_v59 = vmax.f32 %v732_v54, 0.0 }
  0xfc   :  { %v647_v52 = vpop.f32.mrf.mxu2 }
  0xfd   :  { %v690_v49 = vpop.f32.mrf.mxu3  ;;  %v648_v23 = vadd.f32 %v647_v52, %v605_v51 }
  0xff   :  { %v607_v53 = vpop.f32.mrf.mxu1  ;;  %v691_v55 = vadd.f32 %v690_v49, %v648_v23 }
 0x100   :  { %v736_v56 = vpop.f32.mrf.mxu0  ;;  %v608_v63 = vadd.f32 %v607_v53, %v1526_v16 }
 0x101   :  { %v734_v57 = vadd.f32 %v733_v47, %v691_v55 }
 0x103   :  { %v757_v60 = vmax.f32 %v734_v57, 0.0 }
 0x104   :  { %v650_v61 = vpop.f32.mrf.mxu2 }
 0x105   :  { %v693_v58 = vpop.f32.mrf.mxu3  ;;  %v1148_v62 = vpack.c.bf16 %v757_v60, %v756_v59  ;;  %v651_v15 = vadd.f32 %v650_v61, %v608_v63 }
 0x107   :  { %v609_v0 = vpop.f32.mrf.mxu1  ;;  %1162 = vst [vmem:[%s1587_s3 + $0x18] sm:$0xff] %v1148_v62   ;;  %v694_v2 = vadd.f32 %v693_v58, %v651_v15 }
 0x108   :  { %v738_v28 = vpop.f32.mrf.mxu0  ;;  %v610_v3 = vadd.f32 %v609_v0, %v1534_v22 }
 0x109   :  { %v737_v8 = vadd.f32 %v736_v56, %v694_v2 }
 0x10b   :  { %v758_v16 = vmax.f32 %v737_v8, 0.0 }
 0x10c   :  { %v652_v4 = vpop.f32.mrf.mxu2 }
 0x10d   :  { %v695_v1 = vpop.f32.mrf.mxu3  ;;  %v653_v5 = vadd.f32 %v652_v4, %v610_v3 }
 0x10f   :  { %v612_v6 = vpop.f32.mrf.mxu1  ;;  %v696_v9 = vadd.f32 %v695_v1, %v653_v5 }
 0x110   :  { %v741_v10 = vpop.f32.mrf.mxu0  ;;  %v613_v19 = vadd.f32 %v612_v6, %v1539_v27 }
 0x111   :  { %v739_v11 = vadd.f32 %v738_v28, %v696_v9 }
 0x113   :  { %v759_v14 = vmax.f32 %v739_v11, 0.0 }
 0x114   :  { %v655_v7 = vpop.f32.mrf.mxu2 }
 0x115   :  { %v698_v13 = vpop.f32.mrf.mxu3  ;;  %v1153_v18 = vpack.c.bf16 %v759_v14, %v758_v16  ;;  %v656_v22 = vadd.f32 %v655_v7, %v613_v19 }
 0x117   :  { %v614_v21 = vpop.f32.mrf.mxu1  ;;  %1163 = vst [vmem:[%s1587_s3 + $0x20] sm:$0xff] %v1153_v18   ;;  %v699_v26 = vadd.f32 %v698_v13, %v656_v22 }
 0x118   :  { %v743_v24 = vpop.f32.mrf.mxu0  ;;  %v615_v29 = vadd.f32 %v614_v21, %v1544_v31 }
 0x119   :  { %v742_v12 = vadd.f32 %v741_v10, %v699_v26 }
 0x11b   :  { %v760_v27 = vmax.f32 %v742_v12, 0.0 }
 0x11c   :  { %v657_v30 = vpop.f32.mrf.mxu2 }
 0x11d   :  { %v700_v25 = vpop.f32.mrf.mxu3  ;;  %v658_v32 = vadd.f32 %v657_v30, %v615_v29 }
 0x11f   :  { %v617_v33 = vpop.f32.mrf.mxu1  ;;  %v701_v34 = vadd.f32 %v700_v25, %v658_v32 }
 0x120   :  { %v746_v35 = vpop.f32.mrf.mxu0  ;;  %v618_v39 = vadd.f32 %v617_v33, %v1531_v20 }
 0x121   :  { %v744_v36 = vadd.f32 %v743_v24, %v701_v34 }
 0x123   :  { %v761_v38 = vmax.f32 %v744_v36, 0.0 }
 0x124   :  { %v660_v40 = vpop.f32.mrf.mxu2 }
 0x125   :  { %v703_v37 = vpop.f32.mrf.mxu3  ;;  %v1158_v41 = vpack.c.bf16 %v761_v38, %v760_v27  ;;  %v661_v42 = vadd.f32 %v660_v40, %v618_v39 }
 0x127   :  { %v619_v43 = vpop.f32.mrf.mxu1  ;;  %1164 = vst [vmem:[%s1587_s3 + $0x28] sm:$0xff] %v1158_v41   ;;  %v704_v31 = vadd.f32 %v703_v37, %v661_v42 }
 0x128   :  { %v748_v44 = vpop.f32.mrf.mxu0 }
 0x129   :  { %v747_v45 = vadd.f32 %v746_v35, %v704_v31 }
 0x12b   :  { %v762_v46 = vmax.f32 %v747_v45, 0.0 }
 0x12c   :  { %v662_v47 = vpop.f32.mrf.mxu2 }
 0x12d   :  { %v705_v17 = vpop.f32.mrf.mxu3  ;;  %v775_v48 = vpack.c.bf16 %v762_v46, %v762_v46 }
 0x12f   :  { %788 = vst [vmem:[%s1587_s3 + $0x30] sm:$0xf] %v775_v48 }

// kernel: autoencoder_forward.10
= control target key start
LH: loop header
LB: loop body
LE: loop exit
PB: predicated region body
PF: predicated region fallthrough
CT: control target
= control target key end

     0   :  { %vm362_vm0 = vcmask 130048   ;;  %s1898_s1 = inlined_call_operand.vmem [shape: bf16[144,128], index: 1, kind: input, shape index: {}]   ;;  %s1899_s0 = inlined_call_operand.vmem [shape: bf16[392,144], index: 0, kind: input, shape index: {}]   ;;  %s1900_s2 = inlined_call_operand.vmem [shape: f32[1,128], index: 2, kind: input, shape index: {}]   ;;  %s1901_s3 = inlined_call_operand.vmem [shape: bf16[392,128], index: 3, kind: output, shape index: {}]  }
   0x1   :  { %v1163_v0 = vld [vmem:[%s1898_s1 + $0x38] sm:$0xff]  ;;  %v1164_v1 = vld [vmem:[%s1898_s1 + $0x40] sm:$0xff]  ;;  %v859_v3 = vld [vmem:[%s1899_s0 + $0x8] sm:$0xf0] }
   0x2   :  { %v1108_v2 = vld [vmem:[%s1899_s0 + $0x4] sm:$0xf]  ;;  %438 = vmatpush.bf16.msra.mxu0 %v1163_v0  ;;  %1308 = vmatpush.bf16.msra.mxu2 %v1163_v0  ;;  %v1162_v5 = vld [vmem:[%s1898_s1 + $0x30] sm:$0xff]  ;;  %v1161_v6 = vld [vmem:[%s1898_s1 + $0x28] sm:$0xff] }
   0x3   :  { %v862_v4 = vor.u32 %v1108_v2, %v859_v3  ;;  %578 = vmatpush.bf16.msra.mxu1 %v1164_v1  ;;  %1316 = vmatpush.bf16.msra.mxu3 %v1164_v1  ;;  %v1160_v7 = vld [vmem:[%s1898_s1 + $0x20] sm:$0xff]  ;;  %v1159_v8 = vld [vmem:[%s1898_s1 + $0x18] sm:$0xff]  ;;  %v1110_v9 = vld [vmem:[%s1899_s0 + $0x14] sm:$0xf] }
   0x4   :  { %v867_v10 = vld [vmem:[%s1899_s0 + $0x18] sm:$0xf0]  ;;  %v1158_v12 = vld [vmem:[%s1898_s1 + $0x10] sm:$0xff]  ;;  %v1157_v13 = vld [vmem:[%s1898_s1 + $0x8] sm:$0xff] }
   0x5   :  { %v870_v11 = vor.u32 %v1110_v9, %v867_v10  ;;  %v1136_v14 = vld [vmem:[%s1899_s0 + $0xe4] sm:$0xf]  ;;  %v971_v15 = vld [vmem:[%s1899_s0 + $0xe8] sm:$0xf0]  ;;  %v857_v18 = vld [vmem:[%s1899_s0] sm:$0xf] }
   0x6   :  { %1083 = vmatmul.msk.bf16.vlgmr.msra.gmra.mxu1 %vm362_vm0, %v862_v4  ;;  %439 = vmatpush.bf16.msra.mxu0 %v1162_v5  ;;  %v974_v16 = vor.u32 %v1136_v14, %v971_v15  ;;  %v1156_v17 = vld [vmem:[%s1898_s1] sm:$0xff]  ;;  %v1109_v19 = vld [vmem:[%s1899_s0 + $0x4] sm:$0xf0]  ;;  %v875_v25 = vld [vmem:[%s1899_s0 + $0x28] sm:$0xf0] }
   0x7   :  { %1309 = vmatpush.bf16.msra.mxu2 %v1162_v5  ;;  %v953_v20 = vld [vmem:[%s1899_s0 + $0xc0] sm:$0xf]  ;;  %v1133_v21 = vld [vmem:[%s1899_s0 + $0xc4] sm:$0xf0]  ;;  %v858_v22 = vor.u32 %v1109_v19, %v857_v18  ;;  %v1112_v24 = vld [vmem:[%s1899_s0 + $0x24] sm:$0xf] }
   0x8   :  { %1097 = vmatmul.msk.bf16.vlgmr.msra.gmra.mxu3 %vm362_vm0, %v974_v16  ;;  %v954_v23 = vor.u32 %v1133_v21, %v953_v20  ;;  %v878_v26 = vor.u32 %v1112_v24, %v875_v25  ;;  %v1138_v27 = vld [vmem:[%s1899_s0 + $0xf4] sm:$0xf]  ;;  %v979_v28 = vld [vmem:[%s1899_s0 + $0xf8] sm:$0xf0]  ;;  %v865_v30 = vld [vmem:[%s1899_s0 + $0x10] sm:$0xf] }
   0x9   :  { %v982_v29 = vor.u32 %v1138_v27, %v979_v28  ;;  %v1111_v31 = vld [vmem:[%s1899_s0 + $0x14] sm:$0xf0]  ;;  %v961_v32 = vld [vmem:[%s1899_s0 + $0xd0] sm:$0xf]  ;;  %v1114_v36 = vld [vmem:[%s1899_s0 + $0x34] sm:$0xf] }
   0xa   :  { %440 = vmatpush.bf16.msra.mxu0 %v1161_v6  ;;  %v1135_v33 = vld [vmem:[%s1899_s0 + $0xd4] sm:$0xf0]  ;;  %v866_v34 = vor.u32 %v1111_v31, %v865_v30  ;;  %v883_v37 = vld [vmem:[%s1899_s0 + $0x38] sm:$0xf0]  ;;  %v1140_v39 = vld [vmem:[%s1899_s0 + $0x104] sm:$0xf] }
   0xb   :  { %1310 = vmatpush.bf16.msra.mxu2 %v1161_v6  ;;  %v962_v35 = vor.u32 %v1135_v33, %v961_v32  ;;  %v886_v38 = vor.u32 %v1114_v36, %v883_v37  ;;  %v987_v40 = vld [vmem:[%s1899_s0 + $0x108] sm:$0xf0]  ;;  %v873_v42 = vld [vmem:[%s1899_s0 + $0x20] sm:$0xf]  ;;  %v1113_v43 = vld [vmem:[%s1899_s0 + $0x24] sm:$0xf0] }
   0xc   :  { %v990_v41 = vor.u32 %v1140_v39, %v987_v40  ;;  %v969_v44 = vld [vmem:[%s1899_s0 + $0xe0] sm:$0xf]  ;;  %v1137_v45 = vld [vmem:[%s1899_s0 + $0xe4] sm:$0xf0]  ;;  %v874_v46 = vor.u32 %v1113_v43, %v873_v42  ;;  %v1116_v48 = vld [vmem:[%s1899_s0 + $0x44] sm:$0xf] }
   0xd   :  { %v970_v47 = vor.u32 %v1137_v45, %v969_v44  ;;  %v891_v49 = vld [vmem:[%s1899_s0 + $0x48] sm:$0xf0]  ;;  %v1142_v51 = vld [vmem:[%s1899_s0 + $0x114] sm:$0xf]  ;;  %v995_v52 = vld [vmem:[%s1899_s0 + $0x118] sm:$0xf0] }
   0xe   :  { %441 = vmatpush.bf16.msra.mxu0 %v1160_v7  ;;  %v894_v50 = vor.u32 %v1116_v48, %v891_v49  ;;  %v998_v53 = vor.u32 %v1142_v51, %v995_v52  ;;  %v881_v54 = vld [vmem:[%s1899_s0 + $0x30] sm:$0xf]  ;;  %v1115_v55 = vld [vmem:[%s1899_s0 + $0x34] sm:$0xf0]  ;;  %v1118_v60 = vld [vmem:[%s1899_s0 + $0x54] sm:$0xf] }
   0xf   :  { %1311 = vmatpush.bf16.msra.mxu2 %v1160_v7  ;;  %v977_v56 = vld [vmem:[%s1899_s0 + $0xf0] sm:$0xf]  ;;  %v1139_v57 = vld [vmem:[%s1899_s0 + $0xf4] sm:$0xf0]  ;;  %v882_v58 = vor.u32 %v1115_v55, %v881_v54  ;;  %v899_v61 = vld [vmem:[%s1899_s0 + $0x58] sm:$0xf0] }
  0x10   :  { %v978_v59 = vor.u32 %v1139_v57, %v977_v56  ;;  %v902_v62 = vor.u32 %v1118_v60, %v899_v61  ;;  %v1144_v63 = vld [vmem:[%s1899_s0 + $0x124] sm:$0xf]  ;;  %v1003_v0 = vld [vmem:[%s1899_s0 + $0x128] sm:$0xf0]  ;;  %v889_v2 = vld [vmem:[%s1899_s0 + $0x40] sm:$0xf] }
  0x11   :  { %v1006_v1 = vor.u32 %v1144_v63, %v1003_v0  ;;  %v1117_v3 = vld [vmem:[%s1899_s0 + $0x44] sm:$0xf0]  ;;  %v985_v4 = vld [vmem:[%s1899_s0 + $0x100] sm:$0xf]  ;;  %v907_v9 = vld [vmem:[%s1899_s0 + $0x68] sm:$0xf0] }
  0x12   :  { %442 = vmatpush.bf16.msra.mxu0 %v1159_v8  ;;  %v1141_v5 = vld [vmem:[%s1899_s0 + $0x104] sm:$0xf0]  ;;  %v890_v6 = vor.u32 %v1117_v3, %v889_v2  ;;  %v897_v14 = vld [vmem:[%s1899_s0 + $0x50] sm:$0xf]  ;;  %v1119_v15 = vld [vmem:[%s1899_s0 + $0x54] sm:$0xf0] }
  0x13   :  { %1312 = vmatpush.bf16.msra.mxu2 %v1159_v8  ;;  %v986_v7 = vor.u32 %v1141_v5, %v985_v4  ;;  %v1120_v8 = vld [vmem:[%s1899_s0 + $0x64] sm:$0xf]  ;;  %v993_v16 = vld [vmem:[%s1899_s0 + $0x110] sm:$0xf]  ;;  %v898_v18 = vor.u32 %v1119_v15, %v897_v14  ;;  %v1122_v20 = vld [vmem:[%s1899_s0 + $0x74] sm:$0xf] }
  0x14   :  { %v910_v10 = vor.u32 %v1120_v8, %v907_v9  ;;  %v915_v21 = vld [vmem:[%s1899_s0 + $0x78] sm:$0xf0]  ;;  %v1019_v24 = vld [vmem:[%s1899_s0 + $0x148] sm:$0xf0]  ;;  %v1121_v27 = vld [vmem:[%s1899_s0 + $0x64] sm:$0xf0] }
  0x15   :  { %v1001_v28 = vld [vmem:[%s1899_s0 + $0x120] sm:$0xf]  ;;  %v1124_v32 = vld [vmem:[%s1899_s0 + $0x84] sm:$0xf]  ;;  %v923_v33 = vld [vmem:[%s1899_s0 + $0x88] sm:$0xf0] }
  0x16   :  { %1084 = vmatmul.msk.bf16.gmra.mxu1 %vm362_vm0, %v870_v11  ;;  %443 = vmatpush.bf16.msra.mxu0 %v1158_v12  ;;  %v1146_v11 = vld [vmem:[%s1899_s0 + $0x134] sm:$0xf]  ;;  %v1027_v37 = vld [vmem:[%s1899_s0 + $0x158] sm:$0xf0]  ;;  %v913_v39 = vld [vmem:[%s1899_s0 + $0x70] sm:$0xf] }
  0x17   :  { %1313 = vmatpush.bf16.msra.mxu2 %v1158_v12  ;;  %v1011_v12 = vld [vmem:[%s1899_s0 + $0x138] sm:$0xf0]  ;;  %v1150_v36 = vld [vmem:[%s1899_s0 + $0x154] sm:$0xf]  ;;  %v1123_v40 = vld [vmem:[%s1899_s0 + $0x74] sm:$0xf0] }
  0x18   :  { %1098 = vmatmul.msk.bf16.gmra.mxu3 %vm362_vm0, %v982_v29  ;;  %v1145_v29 = vld [vmem:[%s1899_s0 + $0x124] sm:$0xf0]  ;;  %v1009_v42 = vld [vmem:[%s1899_s0 + $0x130] sm:$0xf]  ;;  %v1147_v43 = vld [vmem:[%s1899_s0 + $0x134] sm:$0xf0]  ;;  %v914_v44 = vor.u32 %v1123_v40, %v913_v39 }
  0x19   :  { %v1002_v31 = vor.u32 %v1145_v29, %v1001_v28  ;;  %v1010_v45 = vor.u32 %v1147_v43, %v1009_v42  ;;  %v1035_v51 = vld [vmem:[%s1899_s0 + $0x168] sm:$0xf0]  ;;  %v1125_v54 = vld [vmem:[%s1899_s0 + $0x84] sm:$0xf0]  ;;  %v1017_v56 = vld [vmem:[%s1899_s0 + $0x140] sm:$0xf] }
  0x1a   :  { %444 = vmatpush.bf16.msra.mxu0 %v1157_v13  ;;  %v1149_v57 = vld [vmem:[%s1899_s0 + $0x144] sm:$0xf0]  ;;  %v1128_v63 = vld [vmem:[%s1899_s0 + $0xa4] sm:$0xf]  ;;  %v939_v0 = vld [vmem:[%s1899_s0 + $0xa8] sm:$0xf0] }
  0x1b   :  { %1314 = vmatpush.bf16.msra.mxu2 %v1157_v13  ;;  %v1014_v13 = vor.u32 %v1146_v11, %v1011_v12  ;;  %v1018_v60 = vor.u32 %v1149_v57, %v1017_v56  ;;  %v1154_v9 = vld [vmem:[%s1899_s0 + $0x174] sm:$0xf]  ;;  %v1127_v14 = vld [vmem:[%s1899_s0 + $0x94] sm:$0xf0]  ;;  %v937_v40 = vld [vmem:[%s1899_s0 + $0xa0] sm:$0xf] }
  0x1e   :  { %445 = vmatpush.bf16.msra.mxu0 %v1156_v17 }
  0x1f   :  { %1315 = vmatpush.bf16.msra.mxu2 %v1156_v17  ;;  %v1143_v17 = vld [vmem:[%s1899_s0 + $0x114] sm:$0xf0] }
  0x20   :  { %v994_v19 = vor.u32 %v1143_v17, %v993_v16 }
  0x21   :  { %446 = vmatmul.bf16.vlgmr.msra.gmra.mxu0 %v858_v22  ;;  %v918_v22 = vor.u32 %v1122_v20, %v915_v21 }
  0x22   :  { %506 = vmatmul.bf16.vlgmr.msra.gmra.mxu2 %v954_v23  ;;  %v1148_v23 = vld [vmem:[%s1899_s0 + $0x144] sm:$0xf] }
  0x23   :  { %v1022_v25 = vor.u32 %v1148_v23, %v1019_v24 }
  0x26   :  { %1085 = vmatmul.msk.bf16.gmra.mxu1 %vm362_vm0, %v878_v26  ;;  %v905_v26 = vld [vmem:[%s1899_s0 + $0x60] sm:$0xf] }
  0x27   :  { %v906_v30 = vor.u32 %v1121_v27, %v905_v26  ;;  %v1130_v26 = vld [vmem:[%s1899_s0 + $0xb4] sm:$0xf]  ;;  %v947_v27 = vld [vmem:[%s1899_s0 + $0xb8] sm:$0xf0] }
  0x28   :  { %1099 = vmatmul.msk.bf16.gmra.mxu3 %vm362_vm0, %v990_v41  ;;  %v950_v28 = vor.u32 %v1130_v26, %v947_v27 }
  0x31   :  { %451 = vmatmul.bf16.gmra.mxu0 %v866_v34  ;;  %v926_v34 = vor.u32 %v1124_v32, %v923_v33 }
  0x32   :  { %511 = vmatmul.bf16.gmra.mxu2 %v962_v35 }
  0x36   :  { %1086 = vmatmul.msk.bf16.gmra.mxu1 %vm362_vm0, %v886_v38  ;;  %v1030_v38 = vor.u32 %v1150_v36, %v1027_v37 }
  0x38   :  { %1100 = vmatmul.msk.bf16.gmra.mxu3 %vm362_vm0, %v998_v53  ;;  %v921_v53 = vld [vmem:[%s1899_s0 + $0x80] sm:$0xf] }
  0x41   :  { %456 = vmatmul.bf16.gmra.mxu0 %v874_v46  ;;  %v1126_v46 = vld [vmem:[%s1899_s0 + $0x94] sm:$0xf] }
  0x42   :  { %516 = vmatmul.bf16.gmra.mxu2 %v970_v47  ;;  %v931_v47 = vld [vmem:[%s1899_s0 + $0x98] sm:$0xf0] }
  0x43   :  { %v934_v48 = vor.u32 %v1126_v46, %v931_v47  ;;  %v1153_v46 = vld [vmem:[%s1899_s0 + $0x164] sm:$0xf0] }
  0x46   :  { %1087 = vmatmul.msk.bf16.gmra.mxu1 %vm362_vm0, %v894_v50  ;;  %v1152_v50 = vld [vmem:[%s1899_s0 + $0x164] sm:$0xf] }
  0x47   :  { %v1038_v52 = vor.u32 %v1152_v50, %v1035_v51 }
  0x48   :  { %1101 = vmatmul.msk.bf16.gmra.mxu3 %vm362_vm0, %v1006_v1  ;;  %v942_v1 = vor.u32 %v1128_v63, %v939_v0 }
  0x51   :  { %461 = vmatmul.bf16.gmra.mxu0 %v882_v58  ;;  %v922_v58 = vor.u32 %v1125_v54, %v921_v53  ;;  %v1132_v53 = vld [vmem:[%s1899_s0 + $0xc4] sm:$0xf]  ;;  %v955_v54 = vld [vmem:[%s1899_s0 + $0xc8] sm:$0xf0] }
  0x52   :  { %521 = vmatmul.bf16.gmra.mxu2 %v978_v59 }
  0x56   :  { %1088 = vmatmul.msk.bf16.gmra.mxu1 %vm362_vm0, %v902_v62  ;;  %v1611_v62 = vld [vmem:[%s1900_s2] ss:$0 sm:$0xff] }
  0x58   :  { %1102 = vmatmul.msk.bf16.gmra.mxu3 %vm362_vm0, %v1014_v13  ;;  %v929_v13 = vld [vmem:[%s1899_s0 + $0x90] sm:$0xf] }
  0x61   :  { %466 = vmatmul.bf16.gmra.mxu0 %v890_v6 }
  0x62   :  { %526 = vmatmul.bf16.gmra.mxu2 %v986_v7 }
  0x66   :  { %1089 = vmatmul.msk.bf16.gmra.mxu1 %vm362_vm0, %v910_v10  ;;  %v1043_v10 = vld [vmem:[%s1899_s0 + $0x178] sm:$0xf0] }
  0x67   :  { %v1046_v12 = vor.u32 %v1154_v9, %v1043_v10 }
  0x68   :  { %1103 = vmatmul.msk.bf16.gmra.mxu3 %vm362_vm0, %v1022_v25 }
  0x71   :  { %471 = vmatmul.bf16.gmra.mxu0 %v898_v18  ;;  %v1025_v18 = vld [vmem:[%s1899_s0 + $0x150] sm:$0xf] }
  0x72   :  { %531 = vmatmul.bf16.gmra.mxu2 %v994_v19  ;;  %v1151_v19 = vld [vmem:[%s1899_s0 + $0x154] sm:$0xf0] }
  0x73   :  { %v1026_v24 = vor.u32 %v1151_v19, %v1025_v18 }
  0x76   :  { %1090 = vmatmul.msk.bf16.gmra.mxu1 %vm362_vm0, %v918_v22  ;;  %v930_v22 = vor.u32 %v1127_v14, %v929_v13 }
  0x78   :  { %1104 = vmatmul.msk.bf16.gmra.mxu3 %vm362_vm0, %v1030_v38 }
  0x81   :  { %476 = vmatmul.bf16.gmra.mxu0 %v906_v30 }
  0x82   :  { %536 = vmatmul.bf16.gmra.mxu2 %v1002_v31 }
  0x83   :  { %v580_v35 = vpop.f32.mrf.mxu1 }
  0x86   :  { %1091 = vmatmul.msk.bf16.gmra.mxu1 %vm362_vm0, %v926_v34  ;;  %v1671_v34 = vld [vmem:[%s1899_s0 + $0x180] sm:$0xff] }
  0x87   :  { %v232_v37 = vunpack.c.h.b16 %v1671_v34 }
  0x88   :  { %1105 = vmatmul.msk.bf16.gmra.mxu3 %vm362_vm0, %v1038_v52 }
  0x89   :  { %v282_v39 = vpack.c.b16 %v232_v37, %v232_v37 }
  0x8b   :  { %v582_v41 = vpop.f32.mrf.mxu1  ;;  %v1606_v61 = vpop.f32.mrf.mxu3 }
  0x91   :  { %481 = vmatmul.bf16.gmra.mxu0 %v914_v44 }
  0x92   :  { %541 = vmatmul.bf16.gmra.mxu2 %v1010_v45  ;;  %v1033_v45 = vld [vmem:[%s1899_s0 + $0x160] sm:$0xf] }
  0x93   :  { %v585_v49 = vpop.f32.mrf.mxu1  ;;  %v1625_v6 = vpop.f32.mrf.mxu3  ;;  %v1034_v51 = vor.u32 %v1153_v46, %v1033_v45 }
  0x96   :  { %1092 = vmatmul.msk.bf16.gmra.mxu1 %vm362_vm0, %v934_v48 }
  0x98   :  { %1106 = vmatmul.msk.bf16.gmra.mxu3 %vm362_vm0, %v1046_v12 }
  0x9b   :  { %v587_v55 = vpop.f32.mrf.mxu1  ;;  %v1649_v25 = vpop.f32.mrf.mxu3 }
  0x9e   :  { %v447_v59 = vpop.f32.mrf.mxu0 }
  0x9f   :  { %v448_v2 = vadd.f32 %v1611_v62, %v447_v59 }
  0xa1   :  { %486 = vmatmul.bf16.gmra.mxu0 %v922_v58  ;;  %v581_v7 = vadd.f32 %v580_v35, %v448_v2 }
  0xa2   :  { %546 = vmatmul.bf16.gmra.mxu2 %v1018_v60 }
  0xa3   :  { %v1620_v3 = vpop.f32.mrf.mxu1  ;;  %v704_v15 = vmax.f32 %v581_v7, 0.0  ;;  %v1666_v33 = vpop.f32.mrf.mxu3  ;;  %v1131_v7 = vld [vmem:[%s1899_s0 + $0xb4] sm:$0xf0] }
  0xa5   :  { %v1622_v4 = vpop.f32.mrf.mxu2 }
  0xa6   :  { %1093 = vmatmul.msk.bf16.gmra.mxu1 %vm362_vm0, %v942_v1  ;;  %v449_v5 = vpop.f32.mrf.mxu0 }
  0xa7   :  { %v450_v8 = vadd.f32 %v1611_v62, %v449_v5  ;;  %v945_v5 = vld [vmem:[%s1899_s0 + $0xb0] sm:$0xf] }
  0xa8   :  { %1107 = vmatmul.msk.bf16.gmra.mxu3 %vm362_vm0, %v282_v39  ;;  %v946_v14 = vor.u32 %v1131_v7, %v945_v5 }
  0xa9   :  { %v583_v11 = vadd.f32 %v582_v41, %v450_v8  ;;  %v1129_v41 = vld [vmem:[%s1899_s0 + $0xa4] sm:$0xf0] }
  0xab   :  { %v705_v16 = vmax.f32 %v583_v11, 0.0  ;;  %v592_v17 = vpop.f32.mrf.mxu1  ;;  %v1690_v52 = vpop.f32.mrf.mxu3  ;;  %v1155_v11 = vld [vmem:[%s1899_s0 + $0x174] sm:$0xf0] }
  0xad   :  { %v1168_v20 = vpack.c.bf16 %v705_v16, %v704_v15  ;;  %v1647_v21 = vpop.f32.mrf.mxu2 }
  0xae   :  { %v452_v23 = vpop.f32.mrf.mxu0 }
  0xaf   :  { %1169 = vst [vmem:[%s1901_s3] sm:$0xff] %v1168_v20   ;;  %v453_v29 = vadd.f32 %v1611_v62, %v452_v23  ;;  %v1134_v20 = vld [vmem:[%s1899_s0 + $0xd4] sm:$0xf] }
  0xb1   :  { %491 = vmatmul.bf16.gmra.mxu0 %v930_v22  ;;  %v586_v35 = vadd.f32 %v585_v49, %v453_v29  ;;  %v938_v49 = vor.u32 %v1129_v41, %v937_v40  ;;  %v963_v22 = vld [vmem:[%s1899_s0 + $0xd8] sm:$0xf0]  ;;  %v231_v40 = vunpack.c.l.b16 %v1671_v34 }
  0xb2   :  { %551 = vmatmul.bf16.gmra.mxu2 %v1026_v24  ;;  %v966_v26 = vor.u32 %v1134_v20, %v963_v22 }
  0xb3   :  { %v1661_v30 = vpop.f32.mrf.mxu1  ;;  %v706_v42 = vmax.f32 %v586_v35, 0.0  ;;  %v1705_v60 = vpop.f32.mrf.mxu3 }
  0xb5   :  { %v1663_v31 = vpop.f32.mrf.mxu2 }
  0xb6   :  { %1094 = vmatmul.msk.bf16.gmra.mxu1 %vm362_vm0, %v950_v28  ;;  %v454_v32 = vpop.f32.mrf.mxu0 }
  0xb7   :  { %v455_v36 = vadd.f32 %v1611_v62, %v454_v32 }
  0xb9   :  { %v588_v38 = vadd.f32 %v587_v55, %v455_v36  ;;  %v958_v55 = vor.u32 %v1132_v53, %v955_v54 }
  0xbb   :  { %v707_v43 = vmax.f32 %v588_v38, 0.0  ;;  %v597_v44 = vpop.f32.mrf.mxu1  ;;  %v1724_v19 = vpop.f32.mrf.mxu3 }
  0xbd   :  { %v1173_v47 = vpack.c.bf16 %v707_v43, %v706_v42  ;;  %v1688_v48 = vpop.f32.mrf.mxu2 }
  0xbe   :  { %v457_v50 = vpop.f32.mrf.mxu0 }
  0xbf   :  { %1285 = vst [vmem:[%s1901_s3 + $0x8] sm:$0xff] %v1173_v47   ;;  %v458_v56 = vadd.f32 %v1611_v62, %v457_v50 }
  0xc1   :  { %496 = vmatmul.bf16.gmra.mxu0 %v938_v49  ;;  %v591_v63 = vadd.f32 %v1620_v3, %v458_v56  ;;  %v1041_v3 = vld [vmem:[%s1899_s0 + $0x170] sm:$0xf] }
  0xc2   :  { %556 = vmatmul.bf16.gmra.mxu2 %v1034_v51  ;;  %v1042_v18 = vor.u32 %v1155_v11, %v1041_v3  ;;  %v281_v51 = vpack.c.b16 %v231_v40, %v231_v40 }
  0xc3   :  { %v1702_v57 = vpop.f32.mrf.mxu1  ;;  %v708_v8 = vmax.f32 %v591_v63, 0.0  ;;  %v1741_v36 = vpop.f32.mrf.mxu3 }
  0xc5   :  { %v517_v58 = vpop.f32.mrf.mxu2 }
  0xc6   :  { %1095 = vmatmul.msk.bf16.gmra.mxu1 %vm362_vm0, %v958_v55  ;;  %v459_v59 = vpop.f32.mrf.mxu0  ;;  %v518_v2 = vadd.f32 %v1611_v62, %v517_v58 }
  0xc7   :  { %v460_v0 = vadd.f32 %v1611_v62, %v459_v59 }
  0xc8   :  { %v651_v15 = vadd.f32 %v1606_v61, %v518_v2 }
  0xc9   :  { %v593_v1 = vadd.f32 %v592_v17, %v460_v0 }
  0xca   :  { %v732_v23 = vmax.f32 %v651_v15, 0.0 }
  0xcb   :  { %v709_v9 = vmax.f32 %v593_v1, 0.0  ;;  %v602_v10 = vpop.f32.mrf.mxu1  ;;  %v1749_v53 = vpop.f32.mrf.mxu3 }
  0xcd   :  { %v1178_v12 = vpack.c.bf16 %v709_v9, %v708_v8  ;;  %v519_v13 = vpop.f32.mrf.mxu2 }
  0xce   :  { %v520_v16 = vadd.f32 %v1611_v62, %v519_v13  ;;  %v462_v17 = vpop.f32.mrf.mxu0 }
  0xcf   :  { %1286 = vst [vmem:[%s1901_s3 + $0x10] sm:$0xff] %v1178_v12   ;;  %v463_v27 = vadd.f32 %v1611_v62, %v462_v17 }
  0xd0   :  { %v653_v61 = vadd.f32 %v1625_v6, %v520_v16 }
  0xd1   :  { %501 = vmatmul.bf16.gmra.mxu0 %v946_v14  ;;  %v596_v6 = vadd.f32 %v1661_v30, %v463_v27 }
  0xd2   :  { %v733_v24 = vmax.f32 %v653_v61, 0.0  ;;  %561 = vmatmul.bf16.gmra.mxu2 %v1042_v18 }
  0xd3   :  { %v605_v28 = vpop.f32.mrf.mxu1  ;;  %v710_v41 = vmax.f32 %v596_v6, 0.0  ;;  %v1759_v59 = vpop.f32.mrf.mxu3 }
  0xd4   :  { %v1238_v29 = vpack.c.bf16 %v733_v24, %v732_v23 }
  0xd5   :  { %v522_v32 = vpop.f32.mrf.mxu2 }
  0xd6   :  { %1298 = vst [vmem:[%s1901_s3 + $0x70] sm:$0xff] %v1238_v29   ;;  %1096 = vmatmul.msk.bf16.gmra.mxu1 %vm362_vm0, %v966_v26  ;;  %v464_v35 = vpop.f32.mrf.mxu0  ;;  %v523_v39 = vadd.f32 %v1611_v62, %v522_v32 }
  0xd7   :  { %v465_v37 = vadd.f32 %v1611_v62, %v464_v35 }
  0xd8   :  { %v656_v47 = vadd.f32 %v1649_v25, %v523_v39 }
  0xd9   :  { %v598_v38 = vadd.f32 %v597_v44, %v465_v37 }
  0xda   :  { %v734_v34 = vmax.f32 %v656_v47, 0.0 }
  0xdb   :  { %v711_v42 = vmax.f32 %v598_v38, 0.0  ;;  %v607_v43 = vpop.f32.mrf.mxu1  ;;  %v1766_v13 = vpop.f32.mrf.mxu3 }
  0xdd   :  { %v1183_v45 = vpack.c.bf16 %v711_v42, %v710_v41  ;;  %v524_v46 = vpop.f32.mrf.mxu2 }
  0xde   :  { %v525_v49 = vadd.f32 %v1611_v62, %v524_v46  ;;  %v467_v50 = vpop.f32.mrf.mxu0 }
  0xdf   :  { %1287 = vst [vmem:[%s1901_s3 + $0x18] sm:$0xff] %v1183_v45   ;;  %v468_v54 = vadd.f32 %v1611_v62, %v467_v50 }
  0xe0   :  { %v658_v30 = vadd.f32 %v1666_v33, %v525_v49 }
  0xe1   :  { %v601_v63 = vadd.f32 %v1702_v57, %v468_v54 }
  0xe2   :  { %v735_v44 = vmax.f32 %v658_v30, 0.0  ;;  %566 = vmatmul.bf16.gmra.mxu2 %v281_v51 }
  0xe3   :  { %v610_v55 = vpop.f32.mrf.mxu1  ;;  %v712_v2 = vmax.f32 %v601_v63, 0.0  ;;  %v1776_v20 = vpop.f32.mrf.mxu3 }
  0xe4   :  { %v1243_v56 = vpack.c.bf16 %v735_v44, %v734_v34 }
  0xe5   :  { %v527_v25 = vpop.f32.mrf.mxu2 }
  0xe6   :  { %1299 = vst [vmem:[%s1901_s3 + $0x78] sm:$0xff] %v1243_v56   ;;  %v469_v58 = vpop.f32.mrf.mxu0  ;;  %v528_v1 = vadd.f32 %v1611_v62, %v527_v25 }
  0xe7   :  { %v470_v0 = vadd.f32 %v1611_v62, %v469_v58 }
  0xe8   :  { %v661_v3 = vadd.f32 %v1690_v52, %v528_v1 }
  0xe9   :  { %v603_v33 = vadd.f32 %v602_v10, %v470_v0 }
  0xea   :  { %v736_v10 = vmax.f32 %v661_v3, 0.0 }
  0xeb   :  { %v713_v5 = vmax.f32 %v603_v33, 0.0  ;;  %v612_v7 = vpop.f32.mrf.mxu1  ;;  %v1782_v38 = vpop.f32.mrf.mxu3 }
  0xed   :  { %v1188_v8 = vpack.c.bf16 %v713_v5, %v712_v2  ;;  %v529_v9 = vpop.f32.mrf.mxu2 }
  0xee   :  { %v530_v11 = vadd.f32 %v1611_v62, %v529_v9  ;;  %v472_v12 = vpop.f32.mrf.mxu0 }
  0xef   :  { %1288 = vst [vmem:[%s1901_s3 + $0x20] sm:$0xff] %v1188_v8   ;;  %v473_v15 = vadd.f32 %v1611_v62, %v472_v12 }
  0xf0   :  { %v663_v57 = vadd.f32 %v1705_v60, %v530_v11 }
  0xf1   :  { %v606_v22 = vadd.f32 %v605_v28, %v473_v15 }
  0xf2   :  { %v737_v14 = vmax.f32 %v663_v57, 0.0 }
  0xf3   :  { %v615_v16 = vpop.f32.mrf.mxu1  ;;  %v714_v24 = vmax.f32 %v606_v22, 0.0  ;;  %v1792_v46 = vpop.f32.mrf.mxu3 }
  0xf4   :  { %v1248_v17 = vpack.c.bf16 %v737_v14, %v736_v10 }
  0xf5   :  { %v532_v18 = vpop.f32.mrf.mxu2 }
  0xf6   :  { %1300 = vst [vmem:[%s1901_s3 + $0x80] sm:$0xff] %v1248_v17   ;;  %v474_v52 = vpop.f32.mrf.mxu0  ;;  %v533_v60 = vadd.f32 %v1611_v62, %v532_v18 }
  0xf7   :  { %v475_v61 = vadd.f32 %v1611_v62, %v474_v52 }
  0xf8   :  { %v666_v35 = vadd.f32 %v1724_v19, %v533_v60 }
  0xf9   :  { %v608_v23 = vadd.f32 %v607_v43, %v475_v61 }
  0xfa   :  { %v738_v39 = vmax.f32 %v666_v35, 0.0 }
  0xfb   :  { %v715_v26 = vmax.f32 %v608_v23, 0.0  ;;  %v617_v27 = vpop.f32.mrf.mxu1  ;;  %v1798_v63 = vpop.f32.mrf.mxu3 }
  0xfd   :  { %v1193_v29 = vpack.c.bf16 %v715_v26, %v714_v24  ;;  %v534_v32 = vpop.f32.mrf.mxu2 }
  0xfe   :  { %v535_v6 = vadd.f32 %v1611_v62, %v534_v32  ;;  %v477_v37 = vpop.f32.mrf.mxu0 }
  0xff   :  { %1289 = vst [vmem:[%s1901_s3 + $0x28] sm:$0xff] %v1193_v29   ;;  %v478_v41 = vadd.f32 %v1611_v62, %v477_v37 }
 0x100   :  { %v668_v28 = vadd.f32 %v1741_v36, %v535_v6 }
 0x101   :  { %v611_v47 = vadd.f32 %v610_v55, %v478_v41 }
 0x102   :  { %v739_v40 = vmax.f32 %v668_v28, 0.0 }
 0x103   :  { %v620_v42 = vpop.f32.mrf.mxu1  ;;  %v716_v51 = vmax.f32 %v611_v47, 0.0  ;;  %v1808_v8 = vpop.f32.mrf.mxu3 }
 0x104   :  { %v1253_v43 = vpack.c.bf16 %v739_v40, %v738_v39 }
 0x105   :  { %v537_v45 = vpop.f32.mrf.mxu2 }
 0x106   :  { %1301 = vst [vmem:[%s1901_s3 + $0x88] sm:$0xff] %v1253_v43   ;;  %v479_v19 = vpop.f32.mrf.mxu0  ;;  %v538_v36 = vadd.f32 %v1611_v62, %v537_v45 }
 0x107   :  { %v480_v49 = vadd.f32 %v1611_v62, %v479_v19 }
 0x108   :  { %v671_v56 = vadd.f32 %v1749_v53, %v538_v36 }
 0x109   :  { %v613_v50 = vadd.f32 %v612_v7, %v480_v49 }
 0x10a   :  { %v740_v0 = vmax.f32 %v671_v56, 0.0 }
 0x10b   :  { %v717_v30 = vmax.f32 %v613_v50, 0.0  ;;  %v622_v34 = vpop.f32.mrf.mxu1  ;;  %v1814_v22 = vpop.f32.mrf.mxu3 }
 0x10d   :  { %v1198_v44 = vpack.c.bf16 %v717_v30, %v716_v51  ;;  %v539_v54 = vpop.f32.mrf.mxu2 }
 0x10e   :  { %v540_v25 = vadd.f32 %v1611_v62, %v539_v54  ;;  %v482_v58 = vpop.f32.mrf.mxu0 }
 0x10f   :  { %1290 = vst [vmem:[%s1901_s3 + $0x30] sm:$0xff] %v1198_v44   ;;  %v483_v1 = vadd.f32 %v1611_v62, %v482_v58 }
 0x110   :  { %v673_v55 = vadd.f32 %v1759_v59, %v540_v25 }
 0x111   :  { %v616_v9 = vadd.f32 %v615_v16, %v483_v1 }
 0x112   :  { %v741_v33 = vmax.f32 %v673_v55, 0.0 }
 0x113   :  { %v625_v2 = vpop.f32.mrf.mxu1  ;;  %v718_v12 = vmax.f32 %v616_v9, 0.0  ;;  %v1824_v29 = vpop.f32.mrf.mxu3 }
 0x114   :  { %v1258_v5 = vpack.c.bf16 %v741_v33, %v740_v0 }
 0x115   :  { %v542_v7 = vpop.f32.mrf.mxu2 }
 0x116   :  { %1302 = vst [vmem:[%s1901_s3 + $0x90] sm:$0xff] %v1258_v5   ;;  %v484_v53 = vpop.f32.mrf.mxu0  ;;  %v543_v59 = vadd.f32 %v1611_v62, %v542_v7 }
 0x117   :  { %v485_v3 = vadd.f32 %v1611_v62, %v484_v53 }
 0x118   :  { %v676_v17 = vadd.f32 %v1766_v13, %v543_v59 }
 0x119   :  { %v618_v11 = vadd.f32 %v617_v27, %v485_v3 }
 0x11a   :  { %v742_v61 = vmax.f32 %v676_v17, 0.0 }
 0x11b   :  { %v719_v57 = vmax.f32 %v618_v11, 0.0  ;;  %v627_v10 = vpop.f32.mrf.mxu1  ;;  %v1830_v47 = vpop.f32.mrf.mxu3 }
 0x11d   :  { %v1203_v14 = vpack.c.bf16 %v719_v57, %v718_v12  ;;  %v544_v15 = vpop.f32.mrf.mxu2 }
 0x11e   :  { %v545_v18 = vadd.f32 %v1611_v62, %v544_v15  ;;  %v487_v52 = vpop.f32.mrf.mxu0 }
 0x11f   :  { %1291 = vst [vmem:[%s1901_s3 + $0x38] sm:$0xff] %v1203_v14   ;;  %v488_v60 = vadd.f32 %v1611_v62, %v487_v52  ;;  %v510_v52 = vadd.f32 %v1611_v62, %v1647_v21 }
 0x120   :  { %v678_v16 = vadd.f32 %v1776_v20, %v545_v18  ;;  %v508_v18 = vadd.f32 %v1611_v62, %v1622_v4 }
 0x121   :  { %v621_v32 = vadd.f32 %v620_v42, %v488_v60 }
 0x122   :  { %v743_v23 = vmax.f32 %v678_v16, 0.0 }
 0x123   :  { %v630_v24 = vpop.f32.mrf.mxu1  ;;  %v720_v37 = vmax.f32 %v621_v32, 0.0  ;;  %v1840_v44 = vpop.f32.mrf.mxu3 }
 0x124   :  { %v1263_v26 = vpack.c.bf16 %v743_v23, %v742_v61 }
 0x125   :  { %v547_v27 = vpop.f32.mrf.mxu2 }
 0x126   :  { %1303 = vst [vmem:[%s1901_s3 + $0x98] sm:$0xff] %v1263_v26   ;;  %v489_v13 = vpop.f32.mrf.mxu0  ;;  %v548_v20 = vadd.f32 %v1611_v62, %v547_v27 }
 0x127   :  { %v490_v35 = vadd.f32 %v1611_v62, %v489_v13 }
 0x128   :  { %v681_v43 = vadd.f32 %v1782_v38, %v548_v20 }
 0x129   :  { %v623_v6 = vadd.f32 %v622_v34, %v490_v35 }
 0x12a   :  { %v744_v49 = vmax.f32 %v681_v43, 0.0 }
 0x12b   :  { %v721_v28 = vmax.f32 %v623_v6, 0.0  ;;  %v632_v39 = vpop.f32.mrf.mxu1  ;;  %v1846_v9 = vpop.f32.mrf.mxu3 }
 0x12d   :  { %v1208_v40 = vpack.c.bf16 %v721_v28, %v720_v37  ;;  %v549_v41 = vpop.f32.mrf.mxu2 }
 0x12e   :  { %v550_v45 = vadd.f32 %v1611_v62, %v549_v41  ;;  %v492_v19 = vpop.f32.mrf.mxu0 }
 0x12f   :  { %1292 = vst [vmem:[%s1901_s3 + $0x40] sm:$0xff] %v1208_v40   ;;  %v493_v36 = vadd.f32 %v1611_v62, %v492_v19 }
 0x130   :  { %v683_v42 = vadd.f32 %v1792_v46, %v550_v45 }
 0x131   :  { %v626_v54 = vadd.f32 %v625_v2, %v493_v36 }
 0x132   :  { %v745_v50 = vmax.f32 %v683_v42, 0.0 }
 0x133   :  { %v635_v51 = vpop.f32.mrf.mxu1  ;;  %v722_v58 = vmax.f32 %v626_v54, 0.0  ;;  %v702_v14 = vpop.f32.mrf.mxu3 }
 0x134   :  { %v1268_v30 = vpack.c.bf16 %v745_v50, %v744_v49  ;;  %v515_v50 = vadd.f32 %v1611_v62, %v1688_v48 }
 0x135   :  { %v552_v34 = vpop.f32.mrf.mxu2 }
 0x136   :  { %1304 = vst [vmem:[%s1901_s3 + $0xa0] sm:$0xff] %v1268_v30   ;;  %v494_v38 = vpop.f32.mrf.mxu0  ;;  %v553_v46 = vadd.f32 %v1611_v62, %v552_v34 }
 0x137   :  { %v495_v56 = vadd.f32 %v1611_v62, %v494_v38 }
 0x138   :  { %v686_v5 = vadd.f32 %v1798_v63, %v553_v46 }
 0x139   :  { %v628_v25 = vadd.f32 %v627_v10, %v495_v56 }
 0x13a   :  { %v746_v3 = vmax.f32 %v686_v5, 0.0 }
 0x13b   :  { %v723_v55 = vmax.f32 %v628_v25, 0.0  ;;  %v637_v0 = vpop.f32.mrf.mxu1 }
 0x13d   :  { %v1213_v33 = vpack.c.bf16 %v723_v55, %v722_v58  ;;  %v554_v1 = vpop.f32.mrf.mxu2 }
 0x13e   :  { %v555_v7 = vadd.f32 %v1611_v62, %v554_v1  ;;  %v497_v53 = vpop.f32.mrf.mxu0 }
 0x13f   :  { %1293 = vst [vmem:[%s1901_s3 + $0x48] sm:$0xff] %v1213_v33   ;;  %v498_v59 = vadd.f32 %v1611_v62, %v497_v53 }
 0x140   :  { %v688_v2 = vadd.f32 %v1808_v8, %v555_v7 }
 0x141   :  { %v631_v15 = vadd.f32 %v630_v24, %v498_v59 }
 0x142   :  { %v747_v11 = vmax.f32 %v688_v2, 0.0 }
 0x143   :  { %v640_v12 = vpop.f32.mrf.mxu1  ;;  %v724_v23 = vmax.f32 %v631_v15, 0.0 }
 0x144   :  { %v1273_v57 = vpack.c.bf16 %v747_v11, %v746_v3  ;;  %v641_v16 = vadd.f32 %v640_v12, %v508_v18 }
 0x145   :  { %v557_v10 = vpop.f32.mrf.mxu2 }
 0x146   :  { %1305 = vst [vmem:[%s1901_s3 + $0xa8] sm:$0xff] %v1273_v57   ;;  %v499_v63 = vpop.f32.mrf.mxu0  ;;  %v558_v61 = vadd.f32 %v1611_v62, %v557_v10  ;;  %v728_v35 = vmax.f32 %v641_v16, 0.0 }
 0x147   :  { %v500_v17 = vadd.f32 %v1611_v62, %v499_v63 }
 0x148   :  { %v691_v24 = vadd.f32 %v1814_v22, %v558_v61 }
 0x149   :  { %v633_v8 = vadd.f32 %v632_v39, %v500_v17 }
 0x14a   :  { %v748_v28 = vmax.f32 %v691_v24, 0.0 }
 0x14b   :  { %v725_v60 = vmax.f32 %v633_v8, 0.0  ;;  %v642_v26 = vpop.f32.mrf.mxu1 }
 0x14c   :  { %v643_v27 = vadd.f32 %v642_v26, %v510_v52 }
 0x14d   :  { %v1218_v13 = vpack.c.bf16 %v725_v60, %v724_v23  ;;  %v559_v32 = vpop.f32.mrf.mxu2 }
 0x14e   :  { %v729_v6 = vmax.f32 %v643_v27, 0.0  ;;  %v560_v20 = vadd.f32 %v1611_v62, %v559_v32  ;;  %v502_v4 = vpop.f32.mrf.mxu0 }
 0x14f   :  { %1294 = vst [vmem:[%s1901_s3 + $0x50] sm:$0xff] %v1218_v13   ;;  %v503_v40 = vadd.f32 %v1611_v62, %v502_v4 }
 0x150   :  { %v1228_v21 = vpack.c.bf16 %v729_v6, %v728_v35  ;;  %v693_v37 = vadd.f32 %v1824_v29, %v560_v20  ;;  %v513_v29 = vadd.f32 %v1611_v62, %v1663_v31 }
 0x151   :  { %v636_v19 = vadd.f32 %v635_v51, %v503_v40 }
 0x152   :  { %1296 = vst [vmem:[%s1901_s3 + $0x60] sm:$0xff] %v1228_v21   ;;  %v749_v39 = vmax.f32 %v693_v37, 0.0 }
 0x153   :  { %v645_v22 = vpop.f32.mrf.mxu1  ;;  %v726_v34 = vmax.f32 %v636_v19, 0.0 }
 0x154   :  { %v1278_v41 = vpack.c.bf16 %v749_v39, %v748_v28  ;;  %v646_v36 = vadd.f32 %v645_v22, %v513_v29 }
 0x155   :  { %v562_v43 = vpop.f32.mrf.mxu2 }
 0x156   :  { %1306 = vst [vmem:[%s1901_s3 + $0xb0] sm:$0xff] %v1278_v41   ;;  %v504_v45 = vpop.f32.mrf.mxu0  ;;  %v563_v30 = vadd.f32 %v1611_v62, %v562_v43  ;;  %v730_v58 = vmax.f32 %v646_v36, 0.0 }
 0x157   :  { %v505_v42 = vadd.f32 %v1611_v62, %v504_v45 }
 0x158   :  { %v696_v51 = vadd.f32 %v1830_v47, %v563_v30 }
 0x159   :  { %v638_v49 = vadd.f32 %v637_v0, %v505_v42 }
 0x15a   :  { %v750_v0 = vmax.f32 %v696_v51, 0.0 }
 0x15b   :  { %v727_v38 = vmax.f32 %v638_v49, 0.0  ;;  %v647_v54 = vpop.f32.mrf.mxu1 }
 0x15c   :  { %v648_v56 = vadd.f32 %v647_v54, %v515_v50 }
 0x15d   :  { %v1223_v25 = vpack.c.bf16 %v727_v38, %v726_v34  ;;  %v564_v46 = vpop.f32.mrf.mxu2 }
 0x15e   :  { %v731_v55 = vmax.f32 %v648_v56, 0.0  ;;  %v565_v33 = vadd.f32 %v1611_v62, %v564_v46 }
 0x15f   :  { %1295 = vst [vmem:[%s1901_s3 + $0x58] sm:$0xff] %v1223_v25  }
 0x160   :  { %v1233_v31 = vpack.c.bf16 %v731_v55, %v730_v58  ;;  %v698_v48 = vadd.f32 %v1840_v44, %v565_v33 }
 0x162   :  { %1297 = vst [vmem:[%s1901_s3 + $0x68] sm:$0xff] %v1233_v31   ;;  %v751_v1 = vmax.f32 %v698_v48, 0.0 }
 0x164   :  { %v1283_v5 = vpack.c.bf16 %v751_v1, %v750_v0 }
 0x165   :  { %v567_v7 = vpop.f32.mrf.mxu2 }
 0x166   :  { %1307 = vst [vmem:[%s1901_s3 + $0xb8] sm:$0xff] %v1283_v5   ;;  %v568_v47 = vadd.f32 %v1611_v62, %v567_v7 }
 0x168   :  { %v701_v53 = vadd.f32 %v1846_v9, %v568_v47 }
 0x16a   :  { %v752_v2 = vmax.f32 %v701_v53, 0.0 }
 0x16c   :  { %v801_v3 = vpack.c.bf16 %v752_v2, %v752_v2 }
 0x16d   :  { %v569_v11 = vpop.f32.mrf.mxu2 }
 0x16e   :  { %850 = vst [vmem:[%s1901_s3 + $0xc0] sm:$0xf] %v801_v3 }

// kernel: autoencoder_forward.11
= control target key start
LH: loop header
LB: loop body
LE: loop exit
PB: predicated region body
PF: predicated region fallthrough
CT: control target
= control target key end

     0   :  { %vm1036_vm0 = vcmask 1043456   ;;  %vm741_vm1 = vcmask 588800   ;;  %s4654_s1 = inlined_call_operand.vmem [shape: bf16[72,128], index: 1, kind: input, shape index: {}]   ;;  %s4655_s2 = inlined_call_operand.vmem [shape: f32[1,128], index: 2, kind: input, shape index: {}]   ;;  %s4656_s0 = inlined_call_operand.vmem [shape: bf16[1568,72], index: 0, kind: input, shape index: {}]   ;;  %s4657_s3 = inlined_call_operand.vmem [shape: bf16[1568,128], index: 3, kind: output, shape index: {}]  }
   0x1   :  { %v219_v0 = vld [vmem:[%s4654_s1 + $0x20] sm:$0xf]  ;;  %v2738_v4 = vld [vmem:[%s4654_s1 + $0x18] sm:$0xff]  ;;  %v2737_v5 = vld [vmem:[%s4654_s1 + $0x10] sm:$0xff] }
   0x2   :  { %v731_v1 = vunpack.c.l.b16 %v219_v0  ;;  %v2736_v6 = vld [vmem:[%s4654_s1 + $0x8] sm:$0xff]  ;;  %v2735_v7 = vld [vmem:[%s4654_s1] sm:$0xff]  ;;  %v2711_v10 = vld [vmem:[%s4656_s0 + $0x250] sm:$0xff] }
   0x3   :  { %v2661_v8 = vld [vmem:[%s4656_s0 + $0xc0] sm:$0xff]  ;;  %v2686_v9 = vld [vmem:[%s4656_s0 + $0x188] sm:$0xff]  ;;  %v2687_v13 = vld [vmem:[%s4656_s0 + $0x190] sm:$0xff] }
   0x4   :  { %v736_v2 = vpack.c.b16 %v731_v1, %v731_v1  ;;  %v2637_v11 = vld [vmem:[%s4656_s0] sm:$0xff]  ;;  %v2662_v12 = vld [vmem:[%s4656_s0 + $0xc8] sm:$0xff]  ;;  %v2712_v14 = vld [vmem:[%s4656_s0 + $0x258] sm:$0xff] }
   0x5   :  { %v2638_v15 = vld [vmem:[%s4656_s0 + $0x8] sm:$0xff]  ;;  %v2663_v16 = vld [vmem:[%s4656_s0 + $0xd0] sm:$0xff]  ;;  %v2688_v17 = vld [vmem:[%s4656_s0 + $0x198] sm:$0xff] }
   0x6   :  { %v1038_v3 = vsel %vm1036_vm0, %v736_v2, 0  ;;  %v2713_v18 = vld [vmem:[%s4656_s0 + $0x260] sm:$0xff]  ;;  %v2639_v19 = vld [vmem:[%s4656_s0 + $0x10] sm:$0xff]  ;;  %v2664_v20 = vld [vmem:[%s4656_s0 + $0xd8] sm:$0xff] }
   0x7   :  { %3326 = vmatpush.bf16.msra.mxu1 %v1038_v3  ;;  %3327 = vmatpush.bf16.msra.mxu2 %v1038_v3  ;;  %v2689_v21 = vld [vmem:[%s4656_s0 + $0x1a0] sm:$0xff]  ;;  %v2714_v22 = vld [vmem:[%s4656_s0 + $0x268] sm:$0xff]  ;;  %v2640_v23 = vld [vmem:[%s4656_s0 + $0x18] sm:$0xff] }
   0x8   :  { %3328 = vmatpush.bf16.msra.mxu3 %v1038_v3  ;;  %1043 = vmatpush.bf16.msra.mxu0 %v1038_v3  ;;  %v2665_v24 = vld [vmem:[%s4656_s0 + $0xe0] sm:$0xff]  ;;  %v2690_v25 = vld [vmem:[%s4656_s0 + $0x1a8] sm:$0xff]  ;;  %v2715_v26 = vld [vmem:[%s4656_s0 + $0x270] sm:$0xff] }
   0x9   :  { %v2641_v27 = vld [vmem:[%s4656_s0 + $0x20] sm:$0xff]  ;;  %v2666_v28 = vld [vmem:[%s4656_s0 + $0xe8] sm:$0xff]  ;;  %v2691_v29 = vld [vmem:[%s4656_s0 + $0x1b0] sm:$0xff] }
   0xa   :  { %v2716_v30 = vld [vmem:[%s4656_s0 + $0x278] sm:$0xff]  ;;  %v2642_v31 = vld [vmem:[%s4656_s0 + $0x28] sm:$0xff]  ;;  %v2667_v32 = vld [vmem:[%s4656_s0 + $0xf0] sm:$0xff] }
   0xb   :  { %3329 = vmatpush.bf16.msra.mxu1 %v2738_v4  ;;  %3330 = vmatpush.bf16.msra.mxu2 %v2738_v4  ;;  %v2692_v33 = vld [vmem:[%s4656_s0 + $0x1b8] sm:$0xff]  ;;  %v2717_v34 = vld [vmem:[%s4656_s0 + $0x280] sm:$0xff]  ;;  %v2643_v35 = vld [vmem:[%s4656_s0 + $0x30] sm:$0xff] }
   0xc   :  { %3331 = vmatpush.bf16.msra.mxu3 %v2738_v4  ;;  %1044 = vmatpush.bf16.msra.mxu0 %v2738_v4  ;;  %v2668_v36 = vld [vmem:[%s4656_s0 + $0xf8] sm:$0xff]  ;;  %v2693_v37 = vld [vmem:[%s4656_s0 + $0x1c0] sm:$0xff]  ;;  %v2718_v38 = vld [vmem:[%s4656_s0 + $0x288] sm:$0xff] }
   0xd   :  { %v2644_v39 = vld [vmem:[%s4656_s0 + $0x38] sm:$0xff]  ;;  %v2669_v40 = vld [vmem:[%s4656_s0 + $0x100] sm:$0xff]  ;;  %v2694_v41 = vld [vmem:[%s4656_s0 + $0x1c8] sm:$0xff] }
   0xe   :  { %v2719_v43 = vld [vmem:[%s4656_s0 + $0x290] sm:$0xff]  ;;  %v2645_v44 = vld [vmem:[%s4656_s0 + $0x40] sm:$0xff]  ;;  %v2670_v60 = vld [vmem:[%s4656_s0 + $0x108] sm:$0xff] }
   0xf   :  { %3332 = vmatpush.bf16.msra.mxu1 %v2737_v5  ;;  %3333 = vmatpush.bf16.msra.mxu2 %v2737_v5  ;;  %v3914_v45 = vld [vmem:[%s4655_s2] ss:$0 sm:$0xff]  ;;  %v2695_v61 = vld [vmem:[%s4656_s0 + $0x1d0] sm:$0xff]  ;;  %v2720_v2 = vld [vmem:[%s4656_s0 + $0x298] sm:$0xff] }
  0x10   :  { %3334 = vmatpush.bf16.msra.mxu3 %v2737_v5  ;;  %1045 = vmatpush.bf16.msra.mxu0 %v2737_v5  ;;  %v2646_v3 = vld [vmem:[%s4656_s0 + $0x48] sm:$0xff] }
  0x13   :  { %3335 = vmatpush.bf16.msra.mxu1 %v2736_v6  ;;  %3336 = vmatpush.bf16.msra.mxu2 %v2736_v6 }
  0x14   :  { %3337 = vmatpush.bf16.msra.mxu3 %v2736_v6  ;;  %1046 = vmatpush.bf16.msra.mxu0 %v2736_v6 }
  0x17   :  { %3338 = vmatpush.bf16.msra.mxu1 %v2735_v7  ;;  %3339 = vmatpush.bf16.msra.mxu2 %v2735_v7 }
  0x18   :  { %3340 = vmatpush.bf16.msra.mxu3 %v2735_v7  ;;  %1047 = vmatpush.bf16.msra.mxu0 %v2735_v7 }
  0x1a   :  { %2563 = vmatmul.msk.bf16.vlgmr.msra.gmra.mxu1 %vm741_vm1, %v2661_v8  ;;  %2588 = vmatmul.msk.bf16.vlgmr.msra.gmra.mxu2 %vm741_vm1, %v2686_v9 }
  0x1b   :  { %2613 = vmatmul.msk.bf16.vlgmr.msra.gmra.mxu3 %vm741_vm1, %v2711_v10  ;;  %2539 = vmatmul.msk.bf16.vlgmr.msra.gmra.mxu0 %vm741_vm1, %v2637_v11 }
  0x2a   :  { %2564 = vmatmul.msk.bf16.gmra.mxu1 %vm741_vm1, %v2662_v12  ;;  %2589 = vmatmul.msk.bf16.gmra.mxu2 %vm741_vm1, %v2687_v13 }
  0x2b   :  { %2614 = vmatmul.msk.bf16.gmra.mxu3 %vm741_vm1, %v2712_v14  ;;  %2540 = vmatmul.msk.bf16.gmra.mxu0 %vm741_vm1, %v2638_v15 }
  0x3a   :  { %2565 = vmatmul.msk.bf16.gmra.mxu1 %vm741_vm1, %v2663_v16  ;;  %2590 = vmatmul.msk.bf16.gmra.mxu2 %vm741_vm1, %v2688_v17 }
  0x3b   :  { %2615 = vmatmul.msk.bf16.gmra.mxu3 %vm741_vm1, %v2713_v18  ;;  %2541 = vmatmul.msk.bf16.gmra.mxu0 %vm741_vm1, %v2639_v19 }
  0x4a   :  { %2566 = vmatmul.msk.bf16.gmra.mxu1 %vm741_vm1, %v2664_v20  ;;  %2591 = vmatmul.msk.bf16.gmra.mxu2 %vm741_vm1, %v2689_v21 }
  0x4b   :  { %2616 = vmatmul.msk.bf16.gmra.mxu3 %vm741_vm1, %v2714_v22  ;;  %2542 = vmatmul.msk.bf16.gmra.mxu0 %vm741_vm1, %v2640_v23 }
  0x5a   :  { %2567 = vmatmul.msk.bf16.gmra.mxu1 %vm741_vm1, %v2665_v24  ;;  %2592 = vmatmul.msk.bf16.gmra.mxu2 %vm741_vm1, %v2690_v25 }
  0x5b   :  { %2617 = vmatmul.msk.bf16.gmra.mxu3 %vm741_vm1, %v2715_v26  ;;  %2543 = vmatmul.msk.bf16.gmra.mxu0 %vm741_vm1, %v2641_v27 }
  0x6a   :  { %2568 = vmatmul.msk.bf16.gmra.mxu1 %vm741_vm1, %v2666_v28  ;;  %2593 = vmatmul.msk.bf16.gmra.mxu2 %vm741_vm1, %v2691_v29  ;;  %v2671_v28 = vld [vmem:[%s4656_s0 + $0x110] sm:$0xff]  ;;  %v2696_v29 = vld [vmem:[%s4656_s0 + $0x1d8] sm:$0xff] }
  0x6b   :  { %2618 = vmatmul.msk.bf16.gmra.mxu3 %vm741_vm1, %v2716_v30  ;;  %2544 = vmatmul.msk.bf16.gmra.mxu0 %vm741_vm1, %v2642_v31 }
  0x7a   :  { %2569 = vmatmul.msk.bf16.gmra.mxu1 %vm741_vm1, %v2667_v32  ;;  %2594 = vmatmul.msk.bf16.gmra.mxu2 %vm741_vm1, %v2692_v33 }
  0x7b   :  { %2619 = vmatmul.msk.bf16.gmra.mxu3 %vm741_vm1, %v2717_v34  ;;  %2545 = vmatmul.msk.bf16.gmra.mxu0 %vm741_vm1, %v2643_v35  ;;  %v2721_v34 = vld [vmem:[%s4656_s0 + $0x2a0] sm:$0xff]  ;;  %v2647_v35 = vld [vmem:[%s4656_s0 + $0x50] sm:$0xff] }
  0x8a   :  { %2570 = vmatmul.msk.bf16.gmra.mxu1 %vm741_vm1, %v2668_v36  ;;  %2595 = vmatmul.msk.bf16.gmra.mxu2 %vm741_vm1, %v2693_v37 }
  0x8b   :  { %2620 = vmatmul.msk.bf16.gmra.mxu3 %vm741_vm1, %v2718_v38  ;;  %2546 = vmatmul.msk.bf16.gmra.mxu0 %vm741_vm1, %v2644_v39 }
  0x97   :  { %v1169_v42 = vpop.f32.mrf.mxu1 }
  0x98   :  { %v1049_v46 = vpop.f32.mrf.mxu0  ;;  %v1170_v47 = vadd.f32 %v3914_v45, %v1169_v42 }
  0x99   :  { %v1050_v49 = vadd.f32 %v3914_v45, %v1049_v46 }
  0x9a   :  { %2571 = vmatmul.msk.bf16.gmra.mxu1 %vm741_vm1, %v2669_v40  ;;  %2596 = vmatmul.msk.bf16.gmra.mxu2 %vm741_vm1, %v2694_v41  ;;  %3342 = vtanh.f32 %v1170_v47 }
  0x9b   :  { %2621 = vmatmul.msk.bf16.gmra.mxu3 %vm741_vm1, %v2719_v43  ;;  %2547 = vmatmul.msk.bf16.gmra.mxu0 %vm741_vm1, %v2645_v44  ;;  %3344 = vtanh.f32 %v1050_v49 }
  0x9d   :  { %v1294_v48 = vpop.f32.mrf.mxu2 }
  0x9e   :  { %v1419_v50 = vpop.f32.mrf.mxu3  ;;  %v1295_v55 = vadd.f32 %v3914_v45, %v1294_v48 }
  0x9f   :  { %v1171_v51 = vpop.f32.mrf.mxu1  ;;  %v1420_v56 = vadd.f32 %v3914_v45, %v1419_v50 }
  0xa0   :  { %v1172_v52 = vadd.f32 %v3914_v45, %v1171_v51  ;;  %v1051_v53 = vpop.f32.mrf.mxu0  ;;  %v3343_v58 = vpop.eup %3342 }
  0xa1   :  { %v1052_v54 = vadd.f32 %v3914_v45, %v1051_v53  ;;  %v3345_v63 = vpop.eup %3344 }
  0xa2   :  { %3346 = vtanh.f32 %v1172_v52 }
  0xa3   :  { %3348 = vtanh.f32 %v1052_v54 }
  0xa4   :  { %3350 = vtanh.f32 %v1295_v55 }
  0xa5   :  { %v1296_v57 = vpop.f32.mrf.mxu2  ;;  %3352 = vtanh.f32 %v1420_v56 }
  0xa6   :  { %v1297_v59 = vadd.f32 %v3914_v45, %v1296_v57  ;;  %v1421_v62 = vpop.f32.mrf.mxu3 }
  0xa7   :  { %v1174_v0 = vpop.f32.mrf.mxu1  ;;  %v1422_v1 = vadd.f32 %v3914_v45, %v1421_v62  ;;  %v2697_v62 = vld [vmem:[%s4656_s0 + $0x1e0] sm:$0xff] }
  0xa8   :  { %v3347_v4 = vpop.eup %3346  ;;  %3354 = vtanh.f32 %v1297_v59  ;;  %v1054_v5 = vpop.f32.mrf.mxu0  ;;  %v1175_v10 = vadd.f32 %v3914_v45, %v1174_v0 }
  0xa9   :  { %v3349_v6 = vpop.eup %3348  ;;  %v2862_v7 = vpack.c.bf16 %v3347_v4, %v3343_v58  ;;  %3356 = vtanh.f32 %v1422_v1  ;;  %v1055_v13 = vadd.f32 %v3914_v45, %v1054_v5  ;;  %v2648_v4 = vld [vmem:[%s4656_s0 + $0x58] sm:$0xff] }
  0xaa   :  { %2572 = vmatmul.msk.bf16.gmra.mxu1 %vm741_vm1, %v2670_v60  ;;  %2597 = vmatmul.msk.bf16.gmra.mxu2 %vm741_vm1, %v2695_v61  ;;  %v2742_v8 = vpack.c.bf16 %v3349_v6, %v3345_v63  ;;  %v3351_v9 = vpop.eup %3350  ;;  %3358 = vtanh.f32 %v1175_v10  ;;  %v2672_v61 = vld [vmem:[%s4656_s0 + $0x118] sm:$0xff] }
  0xab   :  { %3252 = vst [vmem:[%s4657_s3 + $0xc0] sm:$0xff] %v2862_v7   ;;  %2622 = vmatmul.msk.bf16.gmra.mxu3 %vm741_vm1, %v2720_v2  ;;  %2548 = vmatmul.msk.bf16.gmra.mxu0 %vm741_vm1, %v2646_v3  ;;  %v3353_v11 = vpop.eup %3352  ;;  %3360 = vtanh.f32 %v1055_v13  ;;  %v2722_v3 = vld [vmem:[%s4656_s0 + $0x2a8] sm:$0xff] }
  0xac   :  { %2743 = vst [vmem:[%s4657_s3] sm:$0xff] %v2742_v8  }
  0xad   :  { %v1299_v12 = vpop.f32.mrf.mxu2 }
  0xae   :  { %v3355_v14 = vpop.eup %3354  ;;  %v1424_v15 = vpop.f32.mrf.mxu3  ;;  %v1300_v23 = vadd.f32 %v3914_v45, %v1299_v12 }
  0xaf   :  { %v3357_v16 = vpop.eup %3356  ;;  %v2987_v17 = vpack.c.bf16 %v3355_v14, %v3351_v9  ;;  %v1176_v18 = vpop.f32.mrf.mxu1  ;;  %v1425_v24 = vadd.f32 %v3914_v45, %v1424_v15 }
  0xb0   :  { %v3112_v19 = vpack.c.bf16 %v3357_v16, %v3353_v11  ;;  %v1177_v20 = vadd.f32 %v3914_v45, %v1176_v18  ;;  %v1056_v21 = vpop.f32.mrf.mxu0  ;;  %v3359_v26 = vpop.eup %3358 }
  0xb1   :  { %3277 = vst [vmem:[%s4657_s3 + $0x188] sm:$0xff] %v2987_v17   ;;  %v1057_v22 = vadd.f32 %v3914_v45, %v1056_v21  ;;  %v3361_v31 = vpop.eup %3360 }
  0xb2   :  { %3302 = vst [vmem:[%s4657_s3 + $0x250] sm:$0xff] %v3112_v19   ;;  %3362 = vtanh.f32 %v1177_v20 }
  0xb3   :  { %3364 = vtanh.f32 %v1057_v22 }
  0xb4   :  { %3366 = vtanh.f32 %v1300_v23 }
  0xb5   :  { %v1301_v25 = vpop.f32.mrf.mxu2  ;;  %3368 = vtanh.f32 %v1425_v24 }
  0xb6   :  { %v1302_v27 = vadd.f32 %v3914_v45, %v1301_v25  ;;  %v1426_v30 = vpop.f32.mrf.mxu3 }
  0xb7   :  { %v1179_v32 = vpop.f32.mrf.mxu1  ;;  %v1427_v33 = vadd.f32 %v3914_v45, %v1426_v30  ;;  %v2698_v30 = vld [vmem:[%s4656_s0 + $0x1e8] sm:$0xff] }
  0xb8   :  { %v3363_v36 = vpop.eup %3362  ;;  %3370 = vtanh.f32 %v1302_v27  ;;  %v1059_v37 = vpop.f32.mrf.mxu0  ;;  %v1180_v42 = vadd.f32 %v3914_v45, %v1179_v32 }
  0xb9   :  { %v3365_v38 = vpop.eup %3364  ;;  %v2867_v39 = vpack.c.bf16 %v3363_v36, %v3359_v26  ;;  %3372 = vtanh.f32 %v1427_v33  ;;  %v1060_v46 = vadd.f32 %v3914_v45, %v1059_v37  ;;  %v2649_v36 = vld [vmem:[%s4656_s0 + $0x60] sm:$0xff] }
  0xba   :  { %2573 = vmatmul.msk.bf16.gmra.mxu1 %vm741_vm1, %v2671_v28  ;;  %2598 = vmatmul.msk.bf16.gmra.mxu2 %vm741_vm1, %v2696_v29  ;;  %v2747_v40 = vpack.c.bf16 %v3365_v38, %v3361_v31  ;;  %v3367_v41 = vpop.eup %3366  ;;  %3374 = vtanh.f32 %v1180_v42  ;;  %v2673_v29 = vld [vmem:[%s4656_s0 + $0x120] sm:$0xff] }
  0xbb   :  { %3253 = vst [vmem:[%s4657_s3 + $0xc8] sm:$0xff] %v2867_v39   ;;  %2623 = vmatmul.msk.bf16.gmra.mxu3 %vm741_vm1, %v2721_v34  ;;  %2549 = vmatmul.msk.bf16.gmra.mxu0 %vm741_vm1, %v2647_v35  ;;  %v3369_v43 = vpop.eup %3368  ;;  %3376 = vtanh.f32 %v1060_v46  ;;  %v2723_v35 = vld [vmem:[%s4656_s0 + $0x2b0] sm:$0xff] }
  0xbc   :  { %3229 = vst [vmem:[%s4657_s3 + $0x8] sm:$0xff] %v2747_v40  }
  0xbd   :  { %v1304_v44 = vpop.f32.mrf.mxu2 }
  0xbe   :  { %v3371_v47 = vpop.eup %3370  ;;  %v1429_v48 = vpop.f32.mrf.mxu3  ;;  %v1305_v56 = vadd.f32 %v3914_v45, %v1304_v44 }
  0xbf   :  { %v3373_v49 = vpop.eup %3372  ;;  %v2992_v50 = vpack.c.bf16 %v3371_v47, %v3367_v41  ;;  %v1181_v51 = vpop.f32.mrf.mxu1  ;;  %v1430_v57 = vadd.f32 %v3914_v45, %v1429_v48 }
  0xc0   :  { %v3117_v52 = vpack.c.bf16 %v3373_v49, %v3369_v43  ;;  %v1182_v53 = vadd.f32 %v3914_v45, %v1181_v51  ;;  %v1061_v54 = vpop.f32.mrf.mxu0  ;;  %v3375_v59 = vpop.eup %3374 }
  0xc1   :  { %3278 = vst [vmem:[%s4657_s3 + $0x190] sm:$0xff] %v2992_v50   ;;  %v1062_v55 = vadd.f32 %v3914_v45, %v1061_v54  ;;  %v3377_v0 = vpop.eup %3376 }
  0xc2   :  { %3303 = vst [vmem:[%s4657_s3 + $0x258] sm:$0xff] %v3117_v52   ;;  %3378 = vtanh.f32 %v1182_v53 }
  0xc3   :  { %3380 = vtanh.f32 %v1062_v55 }
  0xc4   :  { %3382 = vtanh.f32 %v1305_v56 }
  0xc5   :  { %v1306_v58 = vpop.f32.mrf.mxu2  ;;  %3384 = vtanh.f32 %v1430_v57 }
  0xc6   :  { %v1307_v60 = vadd.f32 %v3914_v45, %v1306_v58  ;;  %v1431_v63 = vpop.f32.mrf.mxu3 }
  0xc7   :  { %v1184_v1 = vpop.f32.mrf.mxu1  ;;  %v1432_v2 = vadd.f32 %v3914_v45, %v1431_v63  ;;  %v2699_v63 = vld [vmem:[%s4656_s0 + $0x1f0] sm:$0xff] }
  0xc8   :  { %v3379_v5 = vpop.eup %3378  ;;  %3386 = vtanh.f32 %v1307_v60  ;;  %v1064_v6 = vpop.f32.mrf.mxu0  ;;  %v1185_v11 = vadd.f32 %v3914_v45, %v1184_v1 }
  0xc9   :  { %v3381_v7 = vpop.eup %3380  ;;  %v2872_v8 = vpack.c.bf16 %v3379_v5, %v3375_v59  ;;  %3388 = vtanh.f32 %v1432_v2  ;;  %v1065_v14 = vadd.f32 %v3914_v45, %v1064_v6  ;;  %v2650_v5 = vld [vmem:[%s4656_s0 + $0x68] sm:$0xff] }
  0xca   :  { %2574 = vmatmul.msk.bf16.gmra.mxu1 %vm741_vm1, %v2672_v61  ;;  %2599 = vmatmul.msk.bf16.gmra.mxu2 %vm741_vm1, %v2697_v62  ;;  %v2752_v9 = vpack.c.bf16 %v3381_v7, %v3377_v0  ;;  %v3383_v10 = vpop.eup %3382  ;;  %3390 = vtanh.f32 %v1185_v11  ;;  %v2674_v62 = vld [vmem:[%s4656_s0 + $0x128] sm:$0xff] }
  0xcb   :  { %3254 = vst [vmem:[%s4657_s3 + $0xd0] sm:$0xff] %v2872_v8   ;;  %2624 = vmatmul.msk.bf16.gmra.mxu3 %vm741_vm1, %v2722_v3  ;;  %2550 = vmatmul.msk.bf16.gmra.mxu0 %vm741_vm1, %v2648_v4  ;;  %v3385_v12 = vpop.eup %3384  ;;  %3392 = vtanh.f32 %v1065_v14  ;;  %v2724_v4 = vld [vmem:[%s4656_s0 + $0x2b8] sm:$0xff] }
  0xcc   :  { %3230 = vst [vmem:[%s4657_s3 + $0x10] sm:$0xff] %v2752_v9  }
  0xcd   :  { %v1309_v13 = vpop.f32.mrf.mxu2 }
  0xce   :  { %v3387_v15 = vpop.eup %3386  ;;  %v1434_v16 = vpop.f32.mrf.mxu3  ;;  %v1310_v24 = vadd.f32 %v3914_v45, %v1309_v13 }
  0xcf   :  { %v3389_v17 = vpop.eup %3388  ;;  %v2997_v18 = vpack.c.bf16 %v3387_v15, %v3383_v10  ;;  %v1186_v19 = vpop.f32.mrf.mxu1  ;;  %v1435_v25 = vadd.f32 %v3914_v45, %v1434_v16 }
  0xd0   :  { %v3122_v20 = vpack.c.bf16 %v3389_v17, %v3385_v12  ;;  %v1187_v21 = vadd.f32 %v3914_v45, %v1186_v19  ;;  %v1066_v22 = vpop.f32.mrf.mxu0  ;;  %v3391_v27 = vpop.eup %3390 }
  0xd1   :  { %3279 = vst [vmem:[%s4657_s3 + $0x198] sm:$0xff] %v2997_v18   ;;  %v1067_v23 = vadd.f32 %v3914_v45, %v1066_v22  ;;  %v3393_v32 = vpop.eup %3392 }
  0xd2   :  { %3304 = vst [vmem:[%s4657_s3 + $0x260] sm:$0xff] %v3122_v20   ;;  %3394 = vtanh.f32 %v1187_v21 }
  0xd3   :  { %3396 = vtanh.f32 %v1067_v23 }
  0xd4   :  { %3398 = vtanh.f32 %v1310_v24 }
  0xd5   :  { %v1311_v26 = vpop.f32.mrf.mxu2  ;;  %3400 = vtanh.f32 %v1435_v25 }
  0xd6   :  { %v1312_v28 = vadd.f32 %v3914_v45, %v1311_v26  ;;  %v1436_v31 = vpop.f32.mrf.mxu3 }
  0xd7   :  { %v1189_v33 = vpop.f32.mrf.mxu1  ;;  %v1437_v34 = vadd.f32 %v3914_v45, %v1436_v31  ;;  %v2700_v31 = vld [vmem:[%s4656_s0 + $0x1f8] sm:$0xff] }
  0xd8   :  { %v3395_v37 = vpop.eup %3394  ;;  %3402 = vtanh.f32 %v1312_v28  ;;  %v1069_v38 = vpop.f32.mrf.mxu0  ;;  %v1190_v43 = vadd.f32 %v3914_v45, %v1189_v33 }
  0xd9   :  { %v3397_v39 = vpop.eup %3396  ;;  %v2877_v40 = vpack.c.bf16 %v3395_v37, %v3391_v27  ;;  %3404 = vtanh.f32 %v1437_v34  ;;  %v1070_v47 = vadd.f32 %v3914_v45, %v1069_v38  ;;  %v2651_v37 = vld [vmem:[%s4656_s0 + $0x70] sm:$0xff] }
  0xda   :  { %2575 = vmatmul.msk.bf16.gmra.mxu1 %vm741_vm1, %v2673_v29  ;;  %2600 = vmatmul.msk.bf16.gmra.mxu2 %vm741_vm1, %v2698_v30  ;;  %v2757_v41 = vpack.c.bf16 %v3397_v39, %v3393_v32  ;;  %v3399_v42 = vpop.eup %3398  ;;  %3406 = vtanh.f32 %v1190_v43  ;;  %v2675_v30 = vld [vmem:[%s4656_s0 + $0x130] sm:$0xff] }
  0xdb   :  { %3255 = vst [vmem:[%s4657_s3 + $0xd8] sm:$0xff] %v2877_v40   ;;  %2625 = vmatmul.msk.bf16.gmra.mxu3 %vm741_vm1, %v2723_v35  ;;  %2551 = vmatmul.msk.bf16.gmra.mxu0 %vm741_vm1, %v2649_v36  ;;  %v3401_v44 = vpop.eup %3400  ;;  %3408 = vtanh.f32 %v1070_v47  ;;  %v2725_v36 = vld [vmem:[%s4656_s0 + $0x2c0] sm:$0xff] }
  0xdc   :  { %3231 = vst [vmem:[%s4657_s3 + $0x18] sm:$0xff] %v2757_v41  }
  0xdd   :  { %v1314_v46 = vpop.f32.mrf.mxu2 }
  0xde   :  { %v3403_v48 = vpop.eup %3402  ;;  %v1439_v49 = vpop.f32.mrf.mxu3  ;;  %v1315_v57 = vadd.f32 %v3914_v45, %v1314_v46 }
  0xdf   :  { %v3405_v50 = vpop.eup %3404  ;;  %v3002_v51 = vpack.c.bf16 %v3403_v48, %v3399_v42  ;;  %v1191_v52 = vpop.f32.mrf.mxu1  ;;  %v1440_v58 = vadd.f32 %v3914_v45, %v1439_v49 }
  0xe0   :  { %v3127_v53 = vpack.c.bf16 %v3405_v50, %v3401_v44  ;;  %v1192_v54 = vadd.f32 %v3914_v45, %v1191_v52  ;;  %v1071_v55 = vpop.f32.mrf.mxu0  ;;  %v3407_v60 = vpop.eup %3406 }
  0xe1   :  { %3280 = vst [vmem:[%s4657_s3 + $0x1a0] sm:$0xff] %v3002_v51   ;;  %v1072_v56 = vadd.f32 %v3914_v45, %v1071_v55  ;;  %v3409_v1 = vpop.eup %3408 }
  0xe2   :  { %3305 = vst [vmem:[%s4657_s3 + $0x268] sm:$0xff] %v3127_v53   ;;  %3410 = vtanh.f32 %v1192_v54 }
  0xe3   :  { %3412 = vtanh.f32 %v1072_v56 }
  0xe4   :  { %3414 = vtanh.f32 %v1315_v57 }
  0xe5   :  { %v1316_v59 = vpop.f32.mrf.mxu2  ;;  %3416 = vtanh.f32 %v1440_v58 }
  0xe6   :  { %v1317_v61 = vadd.f32 %v3914_v45, %v1316_v59  ;;  %v1441_v0 = vpop.f32.mrf.mxu3 }
  0xe7   :  { %v1194_v2 = vpop.f32.mrf.mxu1  ;;  %v1442_v3 = vadd.f32 %v3914_v45, %v1441_v0  ;;  %v2701_v0 = vld [vmem:[%s4656_s0 + $0x200] sm:$0xff] }
  0xe8   :  { %v3411_v6 = vpop.eup %3410  ;;  %3418 = vtanh.f32 %v1317_v61  ;;  %v1074_v7 = vpop.f32.mrf.mxu0  ;;  %v1195_v12 = vadd.f32 %v3914_v45, %v1194_v2 }
  0xe9   :  { %v3413_v8 = vpop.eup %3412  ;;  %v2882_v9 = vpack.c.bf16 %v3411_v6, %v3407_v60  ;;  %3420 = vtanh.f32 %v1442_v3  ;;  %v1075_v15 = vadd.f32 %v3914_v45, %v1074_v7  ;;  %v2652_v6 = vld [vmem:[%s4656_s0 + $0x78] sm:$0xff] }
  0xea   :  { %2576 = vmatmul.msk.bf16.gmra.mxu1 %vm741_vm1, %v2674_v62  ;;  %2601 = vmatmul.msk.bf16.gmra.mxu2 %vm741_vm1, %v2699_v63  ;;  %v2762_v10 = vpack.c.bf16 %v3413_v8, %v3409_v1  ;;  %v3415_v11 = vpop.eup %3414  ;;  %3422 = vtanh.f32 %v1195_v12  ;;  %v2676_v63 = vld [vmem:[%s4656_s0 + $0x138] sm:$0xff] }
  0xeb   :  { %3256 = vst [vmem:[%s4657_s3 + $0xe0] sm:$0xff] %v2882_v9   ;;  %2626 = vmatmul.msk.bf16.gmra.mxu3 %vm741_vm1, %v2724_v4  ;;  %2552 = vmatmul.msk.bf16.gmra.mxu0 %vm741_vm1, %v2650_v5  ;;  %v3417_v13 = vpop.eup %3416  ;;  %3424 = vtanh.f32 %v1075_v15  ;;  %v2726_v5 = vld [vmem:[%s4656_s0 + $0x2c8] sm:$0xff] }
  0xec   :  { %3232 = vst [vmem:[%s4657_s3 + $0x20] sm:$0xff] %v2762_v10  }
  0xed   :  { %v1319_v14 = vpop.f32.mrf.mxu2 }
  0xee   :  { %v3419_v16 = vpop.eup %3418  ;;  %v1444_v17 = vpop.f32.mrf.mxu3  ;;  %v1320_v25 = vadd.f32 %v3914_v45, %v1319_v14 }
  0xef   :  { %v3421_v18 = vpop.eup %3420  ;;  %v3007_v19 = vpack.c.bf16 %v3419_v16, %v3415_v11  ;;  %v1196_v20 = vpop.f32.mrf.mxu1  ;;  %v1445_v26 = vadd.f32 %v3914_v45, %v1444_v17 }
  0xf0   :  { %v3132_v21 = vpack.c.bf16 %v3421_v18, %v3417_v13  ;;  %v1197_v22 = vadd.f32 %v3914_v45, %v1196_v20  ;;  %v1076_v23 = vpop.f32.mrf.mxu0  ;;  %v3423_v28 = vpop.eup %3422 }
  0xf1   :  { %3281 = vst [vmem:[%s4657_s3 + $0x1a8] sm:$0xff] %v3007_v19   ;;  %v1077_v24 = vadd.f32 %v3914_v45, %v1076_v23  ;;  %v3425_v33 = vpop.eup %3424 }
  0xf2   :  { %3306 = vst [vmem:[%s4657_s3 + $0x270] sm:$0xff] %v3132_v21   ;;  %3426 = vtanh.f32 %v1197_v22 }
  0xf3   :  { %3428 = vtanh.f32 %v1077_v24 }
  0xf4   :  { %3430 = vtanh.f32 %v1320_v25 }
  0xf5   :  { %v1321_v27 = vpop.f32.mrf.mxu2  ;;  %3432 = vtanh.f32 %v1445_v26 }
  0xf6   :  { %v1322_v29 = vadd.f32 %v3914_v45, %v1321_v27  ;;  %v1446_v32 = vpop.f32.mrf.mxu3 }
  0xf7   :  { %v1199_v34 = vpop.f32.mrf.mxu1  ;;  %v1447_v35 = vadd.f32 %v3914_v45, %v1446_v32  ;;  %v2702_v32 = vld [vmem:[%s4656_s0 + $0x208] sm:$0xff] }
  0xf8   :  { %v3427_v38 = vpop.eup %3426  ;;  %3434 = vtanh.f32 %v1322_v29  ;;  %v1079_v39 = vpop.f32.mrf.mxu0  ;;  %v1200_v44 = vadd.f32 %v3914_v45, %v1199_v34 }
  0xf9   :  { %v3429_v40 = vpop.eup %3428  ;;  %v2887_v41 = vpack.c.bf16 %v3427_v38, %v3423_v28  ;;  %3436 = vtanh.f32 %v1447_v35  ;;  %v1080_v48 = vadd.f32 %v3914_v45, %v1079_v39  ;;  %v2653_v38 = vld [vmem:[%s4656_s0 + $0x80] sm:$0xff] }
  0xfa   :  { %2577 = vmatmul.msk.bf16.gmra.mxu1 %vm741_vm1, %v2675_v30  ;;  %2602 = vmatmul.msk.bf16.gmra.mxu2 %vm741_vm1, %v2700_v31  ;;  %v2767_v42 = vpack.c.bf16 %v3429_v40, %v3425_v33  ;;  %v3431_v43 = vpop.eup %3430  ;;  %3438 = vtanh.f32 %v1200_v44  ;;  %v2677_v31 = vld [vmem:[%s4656_s0 + $0x140] sm:$0xff] }
  0xfb   :  { %3257 = vst [vmem:[%s4657_s3 + $0xe8] sm:$0xff] %v2887_v41   ;;  %2627 = vmatmul.msk.bf16.gmra.mxu3 %vm741_vm1, %v2725_v36  ;;  %2553 = vmatmul.msk.bf16.gmra.mxu0 %vm741_vm1, %v2651_v37  ;;  %v3433_v46 = vpop.eup %3432  ;;  %3440 = vtanh.f32 %v1080_v48  ;;  %v2727_v37 = vld [vmem:[%s4656_s0 + $0x2d0] sm:$0xff] }
  0xfc   :  { %3233 = vst [vmem:[%s4657_s3 + $0x28] sm:$0xff] %v2767_v42  }
  0xfd   :  { %v1324_v47 = vpop.f32.mrf.mxu2 }
  0xfe   :  { %v3435_v49 = vpop.eup %3434  ;;  %v1449_v50 = vpop.f32.mrf.mxu3  ;;  %v1325_v58 = vadd.f32 %v3914_v45, %v1324_v47 }
  0xff   :  { %v3437_v51 = vpop.eup %3436  ;;  %v3012_v52 = vpack.c.bf16 %v3435_v49, %v3431_v43  ;;  %v1201_v53 = vpop.f32.mrf.mxu1  ;;  %v1450_v59 = vadd.f32 %v3914_v45, %v1449_v50 }
 0x100   :  { %v3137_v54 = vpack.c.bf16 %v3437_v51, %v3433_v46  ;;  %v1202_v55 = vadd.f32 %v3914_v45, %v1201_v53  ;;  %v1081_v56 = vpop.f32.mrf.mxu0  ;;  %v3439_v61 = vpop.eup %3438 }
 0x101   :  { %3282 = vst [vmem:[%s4657_s3 + $0x1b0] sm:$0xff] %v3012_v52   ;;  %v1082_v57 = vadd.f32 %v3914_v45, %v1081_v56  ;;  %v3441_v2 = vpop.eup %3440 }
 0x102   :  { %3307 = vst [vmem:[%s4657_s3 + $0x278] sm:$0xff] %v3137_v54   ;;  %3442 = vtanh.f32 %v1202_v55 }
 0x103   :  { %3444 = vtanh.f32 %v1082_v57 }
 0x104   :  { %3446 = vtanh.f32 %v1325_v58 }
 0x105   :  { %v1326_v60 = vpop.f32.mrf.mxu2  ;;  %3448 = vtanh.f32 %v1450_v59 }
 0x106   :  { %v1327_v62 = vadd.f32 %v3914_v45, %v1326_v60  ;;  %v1451_v1 = vpop.f32.mrf.mxu3 }
 0x107   :  { %v1204_v3 = vpop.f32.mrf.mxu1  ;;  %v1452_v4 = vadd.f32 %v3914_v45, %v1451_v1  ;;  %v2703_v1 = vld [vmem:[%s4656_s0 + $0x210] sm:$0xff] }
 0x108   :  { %v3443_v7 = vpop.eup %3442  ;;  %3450 = vtanh.f32 %v1327_v62  ;;  %v1084_v8 = vpop.f32.mrf.mxu0  ;;  %v1205_v13 = vadd.f32 %v3914_v45, %v1204_v3 }
 0x109   :  { %v3445_v9 = vpop.eup %3444  ;;  %v2892_v10 = vpack.c.bf16 %v3443_v7, %v3439_v61  ;;  %3452 = vtanh.f32 %v1452_v4  ;;  %v1085_v16 = vadd.f32 %v3914_v45, %v1084_v8  ;;  %v2654_v7 = vld [vmem:[%s4656_s0 + $0x88] sm:$0xff] }
 0x10a   :  { %2578 = vmatmul.msk.bf16.gmra.mxu1 %vm741_vm1, %v2676_v63  ;;  %2603 = vmatmul.msk.bf16.gmra.mxu2 %vm741_vm1, %v2701_v0  ;;  %v2772_v11 = vpack.c.bf16 %v3445_v9, %v3441_v2  ;;  %v3447_v12 = vpop.eup %3446  ;;  %3454 = vtanh.f32 %v1205_v13  ;;  %v2678_v0 = vld [vmem:[%s4656_s0 + $0x148] sm:$0xff] }
 0x10b   :  { %3258 = vst [vmem:[%s4657_s3 + $0xf0] sm:$0xff] %v2892_v10   ;;  %2628 = vmatmul.msk.bf16.gmra.mxu3 %vm741_vm1, %v2726_v5  ;;  %2554 = vmatmul.msk.bf16.gmra.mxu0 %vm741_vm1, %v2652_v6  ;;  %v3449_v14 = vpop.eup %3448  ;;  %3456 = vtanh.f32 %v1085_v16  ;;  %v2728_v6 = vld [vmem:[%s4656_s0 + $0x2d8] sm:$0xff] }
 0x10c   :  { %3234 = vst [vmem:[%s4657_s3 + $0x30] sm:$0xff] %v2772_v11  }
 0x10d   :  { %v1329_v15 = vpop.f32.mrf.mxu2 }
 0x10e   :  { %v3451_v17 = vpop.eup %3450  ;;  %v1454_v18 = vpop.f32.mrf.mxu3  ;;  %v1330_v26 = vadd.f32 %v3914_v45, %v1329_v15 }
 0x10f   :  { %v3453_v19 = vpop.eup %3452  ;;  %v3017_v20 = vpack.c.bf16 %v3451_v17, %v3447_v12  ;;  %v1206_v21 = vpop.f32.mrf.mxu1  ;;  %v1455_v27 = vadd.f32 %v3914_v45, %v1454_v18 }
 0x110   :  { %v3142_v22 = vpack.c.bf16 %v3453_v19, %v3449_v14  ;;  %v1207_v23 = vadd.f32 %v3914_v45, %v1206_v21  ;;  %v1086_v24 = vpop.f32.mrf.mxu0  ;;  %v3455_v29 = vpop.eup %3454 }
 0x111   :  { %3283 = vst [vmem:[%s4657_s3 + $0x1b8] sm:$0xff] %v3017_v20   ;;  %v1087_v25 = vadd.f32 %v3914_v45, %v1086_v24  ;;  %v3457_v34 = vpop.eup %3456 }
 0x112   :  { %3308 = vst [vmem:[%s4657_s3 + $0x280] sm:$0xff] %v3142_v22   ;;  %3458 = vtanh.f32 %v1207_v23 }
 0x113   :  { %3460 = vtanh.f32 %v1087_v25 }
 0x114   :  { %3462 = vtanh.f32 %v1330_v26 }
 0x115   :  { %v1331_v28 = vpop.f32.mrf.mxu2  ;;  %3464 = vtanh.f32 %v1455_v27 }
 0x116   :  { %v1332_v30 = vadd.f32 %v3914_v45, %v1331_v28  ;;  %v1456_v33 = vpop.f32.mrf.mxu3 }
 0x117   :  { %v1209_v35 = vpop.f32.mrf.mxu1  ;;  %v1457_v36 = vadd.f32 %v3914_v45, %v1456_v33  ;;  %v2704_v33 = vld [vmem:[%s4656_s0 + $0x218] sm:$0xff] }
 0x118   :  { %v3459_v39 = vpop.eup %3458  ;;  %3466 = vtanh.f32 %v1332_v30  ;;  %v1089_v40 = vpop.f32.mrf.mxu0  ;;  %v1210_v46 = vadd.f32 %v3914_v45, %v1209_v35 }
 0x119   :  { %v3461_v41 = vpop.eup %3460  ;;  %v2897_v42 = vpack.c.bf16 %v3459_v39, %v3455_v29  ;;  %3468 = vtanh.f32 %v1457_v36  ;;  %v1090_v49 = vadd.f32 %v3914_v45, %v1089_v40  ;;  %v2655_v39 = vld [vmem:[%s4656_s0 + $0x90] sm:$0xff] }
 0x11a   :  { %2579 = vmatmul.msk.bf16.gmra.mxu1 %vm741_vm1, %v2677_v31  ;;  %2604 = vmatmul.msk.bf16.gmra.mxu2 %vm741_vm1, %v2702_v32  ;;  %v2777_v43 = vpack.c.bf16 %v3461_v41, %v3457_v34  ;;  %v3463_v44 = vpop.eup %3462  ;;  %3470 = vtanh.f32 %v1210_v46  ;;  %v2679_v32 = vld [vmem:[%s4656_s0 + $0x150] sm:$0xff] }
 0x11b   :  { %3259 = vst [vmem:[%s4657_s3 + $0xf8] sm:$0xff] %v2897_v42   ;;  %2629 = vmatmul.msk.bf16.gmra.mxu3 %vm741_vm1, %v2727_v37  ;;  %2555 = vmatmul.msk.bf16.gmra.mxu0 %vm741_vm1, %v2653_v38  ;;  %v3465_v47 = vpop.eup %3464  ;;  %3472 = vtanh.f32 %v1090_v49  ;;  %v2729_v38 = vld [vmem:[%s4656_s0 + $0x2e0] sm:$0xff] }
 0x11c   :  { %3235 = vst [vmem:[%s4657_s3 + $0x38] sm:$0xff] %v2777_v43  }
 0x11d   :  { %v1334_v48 = vpop.f32.mrf.mxu2 }
 0x11e   :  { %v3467_v50 = vpop.eup %3466  ;;  %v1459_v51 = vpop.f32.mrf.mxu3  ;;  %v1335_v59 = vadd.f32 %v3914_v45, %v1334_v48 }
 0x11f   :  { %v3469_v52 = vpop.eup %3468  ;;  %v3022_v53 = vpack.c.bf16 %v3467_v50, %v3463_v44  ;;  %v1211_v54 = vpop.f32.mrf.mxu1  ;;  %v1460_v60 = vadd.f32 %v3914_v45, %v1459_v51 }
 0x120   :  { %v3147_v55 = vpack.c.bf16 %v3469_v52, %v3465_v47  ;;  %v1212_v56 = vadd.f32 %v3914_v45, %v1211_v54  ;;  %v1091_v57 = vpop.f32.mrf.mxu0  ;;  %v3471_v62 = vpop.eup %3470 }
 0x121   :  { %3284 = vst [vmem:[%s4657_s3 + $0x1c0] sm:$0xff] %v3022_v53   ;;  %v1092_v58 = vadd.f32 %v3914_v45, %v1091_v57  ;;  %v3473_v3 = vpop.eup %3472 }
 0x122   :  { %3309 = vst [vmem:[%s4657_s3 + $0x288] sm:$0xff] %v3147_v55   ;;  %3474 = vtanh.f32 %v1212_v56 }
 0x123   :  { %3476 = vtanh.f32 %v1092_v58 }
 0x124   :  { %3478 = vtanh.f32 %v1335_v59 }
 0x125   :  { %v1336_v61 = vpop.f32.mrf.mxu2  ;;  %3480 = vtanh.f32 %v1460_v60 }
 0x126   :  { %v1337_v63 = vadd.f32 %v3914_v45, %v1336_v61  ;;  %v1461_v2 = vpop.f32.mrf.mxu3 }
 0x127   :  { %v1214_v4 = vpop.f32.mrf.mxu1  ;;  %v1462_v5 = vadd.f32 %v3914_v45, %v1461_v2  ;;  %v2705_v2 = vld [vmem:[%s4656_s0 + $0x220] sm:$0xff] }
 0x128   :  { %v3475_v8 = vpop.eup %3474  ;;  %3482 = vtanh.f32 %v1337_v63  ;;  %v1094_v9 = vpop.f32.mrf.mxu0  ;;  %v1215_v14 = vadd.f32 %v3914_v45, %v1214_v4 }
 0x129   :  { %v3477_v10 = vpop.eup %3476  ;;  %v2902_v11 = vpack.c.bf16 %v3475_v8, %v3471_v62  ;;  %3484 = vtanh.f32 %v1462_v5  ;;  %v1095_v17 = vadd.f32 %v3914_v45, %v1094_v9  ;;  %v2656_v8 = vld [vmem:[%s4656_s0 + $0x98] sm:$0xff] }
 0x12a   :  { %2580 = vmatmul.msk.bf16.gmra.mxu1 %vm741_vm1, %v2678_v0  ;;  %2605 = vmatmul.msk.bf16.gmra.mxu2 %vm741_vm1, %v2703_v1  ;;  %v2782_v12 = vpack.c.bf16 %v3477_v10, %v3473_v3  ;;  %v3479_v13 = vpop.eup %3478  ;;  %3486 = vtanh.f32 %v1215_v14  ;;  %v2680_v1 = vld [vmem:[%s4656_s0 + $0x158] sm:$0xff]  ;;  %v4310_v14 = vld [vmem:[%s4655_s2] ss:$0 sm:$0xff] }
 0x12b   :  { %3260 = vst [vmem:[%s4657_s3 + $0x100] sm:$0xff] %v2902_v11   ;;  %2630 = vmatmul.msk.bf16.gmra.mxu3 %vm741_vm1, %v2728_v6  ;;  %2556 = vmatmul.msk.bf16.gmra.mxu0 %vm741_vm1, %v2654_v7  ;;  %v3481_v15 = vpop.eup %3480  ;;  %3488 = vtanh.f32 %v1095_v17  ;;  %v2730_v7 = vld [vmem:[%s4656_s0 + $0x2e8] sm:$0xff] }
 0x12c   :  { %3236 = vst [vmem:[%s4657_s3 + $0x40] sm:$0xff] %v2782_v12  }
 0x12d   :  { %v1339_v16 = vpop.f32.mrf.mxu2 }
 0x12e   :  { %v3483_v18 = vpop.eup %3482  ;;  %v1464_v19 = vpop.f32.mrf.mxu3  ;;  %v1340_v27 = vadd.f32 %v3914_v45, %v1339_v16 }
 0x12f   :  { %v3485_v20 = vpop.eup %3484  ;;  %v3027_v21 = vpack.c.bf16 %v3483_v18, %v3479_v13  ;;  %v1216_v22 = vpop.f32.mrf.mxu1  ;;  %v1465_v28 = vadd.f32 %v3914_v45, %v1464_v19 }
 0x130   :  { %v3152_v23 = vpack.c.bf16 %v3485_v20, %v3481_v15  ;;  %v1217_v24 = vadd.f32 %v3914_v45, %v1216_v22  ;;  %v1096_v25 = vpop.f32.mrf.mxu0  ;;  %v3487_v30 = vpop.eup %3486 }
 0x131   :  { %3285 = vst [vmem:[%s4657_s3 + $0x1c8] sm:$0xff] %v3027_v21   ;;  %v1097_v26 = vadd.f32 %v3914_v45, %v1096_v25  ;;  %v3489_v35 = vpop.eup %3488 }
 0x132   :  { %3310 = vst [vmem:[%s4657_s3 + $0x290] sm:$0xff] %v3152_v23   ;;  %3490 = vtanh.f32 %v1217_v24 }
 0x133   :  { %3492 = vtanh.f32 %v1097_v26 }
 0x134   :  { %3494 = vtanh.f32 %v1340_v27 }
 0x135   :  { %v1341_v29 = vpop.f32.mrf.mxu2  ;;  %3496 = vtanh.f32 %v1465_v28 }
 0x136   :  { %v1342_v31 = vadd.f32 %v3914_v45, %v1341_v29  ;;  %v1466_v34 = vpop.f32.mrf.mxu3 }
 0x137   :  { %v1219_v36 = vpop.f32.mrf.mxu1  ;;  %v1467_v37 = vadd.f32 %v3914_v45, %v1466_v34  ;;  %v2706_v34 = vld [vmem:[%s4656_s0 + $0x228] sm:$0xff] }
 0x138   :  { %v3491_v40 = vpop.eup %3490  ;;  %3498 = vtanh.f32 %v1342_v31  ;;  %v1099_v41 = vpop.f32.mrf.mxu0  ;;  %v1220_v47 = vadd.f32 %v3914_v45, %v1219_v36 }
 0x139   :  { %v3493_v42 = vpop.eup %3492  ;;  %v2907_v43 = vpack.c.bf16 %v3491_v40, %v3487_v30  ;;  %3500 = vtanh.f32 %v1467_v37  ;;  %v1100_v50 = vadd.f32 %v3914_v45, %v1099_v41  ;;  %v2657_v40 = vld [vmem:[%s4656_s0 + $0xa0] sm:$0xff] }
 0x13a   :  { %2581 = vmatmul.msk.bf16.gmra.mxu1 %vm741_vm1, %v2679_v32  ;;  %2606 = vmatmul.msk.bf16.gmra.mxu2 %vm741_vm1, %v2704_v33  ;;  %v2787_v44 = vpack.c.bf16 %v3493_v42, %v3489_v35  ;;  %v3495_v46 = vpop.eup %3494  ;;  %3502 = vtanh.f32 %v1220_v47  ;;  %v2681_v33 = vld [vmem:[%s4656_s0 + $0x160] sm:$0xff] }
 0x13b   :  { %3261 = vst [vmem:[%s4657_s3 + $0x108] sm:$0xff] %v2907_v43   ;;  %2631 = vmatmul.msk.bf16.gmra.mxu3 %vm741_vm1, %v2729_v38  ;;  %2557 = vmatmul.msk.bf16.gmra.mxu0 %vm741_vm1, %v2655_v39  ;;  %v3497_v48 = vpop.eup %3496  ;;  %3504 = vtanh.f32 %v1100_v50  ;;  %v2731_v39 = vld [vmem:[%s4656_s0 + $0x2f0] sm:$0xff] }
 0x13c   :  { %3237 = vst [vmem:[%s4657_s3 + $0x48] sm:$0xff] %v2787_v44  }
 0x13d   :  { %v1344_v49 = vpop.f32.mrf.mxu2 }
 0x13e   :  { %v3499_v51 = vpop.eup %3498  ;;  %v1469_v52 = vpop.f32.mrf.mxu3  ;;  %v1345_v60 = vadd.f32 %v3914_v45, %v1344_v49 }
 0x13f   :  { %v3501_v53 = vpop.eup %3500  ;;  %v3032_v54 = vpack.c.bf16 %v3499_v51, %v3495_v46  ;;  %v1221_v55 = vpop.f32.mrf.mxu1  ;;  %v1470_v61 = vadd.f32 %v3914_v45, %v1469_v52 }
 0x140   :  { %v3157_v56 = vpack.c.bf16 %v3501_v53, %v3497_v48  ;;  %v1222_v57 = vadd.f32 %v3914_v45, %v1221_v55  ;;  %v1101_v58 = vpop.f32.mrf.mxu0  ;;  %v3503_v63 = vpop.eup %3502 }
 0x141   :  { %3286 = vst [vmem:[%s4657_s3 + $0x1d0] sm:$0xff] %v3032_v54   ;;  %v1102_v59 = vadd.f32 %v3914_v45, %v1101_v58  ;;  %v3505_v4 = vpop.eup %3504 }
 0x142   :  { %3311 = vst [vmem:[%s4657_s3 + $0x298] sm:$0xff] %v3157_v56   ;;  %3506 = vtanh.f32 %v1222_v57 }
 0x143   :  { %3508 = vtanh.f32 %v1102_v59 }
 0x144   :  { %3510 = vtanh.f32 %v1345_v60 }
 0x145   :  { %v1346_v62 = vpop.f32.mrf.mxu2  ;;  %3512 = vtanh.f32 %v1470_v61 }
 0x146   :  { %v1347_v0 = vadd.f32 %v3914_v45, %v1346_v62  ;;  %v1471_v3 = vpop.f32.mrf.mxu3 }
 0x147   :  { %v1224_v5 = vpop.f32.mrf.mxu1  ;;  %v1472_v6 = vadd.f32 %v3914_v45, %v1471_v3  ;;  %v2707_v3 = vld [vmem:[%s4656_s0 + $0x230] sm:$0xff] }
 0x148   :  { %v3507_v9 = vpop.eup %3506  ;;  %3514 = vtanh.f32 %v1347_v0  ;;  %v1104_v10 = vpop.f32.mrf.mxu0  ;;  %v1225_v15 = vadd.f32 %v4310_v14, %v1224_v5 }
 0x149   :  { %v3509_v11 = vpop.eup %3508  ;;  %v2912_v12 = vpack.c.bf16 %v3507_v9, %v3503_v63  ;;  %3516 = vtanh.f32 %v1472_v6  ;;  %v1105_v18 = vadd.f32 %v4310_v14, %v1104_v10  ;;  %v2658_v9 = vld [vmem:[%s4656_s0 + $0xa8] sm:$0xff] }
 0x14a   :  { %2582 = vmatmul.msk.bf16.gmra.mxu1 %vm741_vm1, %v2680_v1  ;;  %2607 = vmatmul.msk.bf16.gmra.mxu2 %vm741_vm1, %v2705_v2  ;;  %v2792_v13 = vpack.c.bf16 %v3509_v11, %v3505_v4  ;;  %v3511_v45 = vpop.eup %3510  ;;  %3518 = vtanh.f32 %v1225_v15  ;;  %v2682_v2 = vld [vmem:[%s4656_s0 + $0x168] sm:$0xff] }
 0x14b   :  { %3262 = vst [vmem:[%s4657_s3 + $0x110] sm:$0xff] %v2912_v12   ;;  %2632 = vmatmul.msk.bf16.gmra.mxu3 %vm741_vm1, %v2730_v7  ;;  %2558 = vmatmul.msk.bf16.gmra.mxu0 %vm741_vm1, %v2656_v8  ;;  %v3513_v16 = vpop.eup %3512  ;;  %3520 = vtanh.f32 %v1105_v18  ;;  %v2732_v8 = vld [vmem:[%s4656_s0 + $0x2f8] sm:$0xff] }
 0x14c   :  { %3238 = vst [vmem:[%s4657_s3 + $0x50] sm:$0xff] %v2792_v13  }
 0x14d   :  { %v1349_v17 = vpop.f32.mrf.mxu2 }
 0x14e   :  { %v3515_v19 = vpop.eup %3514  ;;  %v1474_v20 = vpop.f32.mrf.mxu3  ;;  %v1350_v28 = vadd.f32 %v4310_v14, %v1349_v17 }
 0x14f   :  { %v3517_v21 = vpop.eup %3516  ;;  %v3037_v22 = vpack.c.bf16 %v3515_v19, %v3511_v45  ;;  %v1226_v23 = vpop.f32.mrf.mxu1  ;;  %v1475_v29 = vadd.f32 %v4310_v14, %v1474_v20 }
 0x150   :  { %v3162_v24 = vpack.c.bf16 %v3517_v21, %v3513_v16  ;;  %v1227_v25 = vadd.f32 %v4310_v14, %v1226_v23  ;;  %v1106_v26 = vpop.f32.mrf.mxu0  ;;  %v3519_v31 = vpop.eup %3518 }
 0x151   :  { %3287 = vst [vmem:[%s4657_s3 + $0x1d8] sm:$0xff] %v3037_v22   ;;  %v1107_v27 = vadd.f32 %v4310_v14, %v1106_v26  ;;  %v3521_v36 = vpop.eup %3520 }
 0x152   :  { %3312 = vst [vmem:[%s4657_s3 + $0x2a0] sm:$0xff] %v3162_v24   ;;  %3522 = vtanh.f32 %v1227_v25 }
 0x153   :  { %3524 = vtanh.f32 %v1107_v27 }
 0x154   :  { %3526 = vtanh.f32 %v1350_v28 }
 0x155   :  { %v1351_v30 = vpop.f32.mrf.mxu2  ;;  %3528 = vtanh.f32 %v1475_v29 }
 0x156   :  { %v1352_v32 = vadd.f32 %v4310_v14, %v1351_v30  ;;  %v1476_v35 = vpop.f32.mrf.mxu3 }
 0x157   :  { %v1229_v37 = vpop.f32.mrf.mxu1  ;;  %v1477_v38 = vadd.f32 %v4310_v14, %v1476_v35  ;;  %v2708_v35 = vld [vmem:[%s4656_s0 + $0x238] sm:$0xff] }
 0x158   :  { %v3523_v41 = vpop.eup %3522  ;;  %3530 = vtanh.f32 %v1352_v32  ;;  %v1109_v42 = vpop.f32.mrf.mxu0  ;;  %v1230_v48 = vadd.f32 %v4310_v14, %v1229_v37 }
 0x159   :  { %v3525_v43 = vpop.eup %3524  ;;  %v2917_v44 = vpack.c.bf16 %v3523_v41, %v3519_v31  ;;  %3532 = vtanh.f32 %v1477_v38  ;;  %v1110_v51 = vadd.f32 %v4310_v14, %v1109_v42  ;;  %v2659_v41 = vld [vmem:[%s4656_s0 + $0xb0] sm:$0xff] }
 0x15a   :  { %2583 = vmatmul.msk.bf16.gmra.mxu1 %vm741_vm1, %v2681_v33  ;;  %2608 = vmatmul.msk.bf16.gmra.mxu2 %vm741_vm1, %v2706_v34  ;;  %v2797_v46 = vpack.c.bf16 %v3525_v43, %v3521_v36  ;;  %v3527_v47 = vpop.eup %3526  ;;  %3534 = vtanh.f32 %v1230_v48  ;;  %v2683_v34 = vld [vmem:[%s4656_s0 + $0x170] sm:$0xff] }
 0x15b   :  { %3263 = vst [vmem:[%s4657_s3 + $0x118] sm:$0xff] %v2917_v44   ;;  %2633 = vmatmul.msk.bf16.gmra.mxu3 %vm741_vm1, %v2731_v39  ;;  %2559 = vmatmul.msk.bf16.gmra.mxu0 %vm741_vm1, %v2657_v40  ;;  %v3529_v49 = vpop.eup %3528  ;;  %3536 = vtanh.f32 %v1110_v51  ;;  %v2733_v40 = vld [vmem:[%s4656_s0 + $0x300] sm:$0xff] }
 0x15c   :  { %3239 = vst [vmem:[%s4657_s3 + $0x58] sm:$0xff] %v2797_v46  }
 0x15d   :  { %v1354_v50 = vpop.f32.mrf.mxu2 }
 0x15e   :  { %v3531_v52 = vpop.eup %3530  ;;  %v1479_v53 = vpop.f32.mrf.mxu3  ;;  %v1355_v61 = vadd.f32 %v4310_v14, %v1354_v50 }
 0x15f   :  { %v3533_v54 = vpop.eup %3532  ;;  %v3042_v55 = vpack.c.bf16 %v3531_v52, %v3527_v47  ;;  %v1231_v56 = vpop.f32.mrf.mxu1  ;;  %v1480_v62 = vadd.f32 %v4310_v14, %v1479_v53 }
 0x160   :  { %v3167_v57 = vpack.c.bf16 %v3533_v54, %v3529_v49  ;;  %v1232_v58 = vadd.f32 %v4310_v14, %v1231_v56  ;;  %v1111_v59 = vpop.f32.mrf.mxu0  ;;  %v3535_v0 = vpop.eup %3534 }
 0x161   :  { %3288 = vst [vmem:[%s4657_s3 + $0x1e0] sm:$0xff] %v3042_v55   ;;  %v1112_v60 = vadd.f32 %v4310_v14, %v1111_v59  ;;  %v3537_v5 = vpop.eup %3536 }
 0x162   :  { %3313 = vst [vmem:[%s4657_s3 + $0x2a8] sm:$0xff] %v3167_v57   ;;  %3538 = vtanh.f32 %v1232_v58 }
 0x163   :  { %3540 = vtanh.f32 %v1112_v60 }
 0x164   :  { %3542 = vtanh.f32 %v1355_v61 }
 0x165   :  { %v1356_v63 = vpop.f32.mrf.mxu2  ;;  %3544 = vtanh.f32 %v1480_v62 }
 0x166   :  { %v1357_v1 = vadd.f32 %v4310_v14, %v1356_v63  ;;  %v1481_v4 = vpop.f32.mrf.mxu3 }
 0x167   :  { %v1234_v6 = vpop.f32.mrf.mxu1  ;;  %v1482_v7 = vadd.f32 %v4310_v14, %v1481_v4  ;;  %v2709_v4 = vld [vmem:[%s4656_s0 + $0x240] sm:$0xff] }
 0x168   :  { %v3539_v10 = vpop.eup %3538  ;;  %3546 = vtanh.f32 %v1357_v1  ;;  %v1114_v11 = vpop.f32.mrf.mxu0  ;;  %v1235_v16 = vadd.f32 %v4310_v14, %v1234_v6 }
 0x169   :  { %v3541_v12 = vpop.eup %3540  ;;  %v2922_v13 = vpack.c.bf16 %v3539_v10, %v3535_v0  ;;  %3548 = vtanh.f32 %v1482_v7  ;;  %v1115_v19 = vadd.f32 %v4310_v14, %v1114_v11  ;;  %v2660_v10 = vld [vmem:[%s4656_s0 + $0xb8] sm:$0xff] }
 0x16a   :  { %2584 = vmatmul.msk.bf16.gmra.mxu1 %vm741_vm1, %v2682_v2  ;;  %2609 = vmatmul.msk.bf16.gmra.mxu2 %vm741_vm1, %v2707_v3  ;;  %v2802_v45 = vpack.c.bf16 %v3541_v12, %v3537_v5  ;;  %v3543_v15 = vpop.eup %3542  ;;  %3550 = vtanh.f32 %v1235_v16  ;;  %v2684_v3 = vld [vmem:[%s4656_s0 + $0x178] sm:$0xff] }
 0x16b   :  { %3264 = vst [vmem:[%s4657_s3 + $0x120] sm:$0xff] %v2922_v13   ;;  %2634 = vmatmul.msk.bf16.gmra.mxu3 %vm741_vm1, %v2732_v8  ;;  %2560 = vmatmul.msk.bf16.gmra.mxu0 %vm741_vm1, %v2658_v9  ;;  %v3545_v17 = vpop.eup %3544  ;;  %3552 = vtanh.f32 %v1115_v19  ;;  %v2734_v9 = vld [vmem:[%s4656_s0 + $0x308] sm:$0xff] }
 0x16c   :  { %3240 = vst [vmem:[%s4657_s3 + $0x60] sm:$0xff] %v2802_v45  }
 0x16d   :  { %v1359_v18 = vpop.f32.mrf.mxu2 }
 0x16e   :  { %v3547_v20 = vpop.eup %3546  ;;  %v1484_v21 = vpop.f32.mrf.mxu3  ;;  %v1360_v29 = vadd.f32 %v4310_v14, %v1359_v18 }
 0x16f   :  { %v3549_v22 = vpop.eup %3548  ;;  %v3047_v23 = vpack.c.bf16 %v3547_v20, %v3543_v15  ;;  %v1236_v24 = vpop.f32.mrf.mxu1  ;;  %v1485_v30 = vadd.f32 %v4310_v14, %v1484_v21 }
 0x170   :  { %v3172_v25 = vpack.c.bf16 %v3549_v22, %v3545_v17  ;;  %v1237_v26 = vadd.f32 %v4310_v14, %v1236_v24  ;;  %v1116_v27 = vpop.f32.mrf.mxu0  ;;  %v3551_v32 = vpop.eup %3550 }
 0x171   :  { %3289 = vst [vmem:[%s4657_s3 + $0x1e8] sm:$0xff] %v3047_v23   ;;  %v1117_v28 = vadd.f32 %v4310_v14, %v1116_v27  ;;  %v3553_v37 = vpop.eup %3552 }
 0x172   :  { %3314 = vst [vmem:[%s4657_s3 + $0x2b0] sm:$0xff] %v3172_v25   ;;  %3554 = vtanh.f32 %v1237_v26 }
 0x173   :  { %3556 = vtanh.f32 %v1117_v28 }
 0x174   :  { %3558 = vtanh.f32 %v1360_v29 }
 0x175   :  { %v1361_v31 = vpop.f32.mrf.mxu2  ;;  %3560 = vtanh.f32 %v1485_v30 }
 0x176   :  { %v1362_v33 = vadd.f32 %v4310_v14, %v1361_v31  ;;  %v1486_v36 = vpop.f32.mrf.mxu3 }
 0x177   :  { %v1239_v38 = vpop.f32.mrf.mxu1  ;;  %v1487_v39 = vadd.f32 %v4310_v14, %v1486_v36  ;;  %v2710_v36 = vld [vmem:[%s4656_s0 + $0x248] sm:$0xff] }
 0x178   :  { %v3555_v42 = vpop.eup %3554  ;;  %3562 = vtanh.f32 %v1362_v33  ;;  %v1119_v43 = vpop.f32.mrf.mxu0  ;;  %v1240_v49 = vadd.f32 %v4310_v14, %v1239_v38 }
 0x179   :  { %v3557_v44 = vpop.eup %3556  ;;  %v2927_v46 = vpack.c.bf16 %v3555_v42, %v3551_v32  ;;  %3564 = vtanh.f32 %v1487_v39  ;;  %v1120_v52 = vadd.f32 %v4310_v14, %v1119_v43 }
 0x17a   :  { %2585 = vmatmul.msk.bf16.gmra.mxu1 %vm741_vm1, %v2683_v34  ;;  %2610 = vmatmul.msk.bf16.gmra.mxu2 %vm741_vm1, %v2708_v35  ;;  %v2807_v47 = vpack.c.bf16 %v3557_v44, %v3553_v37  ;;  %v3559_v48 = vpop.eup %3558  ;;  %3566 = vtanh.f32 %v1240_v49  ;;  %v2685_v35 = vld [vmem:[%s4656_s0 + $0x180] sm:$0xff] }
 0x17b   :  { %3265 = vst [vmem:[%s4657_s3 + $0x128] sm:$0xff] %v2927_v46   ;;  %2635 = vmatmul.msk.bf16.gmra.mxu3 %vm741_vm1, %v2733_v40  ;;  %2561 = vmatmul.msk.bf16.gmra.mxu0 %vm741_vm1, %v2659_v41  ;;  %v3561_v50 = vpop.eup %3560  ;;  %3568 = vtanh.f32 %v1120_v52 }
 0x17c   :  { %3241 = vst [vmem:[%s4657_s3 + $0x68] sm:$0xff] %v2807_v47  }
 0x17d   :  { %v1364_v51 = vpop.f32.mrf.mxu2 }
 0x17e   :  { %v3563_v53 = vpop.eup %3562  ;;  %v1489_v54 = vpop.f32.mrf.mxu3  ;;  %v1365_v62 = vadd.f32 %v4310_v14, %v1364_v51 }
 0x17f   :  { %v3565_v55 = vpop.eup %3564  ;;  %v3052_v56 = vpack.c.bf16 %v3563_v53, %v3559_v48  ;;  %v1241_v57 = vpop.f32.mrf.mxu1  ;;  %v1490_v63 = vadd.f32 %v4310_v14, %v1489_v54 }
 0x180   :  { %v3177_v58 = vpack.c.bf16 %v3565_v55, %v3561_v50  ;;  %v1242_v59 = vadd.f32 %v4310_v14, %v1241_v57  ;;  %v1121_v60 = vpop.f32.mrf.mxu0  ;;  %v3567_v1 = vpop.eup %3566 }
 0x181   :  { %3290 = vst [vmem:[%s4657_s3 + $0x1f0] sm:$0xff] %v3052_v56   ;;  %v1122_v61 = vadd.f32 %v4310_v14, %v1121_v60  ;;  %v3569_v6 = vpop.eup %3568 }
 0x182   :  { %3315 = vst [vmem:[%s4657_s3 + $0x2b8] sm:$0xff] %v3177_v58   ;;  %3570 = vtanh.f32 %v1242_v59 }
 0x183   :  { %3572 = vtanh.f32 %v1122_v61 }
 0x184   :  { %3574 = vtanh.f32 %v1365_v62 }
 0x185   :  { %v1366_v0 = vpop.f32.mrf.mxu2  ;;  %3576 = vtanh.f32 %v1490_v63 }
 0x186   :  { %v1367_v2 = vadd.f32 %v4310_v14, %v1366_v0  ;;  %v1491_v5 = vpop.f32.mrf.mxu3 }
 0x187   :  { %v1244_v7 = vpop.f32.mrf.mxu1  ;;  %v1492_v8 = vadd.f32 %v4310_v14, %v1491_v5 }
 0x188   :  { %v3571_v11 = vpop.eup %3570  ;;  %3578 = vtanh.f32 %v1367_v2  ;;  %v1124_v12 = vpop.f32.mrf.mxu0  ;;  %v1245_v17 = vadd.f32 %v4310_v14, %v1244_v7 }
 0x189   :  { %v3573_v13 = vpop.eup %3572  ;;  %v2932_v45 = vpack.c.bf16 %v3571_v11, %v3567_v1  ;;  %3580 = vtanh.f32 %v1492_v8  ;;  %v1125_v20 = vadd.f32 %v4310_v14, %v1124_v12 }
 0x18a   :  { %2586 = vmatmul.msk.bf16.gmra.mxu1 %vm741_vm1, %v2684_v3  ;;  %2611 = vmatmul.msk.bf16.gmra.mxu2 %vm741_vm1, %v2709_v4  ;;  %v2812_v15 = vpack.c.bf16 %v3573_v13, %v3569_v6  ;;  %v3575_v16 = vpop.eup %3574  ;;  %3582 = vtanh.f32 %v1245_v17 }
 0x18b   :  { %3266 = vst [vmem:[%s4657_s3 + $0x130] sm:$0xff] %v2932_v45   ;;  %2636 = vmatmul.msk.bf16.gmra.mxu3 %vm741_vm1, %v2734_v9  ;;  %2562 = vmatmul.msk.bf16.gmra.mxu0 %vm741_vm1, %v2660_v10  ;;  %v3577_v18 = vpop.eup %3576  ;;  %3584 = vtanh.f32 %v1125_v20 }
 0x18c   :  { %3242 = vst [vmem:[%s4657_s3 + $0x70] sm:$0xff] %v2812_v15  }
 0x18d   :  { %v1369_v19 = vpop.f32.mrf.mxu2 }
 0x18e   :  { %v3579_v21 = vpop.eup %3578  ;;  %v1494_v22 = vpop.f32.mrf.mxu3  ;;  %v1370_v30 = vadd.f32 %v4310_v14, %v1369_v19 }
 0x18f   :  { %v3581_v23 = vpop.eup %3580  ;;  %v3057_v24 = vpack.c.bf16 %v3579_v21, %v3575_v16  ;;  %v1246_v25 = vpop.f32.mrf.mxu1  ;;  %v1495_v31 = vadd.f32 %v4310_v14, %v1494_v22 }
 0x190   :  { %v3182_v26 = vpack.c.bf16 %v3581_v23, %v3577_v18  ;;  %v1247_v27 = vadd.f32 %v4310_v14, %v1246_v25  ;;  %v1126_v28 = vpop.f32.mrf.mxu0  ;;  %v3583_v33 = vpop.eup %3582 }
 0x191   :  { %3291 = vst [vmem:[%s4657_s3 + $0x1f8] sm:$0xff] %v3057_v24   ;;  %v1127_v29 = vadd.f32 %v4310_v14, %v1126_v28  ;;  %v3585_v38 = vpop.eup %3584 }
 0x192   :  { %3316 = vst [vmem:[%s4657_s3 + $0x2c0] sm:$0xff] %v3182_v26   ;;  %3586 = vtanh.f32 %v1247_v27 }
 0x193   :  { %3588 = vtanh.f32 %v1127_v29 }
 0x194   :  { %3590 = vtanh.f32 %v1370_v30 }
 0x195   :  { %v1371_v32 = vpop.f32.mrf.mxu2  ;;  %3592 = vtanh.f32 %v1495_v31 }
 0x196   :  { %v1372_v34 = vadd.f32 %v4310_v14, %v1371_v32  ;;  %v1496_v37 = vpop.f32.mrf.mxu3 }
 0x197   :  { %v1249_v39 = vpop.f32.mrf.mxu1  ;;  %v1497_v40 = vadd.f32 %v4310_v14, %v1496_v37 }
 0x198   :  { %v3587_v41 = vpop.eup %3586  ;;  %3594 = vtanh.f32 %v1372_v34  ;;  %v1129_v42 = vpop.f32.mrf.mxu0  ;;  %v1250_v48 = vadd.f32 %v4310_v14, %v1249_v39 }
 0x199   :  { %v3589_v43 = vpop.eup %3588  ;;  %v2937_v44 = vpack.c.bf16 %v3587_v41, %v3583_v33  ;;  %3596 = vtanh.f32 %v1497_v40  ;;  %v1130_v51 = vadd.f32 %v4310_v14, %v1129_v42 }
 0x19a   :  { %2587 = vmatmul.msk.bf16.gmra.mxu1 %vm741_vm1, %v2685_v35  ;;  %2612 = vmatmul.msk.bf16.gmra.mxu2 %vm741_vm1, %v2710_v36  ;;  %v2817_v46 = vpack.c.bf16 %v3589_v43, %v3585_v38  ;;  %v3591_v47 = vpop.eup %3590  ;;  %3598 = vtanh.f32 %v1250_v48 }
 0x19b   :  { %3267 = vst [vmem:[%s4657_s3 + $0x138] sm:$0xff] %v2937_v44   ;;  %v3593_v49 = vpop.eup %3592  ;;  %3600 = vtanh.f32 %v1130_v51 }
 0x19c   :  { %3243 = vst [vmem:[%s4657_s3 + $0x78] sm:$0xff] %v2817_v46  }
 0x19d   :  { %v1374_v50 = vpop.f32.mrf.mxu2 }
 0x19e   :  { %v3595_v52 = vpop.eup %3594  ;;  %v1499_v53 = vpop.f32.mrf.mxu3  ;;  %v1375_v61 = vadd.f32 %v4310_v14, %v1374_v50 }
 0x19f   :  { %v3597_v54 = vpop.eup %3596  ;;  %v3062_v55 = vpack.c.bf16 %v3595_v52, %v3591_v47  ;;  %v1251_v56 = vpop.f32.mrf.mxu1  ;;  %v1500_v62 = vadd.f32 %v4310_v14, %v1499_v53 }
 0x1a0   :  { %v3187_v57 = vpack.c.bf16 %v3597_v54, %v3593_v49  ;;  %v1252_v58 = vadd.f32 %v4310_v14, %v1251_v56  ;;  %v1131_v59 = vpop.f32.mrf.mxu0  ;;  %v3599_v0 = vpop.eup %3598 }
 0x1a1   :  { %3292 = vst [vmem:[%s4657_s3 + $0x200] sm:$0xff] %v3062_v55   ;;  %v1132_v60 = vadd.f32 %v4310_v14, %v1131_v59  ;;  %v3601_v3 = vpop.eup %3600 }
 0x1a2   :  { %3317 = vst [vmem:[%s4657_s3 + $0x2c8] sm:$0xff] %v3187_v57   ;;  %3602 = vtanh.f32 %v1252_v58 }
 0x1a3   :  { %3604 = vtanh.f32 %v1132_v60 }
 0x1a4   :  { %3606 = vtanh.f32 %v1375_v61 }
 0x1a5   :  { %v1376_v63 = vpop.f32.mrf.mxu2  ;;  %3608 = vtanh.f32 %v1500_v62 }
 0x1a6   :  { %v1377_v1 = vadd.f32 %v4310_v14, %v1376_v63  ;;  %v1501_v2 = vpop.f32.mrf.mxu3 }
 0x1a7   :  { %v1254_v4 = vpop.f32.mrf.mxu1  ;;  %v1502_v5 = vadd.f32 %v4310_v14, %v1501_v2 }
 0x1a8   :  { %v3603_v6 = vpop.eup %3602  ;;  %3610 = vtanh.f32 %v1377_v1  ;;  %v1134_v7 = vpop.f32.mrf.mxu0  ;;  %v1255_v12 = vadd.f32 %v4310_v14, %v1254_v4 }
 0x1a9   :  { %v3605_v8 = vpop.eup %3604  ;;  %v2942_v9 = vpack.c.bf16 %v3603_v6, %v3599_v0  ;;  %3612 = vtanh.f32 %v1502_v5  ;;  %v1135_v15 = vadd.f32 %v4310_v14, %v1134_v7 }
 0x1aa   :  { %v2822_v10 = vpack.c.bf16 %v3605_v8, %v3601_v3  ;;  %v3607_v11 = vpop.eup %3606  ;;  %3614 = vtanh.f32 %v1255_v12 }
 0x1ab   :  { %3268 = vst [vmem:[%s4657_s3 + $0x140] sm:$0xff] %v2942_v9   ;;  %v3609_v13 = vpop.eup %3608  ;;  %3616 = vtanh.f32 %v1135_v15 }
 0x1ac   :  { %3244 = vst [vmem:[%s4657_s3 + $0x80] sm:$0xff] %v2822_v10  }
 0x1ad   :  { %v1379_v45 = vpop.f32.mrf.mxu2 }
 0x1ae   :  { %v3611_v16 = vpop.eup %3610  ;;  %v1504_v17 = vpop.f32.mrf.mxu3  ;;  %v1380_v25 = vadd.f32 %v4310_v14, %v1379_v45 }
 0x1af   :  { %v3613_v18 = vpop.eup %3612  ;;  %v3067_v19 = vpack.c.bf16 %v3611_v16, %v3607_v11  ;;  %v1256_v20 = vpop.f32.mrf.mxu1  ;;  %v1505_v26 = vadd.f32 %v4310_v14, %v1504_v17 }
 0x1b0   :  { %v3192_v21 = vpack.c.bf16 %v3613_v18, %v3609_v13  ;;  %v1257_v22 = vadd.f32 %v4310_v14, %v1256_v20  ;;  %v1136_v23 = vpop.f32.mrf.mxu0  ;;  %v3615_v28 = vpop.eup %3614 }
 0x1b1   :  { %3293 = vst [vmem:[%s4657_s3 + $0x208] sm:$0xff] %v3067_v19   ;;  %v1137_v24 = vadd.f32 %v4310_v14, %v1136_v23  ;;  %v3617_v31 = vpop.eup %3616 }
 0x1b2   :  { %3318 = vst [vmem:[%s4657_s3 + $0x2d0] sm:$0xff] %v3192_v21   ;;  %3618 = vtanh.f32 %v1257_v22 }
 0x1b3   :  { %3620 = vtanh.f32 %v1137_v24 }
 0x1b4   :  { %3622 = vtanh.f32 %v1380_v25 }
 0x1b5   :  { %v1381_v27 = vpop.f32.mrf.mxu2  ;;  %3624 = vtanh.f32 %v1505_v26 }
 0x1b6   :  { %v1382_v29 = vadd.f32 %v4310_v14, %v1381_v27  ;;  %v1506_v30 = vpop.f32.mrf.mxu3 }
 0x1b7   :  { %v1259_v32 = vpop.f32.mrf.mxu1  ;;  %v1507_v33 = vadd.f32 %v4310_v14, %v1506_v30 }
 0x1b8   :  { %v3619_v34 = vpop.eup %3618  ;;  %3626 = vtanh.f32 %v1382_v29  ;;  %v1139_v35 = vpop.f32.mrf.mxu0  ;;  %v1260_v40 = vadd.f32 %v4310_v14, %v1259_v32 }
 0x1b9   :  { %v3621_v36 = vpop.eup %3620  ;;  %v2947_v37 = vpack.c.bf16 %v3619_v34, %v3615_v28  ;;  %3628 = vtanh.f32 %v1507_v33  ;;  %v1140_v43 = vadd.f32 %v4310_v14, %v1139_v35 }
 0x1ba   :  { %v2827_v38 = vpack.c.bf16 %v3621_v36, %v3617_v31  ;;  %v3623_v39 = vpop.eup %3622  ;;  %3630 = vtanh.f32 %v1260_v40 }
 0x1bb   :  { %3269 = vst [vmem:[%s4657_s3 + $0x148] sm:$0xff] %v2947_v37   ;;  %v3625_v41 = vpop.eup %3624  ;;  %3632 = vtanh.f32 %v1140_v43 }
 0x1bc   :  { %3245 = vst [vmem:[%s4657_s3 + $0x88] sm:$0xff] %v2827_v38  }
 0x1bd   :  { %v1384_v42 = vpop.f32.mrf.mxu2 }
 0x1be   :  { %v3627_v44 = vpop.eup %3626  ;;  %v1509_v46 = vpop.f32.mrf.mxu3  ;;  %v1385_v54 = vadd.f32 %v4310_v14, %v1384_v42 }
 0x1bf   :  { %v3629_v47 = vpop.eup %3628  ;;  %v3072_v48 = vpack.c.bf16 %v3627_v44, %v3623_v39  ;;  %v1261_v49 = vpop.f32.mrf.mxu1  ;;  %v1510_v55 = vadd.f32 %v4310_v14, %v1509_v46 }
 0x1c0   :  { %v3197_v50 = vpack.c.bf16 %v3629_v47, %v3625_v41  ;;  %v1262_v51 = vadd.f32 %v4310_v14, %v1261_v49  ;;  %v1141_v52 = vpop.f32.mrf.mxu0  ;;  %v3631_v57 = vpop.eup %3630 }
 0x1c1   :  { %3294 = vst [vmem:[%s4657_s3 + $0x210] sm:$0xff] %v3072_v48   ;;  %v1142_v53 = vadd.f32 %v4310_v14, %v1141_v52  ;;  %v3633_v60 = vpop.eup %3632 }
 0x1c2   :  { %3319 = vst [vmem:[%s4657_s3 + $0x2d8] sm:$0xff] %v3197_v50   ;;  %3634 = vtanh.f32 %v1262_v51 }
 0x1c3   :  { %3636 = vtanh.f32 %v1142_v53 }
 0x1c4   :  { %3638 = vtanh.f32 %v1385_v54 }
 0x1c5   :  { %v1386_v56 = vpop.f32.mrf.mxu2  ;;  %3640 = vtanh.f32 %v1510_v55 }
 0x1c6   :  { %v1387_v58 = vadd.f32 %v4310_v14, %v1386_v56  ;;  %v1511_v59 = vpop.f32.mrf.mxu3 }
 0x1c7   :  { %v1264_v61 = vpop.f32.mrf.mxu1  ;;  %v1512_v62 = vadd.f32 %v4310_v14, %v1511_v59 }
 0x1c8   :  { %v3635_v63 = vpop.eup %3634  ;;  %3642 = vtanh.f32 %v1387_v58  ;;  %v1144_v0 = vpop.f32.mrf.mxu0  ;;  %v1265_v5 = vadd.f32 %v4310_v14, %v1264_v61 }
 0x1c9   :  { %v3637_v1 = vpop.eup %3636  ;;  %v2952_v2 = vpack.c.bf16 %v3635_v63, %v3631_v57  ;;  %3644 = vtanh.f32 %v1512_v62  ;;  %v1145_v8 = vadd.f32 %v4310_v14, %v1144_v0 }
 0x1ca   :  { %v2832_v3 = vpack.c.bf16 %v3637_v1, %v3633_v60  ;;  %v3639_v4 = vpop.eup %3638  ;;  %3646 = vtanh.f32 %v1265_v5 }
 0x1cb   :  { %3270 = vst [vmem:[%s4657_s3 + $0x150] sm:$0xff] %v2952_v2   ;;  %v3641_v6 = vpop.eup %3640  ;;  %3648 = vtanh.f32 %v1145_v8 }
 0x1cc   :  { %3246 = vst [vmem:[%s4657_s3 + $0x90] sm:$0xff] %v2832_v3  }
 0x1cd   :  { %v1389_v7 = vpop.f32.mrf.mxu2 }
 0x1ce   :  { %v3643_v9 = vpop.eup %3642  ;;  %v1514_v10 = vpop.f32.mrf.mxu3  ;;  %v1390_v18 = vadd.f32 %v4310_v14, %v1389_v7 }
 0x1cf   :  { %v3645_v11 = vpop.eup %3644  ;;  %v3077_v12 = vpack.c.bf16 %v3643_v9, %v3639_v4  ;;  %v1266_v13 = vpop.f32.mrf.mxu1  ;;  %v1515_v19 = vadd.f32 %v4310_v14, %v1514_v10 }
 0x1d0   :  { %v3202_v45 = vpack.c.bf16 %v3645_v11, %v3641_v6  ;;  %v1267_v15 = vadd.f32 %v4310_v14, %v1266_v13  ;;  %v1146_v16 = vpop.f32.mrf.mxu0  ;;  %v3647_v21 = vpop.eup %3646 }
 0x1d1   :  { %3295 = vst [vmem:[%s4657_s3 + $0x218] sm:$0xff] %v3077_v12   ;;  %v1147_v17 = vadd.f32 %v4310_v14, %v1146_v16  ;;  %v3649_v24 = vpop.eup %3648 }
 0x1d2   :  { %3320 = vst [vmem:[%s4657_s3 + $0x2e0] sm:$0xff] %v3202_v45   ;;  %3650 = vtanh.f32 %v1267_v15 }
 0x1d3   :  { %3652 = vtanh.f32 %v1147_v17 }
 0x1d4   :  { %3654 = vtanh.f32 %v1390_v18 }
 0x1d5   :  { %v1391_v20 = vpop.f32.mrf.mxu2  ;;  %3656 = vtanh.f32 %v1515_v19 }
 0x1d6   :  { %v1392_v22 = vadd.f32 %v4310_v14, %v1391_v20  ;;  %v1516_v23 = vpop.f32.mrf.mxu3 }
 0x1d7   :  { %v1269_v25 = vpop.f32.mrf.mxu1  ;;  %v1517_v26 = vadd.f32 %v4310_v14, %v1516_v23 }
 0x1d8   :  { %v3651_v27 = vpop.eup %3650  ;;  %3658 = vtanh.f32 %v1392_v22  ;;  %v1149_v28 = vpop.f32.mrf.mxu0  ;;  %v1270_v33 = vadd.f32 %v4310_v14, %v1269_v25 }
 0x1d9   :  { %v3653_v29 = vpop.eup %3652  ;;  %v2957_v30 = vpack.c.bf16 %v3651_v27, %v3647_v21  ;;  %3660 = vtanh.f32 %v1517_v26  ;;  %v1150_v36 = vadd.f32 %v4310_v14, %v1149_v28 }
 0x1da   :  { %v2837_v31 = vpack.c.bf16 %v3653_v29, %v3649_v24  ;;  %v3655_v32 = vpop.eup %3654  ;;  %3662 = vtanh.f32 %v1270_v33 }
 0x1db   :  { %3271 = vst [vmem:[%s4657_s3 + $0x158] sm:$0xff] %v2957_v30   ;;  %v3657_v34 = vpop.eup %3656  ;;  %3664 = vtanh.f32 %v1150_v36 }
 0x1dc   :  { %3247 = vst [vmem:[%s4657_s3 + $0x98] sm:$0xff] %v2837_v31  }
 0x1dd   :  { %v1394_v35 = vpop.f32.mrf.mxu2 }
 0x1de   :  { %v3659_v37 = vpop.eup %3658  ;;  %v1519_v38 = vpop.f32.mrf.mxu3  ;;  %v1395_v47 = vadd.f32 %v4310_v14, %v1394_v35 }
 0x1df   :  { %v3661_v39 = vpop.eup %3660  ;;  %v3082_v40 = vpack.c.bf16 %v3659_v37, %v3655_v32  ;;  %v1271_v41 = vpop.f32.mrf.mxu1  ;;  %v1520_v48 = vadd.f32 %v4310_v14, %v1519_v38 }
 0x1e0   :  { %v3207_v42 = vpack.c.bf16 %v3661_v39, %v3657_v34  ;;  %v1272_v43 = vadd.f32 %v4310_v14, %v1271_v41  ;;  %v1151_v44 = vpop.f32.mrf.mxu0  ;;  %v3663_v50 = vpop.eup %3662 }
 0x1e1   :  { %3296 = vst [vmem:[%s4657_s3 + $0x220] sm:$0xff] %v3082_v40   ;;  %v1152_v46 = vadd.f32 %v4310_v14, %v1151_v44  ;;  %v3665_v53 = vpop.eup %3664 }
 0x1e2   :  { %3321 = vst [vmem:[%s4657_s3 + $0x2e8] sm:$0xff] %v3207_v42   ;;  %3666 = vtanh.f32 %v1272_v43 }
 0x1e3   :  { %3668 = vtanh.f32 %v1152_v46 }
 0x1e4   :  { %3670 = vtanh.f32 %v1395_v47 }
 0x1e5   :  { %v1396_v49 = vpop.f32.mrf.mxu2  ;;  %3672 = vtanh.f32 %v1520_v48 }
 0x1e6   :  { %v1397_v51 = vadd.f32 %v4310_v14, %v1396_v49  ;;  %v1521_v52 = vpop.f32.mrf.mxu3 }
 0x1e7   :  { %v1274_v54 = vpop.f32.mrf.mxu1  ;;  %v1522_v55 = vadd.f32 %v4310_v14, %v1521_v52 }
 0x1e8   :  { %v3667_v56 = vpop.eup %3666  ;;  %3674 = vtanh.f32 %v1397_v51  ;;  %v1154_v57 = vpop.f32.mrf.mxu0  ;;  %v1275_v62 = vadd.f32 %v4310_v14, %v1274_v54 }
 0x1e9   :  { %v3669_v58 = vpop.eup %3668  ;;  %v2962_v59 = vpack.c.bf16 %v3667_v56, %v3663_v50  ;;  %3676 = vtanh.f32 %v1522_v55  ;;  %v1155_v1 = vadd.f32 %v4310_v14, %v1154_v57  ;;  %v3735_v55 = vld [vmem:[%s4655_s2] ss:$0 sm:$0xff] }
 0x1ea   :  { %v2842_v60 = vpack.c.bf16 %v3669_v58, %v3665_v53  ;;  %v3671_v61 = vpop.eup %3670  ;;  %3678 = vtanh.f32 %v1275_v62 }
 0x1eb   :  { %3272 = vst [vmem:[%s4657_s3 + $0x160] sm:$0xff] %v2962_v59   ;;  %v3673_v63 = vpop.eup %3672  ;;  %3680 = vtanh.f32 %v1155_v1 }
 0x1ec   :  { %3248 = vst [vmem:[%s4657_s3 + $0xa0] sm:$0xff] %v2842_v60  }
 0x1ed   :  { %v1399_v0 = vpop.f32.mrf.mxu2 }
 0x1ee   :  { %v3675_v2 = vpop.eup %3674  ;;  %v1524_v3 = vpop.f32.mrf.mxu3  ;;  %v1400_v11 = vadd.f32 %v4310_v14, %v1399_v0 }
 0x1ef   :  { %v3677_v4 = vpop.eup %3676  ;;  %v3087_v5 = vpack.c.bf16 %v3675_v2, %v3671_v61  ;;  %v1276_v6 = vpop.f32.mrf.mxu1  ;;  %v1525_v12 = vadd.f32 %v4310_v14, %v1524_v3 }
 0x1f0   :  { %v3212_v7 = vpack.c.bf16 %v3677_v4, %v3673_v63  ;;  %v1277_v8 = vadd.f32 %v4310_v14, %v1276_v6  ;;  %v1156_v9 = vpop.f32.mrf.mxu0  ;;  %v3679_v45 = vpop.eup %3678 }
 0x1f1   :  { %3297 = vst [vmem:[%s4657_s3 + $0x228] sm:$0xff] %v3087_v5   ;;  %v1157_v10 = vadd.f32 %v4310_v14, %v1156_v9  ;;  %v3681_v17 = vpop.eup %3680 }
 0x1f2   :  { %3322 = vst [vmem:[%s4657_s3 + $0x2f0] sm:$0xff] %v3212_v7   ;;  %3682 = vtanh.f32 %v1277_v8 }
 0x1f3   :  { %3684 = vtanh.f32 %v1157_v10 }
 0x1f4   :  { %3686 = vtanh.f32 %v1400_v11 }
 0x1f5   :  { %v1401_v13 = vpop.f32.mrf.mxu2  ;;  %3688 = vtanh.f32 %v1525_v12 }
 0x1f6   :  { %v1402_v15 = vadd.f32 %v4310_v14, %v1401_v13  ;;  %v1526_v16 = vpop.f32.mrf.mxu3 }
 0x1f7   :  { %v1279_v18 = vpop.f32.mrf.mxu1  ;;  %v1527_v19 = vadd.f32 %v4310_v14, %v1526_v16 }
 0x1f8   :  { %v3683_v20 = vpop.eup %3682  ;;  %3690 = vtanh.f32 %v1402_v15  ;;  %v1159_v21 = vpop.f32.mrf.mxu0  ;;  %v1280_v26 = vadd.f32 %v4310_v14, %v1279_v18 }
 0x1f9   :  { %v3685_v22 = vpop.eup %3684  ;;  %v2967_v23 = vpack.c.bf16 %v3683_v20, %v3679_v45  ;;  %3692 = vtanh.f32 %v1527_v19  ;;  %v1160_v29 = vadd.f32 %v4310_v14, %v1159_v21 }
 0x1fa   :  { %v2847_v24 = vpack.c.bf16 %v3685_v22, %v3681_v17  ;;  %v3687_v25 = vpop.eup %3686  ;;  %3694 = vtanh.f32 %v1280_v26 }
 0x1fb   :  { %3273 = vst [vmem:[%s4657_s3 + $0x168] sm:$0xff] %v2967_v23   ;;  %v3689_v27 = vpop.eup %3688  ;;  %3696 = vtanh.f32 %v1160_v29 }
 0x1fc   :  { %3249 = vst [vmem:[%s4657_s3 + $0xa8] sm:$0xff] %v2847_v24  }
 0x1fd   :  { %v1404_v28 = vpop.f32.mrf.mxu2 }
 0x1fe   :  { %v3691_v30 = vpop.eup %3690  ;;  %v1529_v31 = vpop.f32.mrf.mxu3  ;;  %v1405_v39 = vadd.f32 %v4310_v14, %v1404_v28 }
 0x1ff   :  { %v3693_v32 = vpop.eup %3692  ;;  %v3092_v33 = vpack.c.bf16 %v3691_v30, %v3687_v25  ;;  %v1281_v34 = vpop.f32.mrf.mxu1  ;;  %v1530_v40 = vadd.f32 %v4310_v14, %v1529_v31 }
 0x200   :  { %v3217_v35 = vpack.c.bf16 %v3693_v32, %v3689_v27  ;;  %v1282_v36 = vadd.f32 %v4310_v14, %v1281_v34  ;;  %v1161_v37 = vpop.f32.mrf.mxu0  ;;  %v3695_v42 = vpop.eup %3694 }
 0x201   :  { %3298 = vst [vmem:[%s4657_s3 + $0x230] sm:$0xff] %v3092_v33   ;;  %v1162_v38 = vadd.f32 %v4310_v14, %v1161_v37  ;;  %v3697_v46 = vpop.eup %3696 }
 0x202   :  { %3323 = vst [vmem:[%s4657_s3 + $0x2f8] sm:$0xff] %v3217_v35   ;;  %3698 = vtanh.f32 %v1282_v36 }
 0x203   :  { %3700 = vtanh.f32 %v1162_v38 }
 0x204   :  { %3702 = vtanh.f32 %v1405_v39 }
 0x205   :  { %v1406_v41 = vpop.f32.mrf.mxu2  ;;  %3704 = vtanh.f32 %v1530_v40 }
 0x206   :  { %v1407_v43 = vadd.f32 %v4310_v14, %v1406_v41  ;;  %v1531_v44 = vpop.f32.mrf.mxu3 }
 0x207   :  { %v1284_v47 = vpop.f32.mrf.mxu1  ;;  %v1532_v48 = vadd.f32 %v4310_v14, %v1531_v44 }
 0x208   :  { %v3699_v49 = vpop.eup %3698  ;;  %3706 = vtanh.f32 %v1407_v43  ;;  %v1164_v50 = vpop.f32.mrf.mxu0  ;;  %v1285_v56 = vadd.f32 %v3735_v55, %v1284_v47 }
 0x209   :  { %v3701_v51 = vpop.eup %3700  ;;  %v2972_v52 = vpack.c.bf16 %v3699_v49, %v3695_v42  ;;  %3708 = vtanh.f32 %v1532_v48  ;;  %v1165_v58 = vadd.f32 %v3735_v55, %v1164_v50 }
 0x20a   :  { %v2852_v53 = vpack.c.bf16 %v3701_v51, %v3697_v46  ;;  %v3703_v54 = vpop.eup %3702  ;;  %3710 = vtanh.f32 %v1285_v56 }
 0x20b   :  { %3274 = vst [vmem:[%s4657_s3 + $0x170] sm:$0xff] %v2972_v52   ;;  %v3705_v14 = vpop.eup %3704  ;;  %3712 = vtanh.f32 %v1165_v58 }
 0x20c   :  { %3250 = vst [vmem:[%s4657_s3 + $0xb0] sm:$0xff] %v2852_v53  }
 0x20d   :  { %v1409_v57 = vpop.f32.mrf.mxu2 }
 0x20e   :  { %v3707_v59 = vpop.eup %3706  ;;  %v1534_v60 = vpop.f32.mrf.mxu3  ;;  %v1410_v4 = vadd.f32 %v3735_v55, %v1409_v57 }
 0x20f   :  { %v3709_v61 = vpop.eup %3708  ;;  %v3097_v62 = vpack.c.bf16 %v3707_v59, %v3703_v54  ;;  %v1286_v63 = vpop.f32.mrf.mxu1  ;;  %v1535_v5 = vadd.f32 %v3735_v55, %v1534_v60 }
 0x210   :  { %v3222_v0 = vpack.c.bf16 %v3709_v61, %v3705_v14  ;;  %v1287_v1 = vadd.f32 %v3735_v55, %v1286_v63  ;;  %v1166_v2 = vpop.f32.mrf.mxu0  ;;  %v3711_v7 = vpop.eup %3710 }
 0x211   :  { %3299 = vst [vmem:[%s4657_s3 + $0x238] sm:$0xff] %v3097_v62   ;;  %v1167_v3 = vadd.f32 %v3735_v55, %v1166_v2  ;;  %v3713_v10 = vpop.eup %3712 }
 0x212   :  { %3324 = vst [vmem:[%s4657_s3 + $0x300] sm:$0xff] %v3222_v0   ;;  %3714 = vtanh.f32 %v1287_v1 }
 0x213   :  { %3716 = vtanh.f32 %v1167_v3 }
 0x214   :  { %3718 = vtanh.f32 %v1410_v4 }
 0x215   :  { %v1411_v6 = vpop.f32.mrf.mxu2  ;;  %3720 = vtanh.f32 %v1535_v5 }
 0x216   :  { %v1412_v8 = vadd.f32 %v3735_v55, %v1411_v6  ;;  %v1536_v9 = vpop.f32.mrf.mxu3 }
 0x217   :  { %v1289_v11 = vpop.f32.mrf.mxu1  ;;  %v1537_v12 = vadd.f32 %v3735_v55, %v1536_v9 }
 0x218   :  { %v3715_v13 = vpop.eup %3714  ;;  %3722 = vtanh.f32 %v1412_v8  ;;  %v1290_v19 = vadd.f32 %v3735_v55, %v1289_v11 }
 0x219   :  { %v3717_v45 = vpop.eup %3716  ;;  %v2977_v15 = vpack.c.bf16 %v3715_v13, %v3711_v7  ;;  %3724 = vtanh.f32 %v1537_v12 }
 0x21a   :  { %v2857_v16 = vpack.c.bf16 %v3717_v45, %v3713_v10  ;;  %v3719_v17 = vpop.eup %3718  ;;  %3726 = vtanh.f32 %v1290_v19 }
 0x21b   :  { %3275 = vst [vmem:[%s4657_s3 + $0x178] sm:$0xff] %v2977_v15   ;;  %v3721_v18 = vpop.eup %3720 }
 0x21c   :  { %3251 = vst [vmem:[%s4657_s3 + $0xb8] sm:$0xff] %v2857_v16  }
 0x21d   :  { %v1414_v20 = vpop.f32.mrf.mxu2 }
 0x21e   :  { %v3723_v21 = vpop.eup %3722  ;;  %v1415_v27 = vadd.f32 %v3735_v55, %v1414_v20 }
 0x21f   :  { %v3725_v22 = vpop.eup %3724  ;;  %v3102_v23 = vpack.c.bf16 %v3723_v21, %v3719_v17  ;;  %v1291_v24 = vpop.f32.mrf.mxu1 }
 0x220   :  { %v3227_v25 = vpack.c.bf16 %v3725_v22, %v3721_v18  ;;  %v1292_v26 = vadd.f32 %v3735_v55, %v1291_v24  ;;  %v3727_v30 = vpop.eup %3726 }
 0x221   :  { %3300 = vst [vmem:[%s4657_s3 + $0x240] sm:$0xff] %v3102_v23  }
 0x222   :  { %3325 = vst [vmem:[%s4657_s3 + $0x308] sm:$0xff] %v3227_v25   ;;  %3728 = vtanh.f32 %v1292_v26 }
 0x223   :  { %3730 = vtanh.f32 %v1415_v27 }
 0x225   :  { %v1416_v28 = vpop.f32.mrf.mxu2 }
 0x226   :  { %v1417_v29 = vadd.f32 %v3735_v55, %v1416_v28 }
 0x228   :  { %v3729_v31 = vpop.eup %3728  ;;  %3732 = vtanh.f32 %v1417_v29 }
 0x229   :  { %v2982_v32 = vpack.c.bf16 %v3729_v31, %v3727_v30  ;;  %v3731_v33 = vpop.eup %3730 }
 0x22b   :  { %3276 = vst [vmem:[%s4657_s3 + $0x180] sm:$0xff] %v2982_v32  }
 0x22e   :  { %v3733_v34 = vpop.eup %3732 }
 0x22f   :  { %v3107_v35 = vpack.c.bf16 %v3733_v34, %v3731_v33 }
 0x231   :  { %3301 = vst [vmem:[%s4657_s3 + $0x248] sm:$0xff] %v3107_v35  }

</bundles_post_ra>
